<compile_context>
chip_gen: v5e
topology: v5e:2x2
jax: 0.10.0
libtpu: 0.0.40
codegen_flags: <defaults>
</compile_context>

<pallas_src>
import numpy as np

import jax
import jax.numpy as jnp
from jax.experimental import pallas as pl
from jax.experimental.pallas import tpu as pltpu

BN_EPS = 1e-5
VMEM_LIMIT_BYTES = 32 * 1024 * 1024   # actual resident use is ~4 MiB; safe on v5e/v6e/v7x


# ----------------------------------------------------------------------------
# The fused layer4 + mean-pool kernel (single grid point, everything in VMEM)
# ----------------------------------------------------------------------------
def _layer4_fused_kernel(
        x_ref, gs_ref, g1_ref, g23_ref, pool_ref,
        w11, s11, w12, s12, w13, s13, wd1, sd1,
        w21, s21, w22, s22, w23, s23,
        w31, s31, w32, s32, w33, s33,
        o_ref):
    f32 = jnp.float32
    bf16 = jnp.bfloat16

    def mm(a_bf16, w_ref, s_ref):
        # bf16 MXU matmul, f32 accumulation, + folded-BN shift (f32 epilogue)
        acc = jnp.dot(a_bf16, w_ref[...], preferred_element_type=f32)
        return acc + s_ref[...]

    def relu(v):
        return jnp.maximum(v, 0.0)

    def conv3x3(h_bf16, g_ref, w_ref, s_ref):
        # Implicit-GEMM 3x3 conv: 9 exact 0/1 tap-gather matmuls (zero rows = zero
        # padding), lane-concat into (M, 9*Cin) patches, one deep-K MXU GEMM.
        taps = [jnp.dot(g_ref[t], h_bf16, preferred_element_type=f32).astype(bf16)
                for t in range(9)]
        patches = jnp.concatenate(taps, axis=1)
        return mm(patches, w_ref, s_ref)

    x = x_ref[...]                                                 # (N*49, Cin) bf16

    # ---------------- bottleneck 1: stride 2, projection shortcut ------------
    h = relu(mm(x, w11, s11)).astype(bf16)                         # (N*49, 128)
    h = relu(conv3x3(h, g1_ref, w12, s12)).astype(bf16)            # (N*16, 128)
    xs = jnp.dot(gs_ref[...], x, preferred_element_type=f32).astype(bf16)  # stride-2 pick
    ident = mm(xs, wd1, sd1)                                       # (N*16, 512) f32
    y = relu(mm(h, w13, s13) + ident)                              # (N*16, 512) f32

    # ---------------- bottlenecks 2 & 3: identity shortcut -------------------
    for (w1, s1, w2, s2, w3, s3) in ((w21, s21, w22, s22, w23, s23),
                                     (w31, s31, w32, s32, w33, s33)):
        yb = y.astype(bf16)
        h = relu(mm(yb, w1, s1)).astype(bf16)                      # (N*16, 128)
        h = relu(conv3x3(h, g23_ref, w2, s2)).astype(bf16)         # (N*16, 128)
        y = relu(mm(h, w3, s3) + y)                                # (N*16, 512) f32

    # ---------------- global spatial mean pool (fused epilogue) --------------
    # pool_ref is (num_rois, N*16) with exact 1/16 entries -> y.mean(-1).mean(-1)
    o_ref[...] = jnp.dot(pool_ref[...], y.astype(bf16),
                         preferred_element_type=f32)               # (num_rois, 512) f32


# ----------------------------------------------------------------------------
# Forward wrapper: one XLA relayout + ONE pallas_call
# ----------------------------------------------------------------------------
@jax.jit
def pool_to_feature_vector_forward(rois_nchw, blocks, aux):
    n, c, h, w = rois_nchw.shape
    # TODO(synk): the NCHW->NHWC relayout + bf16 cast stays as one fused XLA op; an
    # in-kernel relayout would need per-image 2-D transposes for negligible gain here.
    x2d = jnp.transpose(rois_nchw, (0, 2, 3, 1)).reshape(n * h * w, c).astype(jnp.bfloat16)

    inputs = [x2d, aux["gs"], aux["g1"], aux["g23"], aux["pool"]]
    for p in blocks:
        inputs += [p["c1"]["w"], p["c1"]["shift"],
                   p["c2"]["w"], p["c2"]["shift"],
                   p["c3"]["w"], p["c3"]["shift"]]
        if "cd" in p:
            inputs += [p["cd"]["w"], p["cd"]["shift"]]

    cout = blocks[-1]["c3"]["w"].shape[1]
    in_specs = [pl.BlockSpec(a.shape, lambda i, nd=a.ndim: (0,) * nd) for a in inputs]

    return pl.pallas_call(
        _layer4_fused_kernel,
        out_shape=jax.ShapeDtypeStruct((n, cout), jnp.float32),
        grid=(1,),                                  # single TC pass; see header note
        in_specs=in_specs,
        out_specs=pl.BlockSpec((n, cout), lambda i: (0, 0)),
        compiler_params=pltpu.CompilerParams(
            dimension_semantics=("arbitrary",),
            vmem_limit_bytes=VMEM_LIMIT_BYTES),
    )(*inputs)


# ----------------------------------------------------------------------------
# Constant gather / subsample / pool matrices (exact 0/1 or 1/HW entries)
# ----------------------------------------------------------------------------
def _conv_gather_mats(n, h, w, ho, wo, stride, pad):
    """g[t, m, r] = 1 iff output pixel m=(n,oh,ow) reads input pixel r=(n,ih,iw) for
    tap t=(di,dj) of a 3x3 conv; out-of-bounds taps are all-zero rows (= zero pad)."""
    g = np.zeros((9, n * ho * wo, n * h * w), np.float32)
    for di in range(3):
        for dj in range(3):
            t = di * 3 + dj
            for ni in range(n):
                for oh in range(ho):
                    ih = oh * stride + di - pad
                    if not 0 <= ih < h:
                        continue
                    for ow in range(wo):
                        iw = ow * stride + dj - pad
                        if not 0 <= iw < w:
                            continue
                        g[t, ni * ho * wo + oh * wo + ow, ni * h * w + ih * w + iw] = 1.0
    return jnp.asarray(g, jnp.bfloat16)


def _subsample_mat(n, h, w, stride):
    """Exact row-selection matrix for a 1x1 stride-`stride` conv (no padding)."""
    ho = (h - 1) // stride + 1
    wo = (w - 1) // stride + 1
    s = np.zeros((n * ho * wo, n * h * w), np.float32)
    for ni in range(n):
        for oh in range(ho):
            for ow in range(wo):
                s[ni * ho * wo + oh * wo + ow,
                  ni * h * w + (oh * stride) * w + ow * stride] = 1.0
    return jnp.asarray(s, jnp.bfloat16), ho, wo


def _pool_mat(n, hw):
    p = np.zeros((n, n * hw), np.float32)
    for ni in range(n):
        p[ni, ni * hw:(ni + 1) * hw] = 1.0 / hw   # 1/16 is exact in bf16
    return jnp.asarray(p, jnp.bfloat16)


def build_aux(num_rois, h, w):
    gs, ho, wo = _subsample_mat(num_rois, h, w, stride=2)
    return {
        "gs": gs,                                                    # (N*16, N*49)
        "g1": _conv_gather_mats(num_rois, h, w, ho, wo, 2, 1),       # (9, N*16, N*49)
        "g23": _conv_gather_mats(num_rois, ho, wo, ho, wo, 1, 1),    # (9, N*16, N*16)
        "pool": _pool_mat(num_rois, ho * wo),                        # (N, N*16)
    }


# ----------------------------------------------------------------------------
# Deterministic parameters (inference BN folded: scale into weights, shift kept)
# ----------------------------------------------------------------------------
class ParamGen:
    def __init__(self, seed=42):
        self.key = jax.random.PRNGKey(seed)

    def _next(self):
        self.key, sub = jax.random.split(self.key)
        return sub

    def conv_bn(self, kh, kw, cin, cout):
        w = jax.random.normal(self._next(), (kh, kw, cin, cout), jnp.float32)
        w = w * (2.0 / (kh * kw * cin)) ** 0.5
        gamma = 1.0 + 0.1 * jax.random.normal(self._next(), (cout,), jnp.float32)
        beta = 0.1 * jax.random.normal(self._next(), (cout,), jnp.float32)
        mean = 0.1 * jax.random.normal(self._next(), (cout,), jnp.float32)
        var = 1.0 + 0.1 * jax.random.uniform(self._next(), (cout,), jnp.float32)
        scale = gamma / jnp.sqrt(var + BN_EPS)
        shift = beta - mean * scale
        w_folded = (w * scale).astype(jnp.bfloat16)          # HWIO, BN scale folded in
        return {"w": w_folded.reshape(kh * kw * cin, cout),  # (di,dj,ci)-major GEMM layout
                "w_hwio": w_folded,                          # for the XLA reference only
                "shift": shift.reshape(1, cout)}


def build_layer4_params(cin=256, planes=128, nblocks=3):
    pg = ParamGen(42)
    blocks = []
    for bi in range(nblocks):
        s = 2 if bi == 0 else 1
        p = {"c1": pg.conv_bn(1, 1, cin, planes),
             "c2": pg.conv_bn(3, 3, planes, planes),
             "c3": pg.conv_bn(1, 1, planes, planes * 4)}
        if s != 1 or cin != planes * 4:
            p["cd"] = pg.conv_bn(1, 1, cin, planes * 4)
        blocks.append(p)
        cin = planes * 4
    return blocks


# ----------------------------------------------------------------------------
# Pure-XLA f32 reference (same folded bf16 weights) for a correctness check
# ----------------------------------------------------------------------------
def reference_forward(rois_nchw, blocks):
    x = rois_nchw.astype(jnp.bfloat16).astype(jnp.float32)  # same input rounding as kernel

    def conv(inp, p, stride, ksize):
        pad = (ksize - 1) // 2
        y = jax.lax.conv_general_dilated(
            inp, p["w_hwio"].astype(jnp.float32),
            window_strides=(stride, stride),
            padding=[(pad, pad), (pad, pad)],
            dimension_numbers=("NCHW", "HWIO", "NCHW"),
            precision=jax.lax.Precision.HIGHEST)
        return y + p["shift"].astype(jnp.float32).reshape(1, -1, 1, 1)

    for p in blocks:
        stride = 2 if "cd" in p else 1
        identity = conv(x, p["cd"], stride, 1) if "cd" in p else x
        h = jax.nn.relu(conv(x, p["c1"], 1, 1))
        h = jax.nn.relu(conv(h, p["c2"], stride, 3))
        x = jax.nn.relu(conv(h, p["c3"], 1, 1) + identity)
    return x.mean(axis=(2, 3))


if __name__ == "__main__":
    key = jax.random.PRNGKey(0)
    num_rois, cin, hw = 2, 256, 7
    # RoI-pooled features: (num_rois, C, 7, 7) -- channels scaled down 4x vs real layer4
    rois = jax.random.normal(key, (num_rois, cin, hw, hw), jnp.float32)

    blocks = build_layer4_params(cin=cin, planes=128, nblocks=3)
    aux = build_aux(num_rois, hw, hw)

    y = pool_to_feature_vector_forward(rois, blocks, aux)
    y = jax.block_until_ready(y)

    # 7x7 -> (layer4 stride 2) -> 4x4 -> spatial mean -> (num_rois, planes*4)
    assert y.shape == (num_rois, 512), y.shape
    assert bool(jnp.all(jnp.isfinite(y)))

    # Cross-check against a pure-XLA f32 conv reference (only bf16 activation rounding
    # inside the fused kernel should differ).
    y_ref = reference_forward(rois, blocks)
    rel = float(jnp.max(jnp.abs(y - y_ref)) / (jnp.max(jnp.abs(y_ref)) + 1e-6))
    assert rel < 0.08, f"kernel vs reference relative error too large: {rel}"

    print("KERNEL_OK")
</pallas_src>

<mosaic_0001>
module attributes {stable_mosaic.version = 11 : i64} {
  func.func @_layer4_fused_kernel(%arg0: i32, %arg1: memref<98x256xbf16, #tpu.memory_space<vmem>>, %arg2: memref<32x98xbf16, #tpu.memory_space<vmem>>, %arg3: memref<9x32x98xbf16, #tpu.memory_space<vmem>>, %arg4: memref<9x32x32xbf16, #tpu.memory_space<vmem>>, %arg5: memref<2x32xbf16, #tpu.memory_space<vmem>>, %arg6: memref<256x128xbf16, #tpu.memory_space<vmem>>, %arg7: memref<1x128xf32, #tpu.memory_space<vmem>>, %arg8: memref<1152x128xbf16, #tpu.memory_space<vmem>>, %arg9: memref<1x128xf32, #tpu.memory_space<vmem>>, %arg10: memref<128x512xbf16, #tpu.memory_space<vmem>>, %arg11: memref<1x512xf32, #tpu.memory_space<vmem>>, %arg12: memref<256x512xbf16, #tpu.memory_space<vmem>>, %arg13: memref<1x512xf32, #tpu.memory_space<vmem>>, %arg14: memref<512x128xbf16, #tpu.memory_space<vmem>>, %arg15: memref<1x128xf32, #tpu.memory_space<vmem>>, %arg16: memref<1152x128xbf16, #tpu.memory_space<vmem>>, %arg17: memref<1x128xf32, #tpu.memory_space<vmem>>, %arg18: memref<128x512xbf16, #tpu.memory_space<vmem>>, %arg19: memref<1x512xf32, #tpu.memory_space<vmem>>, %arg20: memref<512x128xbf16, #tpu.memory_space<vmem>>, %arg21: memref<1x128xf32, #tpu.memory_space<vmem>>, %arg22: memref<1152x128xbf16, #tpu.memory_space<vmem>>, %arg23: memref<1x128xf32, #tpu.memory_space<vmem>>, %arg24: memref<128x512xbf16, #tpu.memory_space<vmem>>, %arg25: memref<1x512xf32, #tpu.memory_space<vmem>>, %arg26: memref<2x512xf32, #tpu.memory_space<vmem>>) attributes {dimension_semantics = [#tpu.dimension_semantics<arbitrary>], iteration_bounds = array<i64: 1>, scalar_prefetch = 0 : i64, scratch_operands = 0 : i64, tpu.core_type = #tpu.core_type<tc>, window_params = [{pipeline_mode = #tpu.pipeline_mode<synchronous>, transform_indices = @transform_0, window_bounds = array<i64: 98, 256>}, {pipeline_mode = #tpu.pipeline_mode<synchronous>, transform_indices = @transform_1, window_bounds = array<i64: 32, 98>}, {pipeline_mode = #tpu.pipeline_mode<synchronous>, transform_indices = @transform_2, window_bounds = array<i64: 9, 32, 98>}, {pipeline_mode = #tpu.pipeline_mode<synchronous>, transform_indices = @transform_3, window_bounds = array<i64: 9, 32, 32>}, {pipeline_mode = #tpu.pipeline_mode<synchronous>, transform_indices = @transform_4, window_bounds = array<i64: 2, 32>}, {pipeline_mode = #tpu.pipeline_mode<synchronous>, transform_indices = @transform_5, window_bounds = array<i64: 256, 128>}, {pipeline_mode = #tpu.pipeline_mode<synchronous>, transform_indices = @transform_6, window_bounds = array<i64: 1, 128>}, {pipeline_mode = #tpu.pipeline_mode<synchronous>, transform_indices = @transform_7, window_bounds = array<i64: 1152, 128>}, {pipeline_mode = #tpu.pipeline_mode<synchronous>, transform_indices = @transform_8, window_bounds = array<i64: 1, 128>}, {pipeline_mode = #tpu.pipeline_mode<synchronous>, transform_indices = @transform_9, window_bounds = array<i64: 128, 512>}, {pipeline_mode = #tpu.pipeline_mode<synchronous>, transform_indices = @transform_10, window_bounds = array<i64: 1, 512>}, {pipeline_mode = #tpu.pipeline_mode<synchronous>, transform_indices = @transform_11, window_bounds = array<i64: 256, 512>}, {pipeline_mode = #tpu.pipeline_mode<synchronous>, transform_indices = @transform_12, window_bounds = array<i64: 1, 512>}, {pipeline_mode = #tpu.pipeline_mode<synchronous>, transform_indices = @transform_13, window_bounds = array<i64: 512, 128>}, {pipeline_mode = #tpu.pipeline_mode<synchronous>, transform_indices = @transform_14, window_bounds = array<i64: 1, 128>}, {pipeline_mode = #tpu.pipeline_mode<synchronous>, transform_indices = @transform_15, window_bounds = array<i64: 1152, 128>}, {pipeline_mode = #tpu.pipeline_mode<synchronous>, transform_indices = @transform_16, window_bounds = array<i64: 1, 128>}, {pipeline_mode = #tpu.pipeline_mode<synchronous>, transform_indices = @transform_17, window_bounds = array<i64: 128, 512>}, {pipeline_mode = #tpu.pipeline_mode<synchronous>, transform_indices = @transform_18, window_bounds = array<i64: 1, 512>}, {pipeline_mode = #tpu.pipeline_mode<synchronous>, transform_indices = @transform_19, window_bounds = array<i64: 512, 128>}, {pipeline_mode = #tpu.pipeline_mode<synchronous>, transform_indices = @transform_20, window_bounds = array<i64: 1, 128>}, {pipeline_mode = #tpu.pipeline_mode<synchronous>, transform_indices = @transform_21, window_bounds = array<i64: 1152, 128>}, {pipeline_mode = #tpu.pipeline_mode<synchronous>, transform_indices = @transform_22, window_bounds = array<i64: 1, 128>}, {pipeline_mode = #tpu.pipeline_mode<synchronous>, transform_indices = @transform_23, window_bounds = array<i64: 128, 512>}, {pipeline_mode = #tpu.pipeline_mode<synchronous>, transform_indices = @transform_24, window_bounds = array<i64: 1, 512>}, {pipeline_mode = #tpu.pipeline_mode<synchronous>, transform_indices = @transform_25, window_bounds = array<i64: 2, 512>}]} {
    %c0 = arith.constant 0 : index
    %c0_0 = arith.constant 0 : index
    %0 = vector.load %arg1[%c0, %c0_0] : memref<98x256xbf16, #tpu.memory_space<vmem>>, vector<98x256xbf16>
    %c0_1 = arith.constant 0 : index
    %c0_2 = arith.constant 0 : index
    %1 = vector.load %arg6[%c0_1, %c0_2] : memref<256x128xbf16, #tpu.memory_space<vmem>>, vector<256x128xbf16>
    %cst = arith.constant dense<0.000000e+00> : vector<98x128xf32>
    %2 = tpu.matmul %0, %1, %cst {dimension_numbers = #tpu.dot_dimension_numbers<[1], [0], [0], [1], [0, 0, 1, 1], [], []>} : vector<98x256xbf16>, vector<256x128xbf16>, vector<98x128xf32> -> vector<98x128xf32>
    %c0_3 = arith.constant 0 : index
    %c0_4 = arith.constant 0 : index
    %3 = vector.load %arg7[%c0_3, %c0_4] : memref<1x128xf32, #tpu.memory_space<vmem>>, vector<1x128xf32>
    %4 = vector.broadcast %3 : vector<1x128xf32> to vector<98x128xf32>
    %5 = arith.addf %2, %4 : vector<98x128xf32>
    %cst_5 = arith.constant 0.000000e+00 : f32
    %6 = vector.broadcast %cst_5 : f32 to vector<98x128xf32>
    %7 = arith.maximumf %5, %6 : vector<98x128xf32>
    %8 = arith.truncf %7 : vector<98x128xf32> to vector<98x128xbf16>
    %c0_6 = arith.constant 0 : index
    %c0_7 = arith.constant 0 : index
    %c0_8 = arith.constant 0 : index
    %9 = vector.load %arg3[%c0_6, %c0_7, %c0_8] : memref<9x32x98xbf16, #tpu.memory_space<vmem>>, vector<1x32x98xbf16>
    %10 = vector.shape_cast %9 : vector<1x32x98xbf16> to vector<32x98xbf16>
    %cst_9 = arith.constant dense<0.000000e+00> : vector<32x128xf32>
    %11 = tpu.matmul %10, %8, %cst_9 {dimension_numbers = #tpu.dot_dimension_numbers<[1], [0], [0], [1], [0, 0, 1, 1], [], []>} : vector<32x98xbf16>, vector<98x128xbf16>, vector<32x128xf32> -> vector<32x128xf32>
    %12 = arith.truncf %11 : vector<32x128xf32> to vector<32x128xbf16>
    %c1 = arith.constant 1 : index
    %c0_10 = arith.constant 0 : index
    %c0_11 = arith.constant 0 : index
    %13 = vector.load %arg3[%c1, %c0_10, %c0_11] : memref<9x32x98xbf16, #tpu.memory_space<vmem>>, vector<1x32x98xbf16>
    %14 = vector.shape_cast %13 : vector<1x32x98xbf16> to vector<32x98xbf16>
    %cst_12 = arith.constant dense<0.000000e+00> : vector<32x128xf32>
    %15 = tpu.matmul %14, %8, %cst_12 {dimension_numbers = #tpu.dot_dimension_numbers<[1], [0], [0], [1], [0, 0, 1, 1], [], []>} : vector<32x98xbf16>, vector<98x128xbf16>, vector<32x128xf32> -> vector<32x128xf32>
    %16 = arith.truncf %15 : vector<32x128xf32> to vector<32x128xbf16>
    %c2 = arith.constant 2 : index
    %c0_13 = arith.constant 0 : index
    %c0_14 = arith.constant 0 : index
    %17 = vector.load %arg3[%c2, %c0_13, %c0_14] : memref<9x32x98xbf16, #tpu.memory_space<vmem>>, vector<1x32x98xbf16>
    %18 = vector.shape_cast %17 : vector<1x32x98xbf16> to vector<32x98xbf16>
    %cst_15 = arith.constant dense<0.000000e+00> : vector<32x128xf32>
    %19 = tpu.matmul %18, %8, %cst_15 {dimension_numbers = #tpu.dot_dimension_numbers<[1], [0], [0], [1], [0, 0, 1, 1], [], []>} : vector<32x98xbf16>, vector<98x128xbf16>, vector<32x128xf32> -> vector<32x128xf32>
    %20 = arith.truncf %19 : vector<32x128xf32> to vector<32x128xbf16>
    %c3 = arith.constant 3 : index
    %c0_16 = arith.constant 0 : index
    %c0_17 = arith.constant 0 : index
    %21 = vector.load %arg3[%c3, %c0_16, %c0_17] : memref<9x32x98xbf16, #tpu.memory_space<vmem>>, vector<1x32x98xbf16>
    %22 = vector.shape_cast %21 : vector<1x32x98xbf16> to vector<32x98xbf16>
    %cst_18 = arith.constant dense<0.000000e+00> : vector<32x128xf32>
    %23 = tpu.matmul %22, %8, %cst_18 {dimension_numbers = #tpu.dot_dimension_numbers<[1], [0], [0], [1], [0, 0, 1, 1], [], []>} : vector<32x98xbf16>, vector<98x128xbf16>, vector<32x128xf32> -> vector<32x128xf32>
    %24 = arith.truncf %23 : vector<32x128xf32> to vector<32x128xbf16>
    %c4 = arith.constant 4 : index
    %c0_19 = arith.constant 0 : index
    %c0_20 = arith.constant 0 : index
    %25 = vector.load %arg3[%c4, %c0_19, %c0_20] : memref<9x32x98xbf16, #tpu.memory_space<vmem>>, vector<1x32x98xbf16>
    %26 = vector.shape_cast %25 : vector<1x32x98xbf16> to vector<32x98xbf16>
    %cst_21 = arith.constant dense<0.000000e+00> : vector<32x128xf32>
    %27 = tpu.matmul %26, %8, %cst_21 {dimension_numbers = #tpu.dot_dimension_numbers<[1], [0], [0], [1], [0, 0, 1, 1], [], []>} : vector<32x98xbf16>, vector<98x128xbf16>, vector<32x128xf32> -> vector<32x128xf32>
    %28 = arith.truncf %27 : vector<32x128xf32> to vector<32x128xbf16>
    %c5 = arith.constant 5 : index
    %c0_22 = arith.constant 0 : index
    %c0_23 = arith.constant 0 : index
    %29 = vector.load %arg3[%c5, %c0_22, %c0_23] : memref<9x32x98xbf16, #tpu.memory_space<vmem>>, vector<1x32x98xbf16>
    %30 = vector.shape_cast %29 : vector<1x32x98xbf16> to vector<32x98xbf16>
    %cst_24 = arith.constant dense<0.000000e+00> : vector<32x128xf32>
    %31 = tpu.matmul %30, %8, %cst_24 {dimension_numbers = #tpu.dot_dimension_numbers<[1], [0], [0], [1], [0, 0, 1, 1], [], []>} : vector<32x98xbf16>, vector<98x128xbf16>, vector<32x128xf32> -> vector<32x128xf32>
    %32 = arith.truncf %31 : vector<32x128xf32> to vector<32x128xbf16>
    %c6 = arith.constant 6 : index
    %c0_25 = arith.constant 0 : index
    %c0_26 = arith.constant 0 : index
    %33 = vector.load %arg3[%c6, %c0_25, %c0_26] : memref<9x32x98xbf16, #tpu.memory_space<vmem>>, vector<1x32x98xbf16>
    %34 = vector.shape_cast %33 : vector<1x32x98xbf16> to vector<32x98xbf16>
    %cst_27 = arith.constant dense<0.000000e+00> : vector<32x128xf32>
    %35 = tpu.matmul %34, %8, %cst_27 {dimension_numbers = #tpu.dot_dimension_numbers<[1], [0], [0], [1], [0, 0, 1, 1], [], []>} : vector<32x98xbf16>, vector<98x128xbf16>, vector<32x128xf32> -> vector<32x128xf32>
    %36 = arith.truncf %35 : vector<32x128xf32> to vector<32x128xbf16>
    %c7 = arith.constant 7 : index
    %c0_28 = arith.constant 0 : index
    %c0_29 = arith.constant 0 : index
    %37 = vector.load %arg3[%c7, %c0_28, %c0_29] : memref<9x32x98xbf16, #tpu.memory_space<vmem>>, vector<1x32x98xbf16>
    %38 = vector.shape_cast %37 : vector<1x32x98xbf16> to vector<32x98xbf16>
    %cst_30 = arith.constant dense<0.000000e+00> : vector<32x128xf32>
    %39 = tpu.matmul %38, %8, %cst_30 {dimension_numbers = #tpu.dot_dimension_numbers<[1], [0], [0], [1], [0, 0, 1, 1], [], []>} : vector<32x98xbf16>, vector<98x128xbf16>, vector<32x128xf32> -> vector<32x128xf32>
    %40 = arith.truncf %39 : vector<32x128xf32> to vector<32x128xbf16>
    %c8 = arith.constant 8 : index
    %c0_31 = arith.constant 0 : index
    %c0_32 = arith.constant 0 : index
    %41 = vector.load %arg3[%c8, %c0_31, %c0_32] : memref<9x32x98xbf16, #tpu.memory_space<vmem>>, vector<1x32x98xbf16>
    %42 = vector.shape_cast %41 : vector<1x32x98xbf16> to vector<32x98xbf16>
    %cst_33 = arith.constant dense<0.000000e+00> : vector<32x128xf32>
    %43 = tpu.matmul %42, %8, %cst_33 {dimension_numbers = #tpu.dot_dimension_numbers<[1], [0], [0], [1], [0, 0, 1, 1], [], []>} : vector<32x98xbf16>, vector<98x128xbf16>, vector<32x128xf32> -> vector<32x128xf32>
    %44 = arith.truncf %43 : vector<32x128xf32> to vector<32x128xbf16>
    %45 = tpu.concatenate %12, %16, %20, %24, %28, %32, %36, %40, %44 in 1 : vector<32x128xbf16>, vector<32x128xbf16>, vector<32x128xbf16>, vector<32x128xbf16>, vector<32x128xbf16>, vector<32x128xbf16>, vector<32x128xbf16>, vector<32x128xbf16>, vector<32x128xbf16> -> vector<32x1152xbf16>
    %c0_34 = arith.constant 0 : index
    %c0_35 = arith.constant 0 : index
    %46 = vector.load %arg8[%c0_34, %c0_35] : memref<1152x128xbf16, #tpu.memory_space<vmem>>, vector<1152x128xbf16>
    %cst_36 = arith.constant dense<0.000000e+00> : vector<32x128xf32>
    %47 = tpu.matmul %45, %46, %cst_36 {dimension_numbers = #tpu.dot_dimension_numbers<[1], [0], [0], [1], [0, 0, 1, 1], [], []>} : vector<32x1152xbf16>, vector<1152x128xbf16>, vector<32x128xf32> -> vector<32x128xf32>
    %c0_37 = arith.constant 0 : index
    %c0_38 = arith.constant 0 : index
    %48 = vector.load %arg9[%c0_37, %c0_38] : memref<1x128xf32, #tpu.memory_space<vmem>>, vector<1x128xf32>
    %49 = vector.broadcast %48 : vector<1x128xf32> to vector<32x128xf32>
    %50 = arith.addf %47, %49 : vector<32x128xf32>
    %cst_39 = arith.constant 0.000000e+00 : f32
    %51 = vector.broadcast %cst_39 : f32 to vector<32x128xf32>
    %52 = arith.maximumf %50, %51 : vector<32x128xf32>
    %53 = arith.truncf %52 : vector<32x128xf32> to vector<32x128xbf16>
    %c0_40 = arith.constant 0 : index
    %c0_41 = arith.constant 0 : index
    %54 = vector.load %arg2[%c0_40, %c0_41] : memref<32x98xbf16, #tpu.memory_space<vmem>>, vector<32x98xbf16>
    %cst_42 = arith.constant dense<0.000000e+00> : vector<32x256xf32>
    %55 = tpu.matmul %54, %0, %cst_42 {dimension_numbers = #tpu.dot_dimension_numbers<[1], [0], [0], [1], [0, 0, 1, 1], [], []>} : vector<32x98xbf16>, vector<98x256xbf16>, vector<32x256xf32> -> vector<32x256xf32>
    %56 = arith.truncf %55 : vector<32x256xf32> to vector<32x256xbf16>
    %c0_43 = arith.constant 0 : index
    %c0_44 = arith.constant 0 : index
    %57 = vector.load %arg12[%c0_43, %c0_44] : memref<256x512xbf16, #tpu.memory_space<vmem>>, vector<256x512xbf16>
    %cst_45 = arith.constant dense<0.000000e+00> : vector<32x512xf32>
    %58 = tpu.matmul %56, %57, %cst_45 {dimension_numbers = #tpu.dot_dimension_numbers<[1], [0], [0], [1], [0, 0, 1, 1], [], []>} : vector<32x256xbf16>, vector<256x512xbf16>, vector<32x512xf32> -> vector<32x512xf32>
    %c0_46 = arith.constant 0 : index
    %c0_47 = arith.constant 0 : index
    %59 = vector.load %arg13[%c0_46, %c0_47] : memref<1x512xf32, #tpu.memory_space<vmem>>, vector<1x512xf32>
    %60 = vector.broadcast %59 : vector<1x512xf32> to vector<32x512xf32>
    %61 = arith.addf %58, %60 : vector<32x512xf32>
    %c0_48 = arith.constant 0 : index
    %c0_49 = arith.constant 0 : index
    %62 = vector.load %arg10[%c0_48, %c0_49] : memref<128x512xbf16, #tpu.memory_space<vmem>>, vector<128x512xbf16>
    %cst_50 = arith.constant dense<0.000000e+00> : vector<32x512xf32>
    %63 = tpu.matmul %53, %62, %cst_50 {dimension_numbers = #tpu.dot_dimension_numbers<[1], [0], [0], [1], [0, 0, 1, 1], [], []>} : vector<32x128xbf16>, vector<128x512xbf16>, vector<32x512xf32> -> vector<32x512xf32>
    %c0_51 = arith.constant 0 : index
    %c0_52 = arith.constant 0 : index
    %64 = vector.load %arg11[%c0_51, %c0_52] : memref<1x512xf32, #tpu.memory_space<vmem>>, vector<1x512xf32>
    %65 = vector.broadcast %64 : vector<1x512xf32> to vector<32x512xf32>
    %66 = arith.addf %63, %65 : vector<32x512xf32>
    %67 = arith.addf %66, %61 : vector<32x512xf32>
    %cst_53 = arith.constant 0.000000e+00 : f32
    %68 = vector.broadcast %cst_53 : f32 to vector<32x512xf32>
    %69 = arith.maximumf %67, %68 : vector<32x512xf32>
    %70 = arith.truncf %69 : vector<32x512xf32> to vector<32x512xbf16>
    %c0_54 = arith.constant 0 : index
    %c0_55 = arith.constant 0 : index
    %71 = vector.load %arg14[%c0_54, %c0_55] : memref<512x128xbf16, #tpu.memory_space<vmem>>, vector<512x128xbf16>
    %cst_56 = arith.constant dense<0.000000e+00> : vector<32x128xf32>
    %72 = tpu.matmul %70, %71, %cst_56 {dimension_numbers = #tpu.dot_dimension_numbers<[1], [0], [0], [1], [0, 0, 1, 1], [], []>} : vector<32x512xbf16>, vector<512x128xbf16>, vector<32x128xf32> -> vector<32x128xf32>
    %c0_57 = arith.constant 0 : index
    %c0_58 = arith.constant 0 : index
    %73 = vector.load %arg15[%c0_57, %c0_58] : memref<1x128xf32, #tpu.memory_space<vmem>>, vector<1x128xf32>
    %74 = vector.broadcast %73 : vector<1x128xf32> to vector<32x128xf32>
    %75 = arith.addf %72, %74 : vector<32x128xf32>
    %cst_59 = arith.constant 0.000000e+00 : f32
    %76 = vector.broadcast %cst_59 : f32 to vector<32x128xf32>
    %77 = arith.maximumf %75, %76 : vector<32x128xf32>
    %78 = arith.truncf %77 : vector<32x128xf32> to vector<32x128xbf16>
    %c0_60 = arith.constant 0 : index
    %c0_61 = arith.constant 0 : index
    %c0_62 = arith.constant 0 : index
    %79 = vector.load %arg4[%c0_60, %c0_61, %c0_62] : memref<9x32x32xbf16, #tpu.memory_space<vmem>>, vector<1x32x32xbf16>
    %80 = vector.shape_cast %79 : vector<1x32x32xbf16> to vector<32x32xbf16>
    %cst_63 = arith.constant dense<0.000000e+00> : vector<32x128xf32>
    %81 = tpu.matmul %80, %78, %cst_63 {dimension_numbers = #tpu.dot_dimension_numbers<[1], [0], [0], [1], [0, 0, 1, 1], [], []>} : vector<32x32xbf16>, vector<32x128xbf16>, vector<32x128xf32> -> vector<32x128xf32>
    %82 = arith.truncf %81 : vector<32x128xf32> to vector<32x128xbf16>
    %c1_64 = arith.constant 1 : index
    %c0_65 = arith.constant 0 : index
    %c0_66 = arith.constant 0 : index
    %83 = vector.load %arg4[%c1_64, %c0_65, %c0_66] : memref<9x32x32xbf16, #tpu.memory_space<vmem>>, vector<1x32x32xbf16>
    %84 = vector.shape_cast %83 : vector<1x32x32xbf16> to vector<32x32xbf16>
    %cst_67 = arith.constant dense<0.000000e+00> : vector<32x128xf32>
    %85 = tpu.matmul %84, %78, %cst_67 {dimension_numbers = #tpu.dot_dimension_numbers<[1], [0], [0], [1], [0, 0, 1, 1], [], []>} : vector<32x32xbf16>, vector<32x128xbf16>, vector<32x128xf32> -> vector<32x128xf32>
    %86 = arith.truncf %85 : vector<32x128xf32> to vector<32x128xbf16>
    %c2_68 = arith.constant 2 : index
    %c0_69 = arith.constant 0 : index
    %c0_70 = arith.constant 0 : index
    %87 = vector.load %arg4[%c2_68, %c0_69, %c0_70] : memref<9x32x32xbf16, #tpu.memory_space<vmem>>, vector<1x32x32xbf16>
    %88 = vector.shape_cast %87 : vector<1x32x32xbf16> to vector<32x32xbf16>
    %cst_71 = arith.constant dense<0.000000e+00> : vector<32x128xf32>
    %89 = tpu.matmul %88, %78, %cst_71 {dimension_numbers = #tpu.dot_dimension_numbers<[1], [0], [0], [1], [0, 0, 1, 1], [], []>} : vector<32x32xbf16>, vector<32x128xbf16>, vector<32x128xf32> -> vector<32x128xf32>
    %90 = arith.truncf %89 : vector<32x128xf32> to vector<32x128xbf16>
    %c3_72 = arith.constant 3 : index
    %c0_73 = arith.constant 0 : index
    %c0_74 = arith.constant 0 : index
    %91 = vector.load %arg4[%c3_72, %c0_73, %c0_74] : memref<9x32x32xbf16, #tpu.memory_space<vmem>>, vector<1x32x32xbf16>
    %92 = vector.shape_cast %91 : vector<1x32x32xbf16> to vector<32x32xbf16>
    %cst_75 = arith.constant dense<0.000000e+00> : vector<32x128xf32>
    %93 = tpu.matmul %92, %78, %cst_75 {dimension_numbers = #tpu.dot_dimension_numbers<[1], [0], [0], [1], [0, 0, 1, 1], [], []>} : vector<32x32xbf16>, vector<32x128xbf16>, vector<32x128xf32> -> vector<32x128xf32>
    %94 = arith.truncf %93 : vector<32x128xf32> to vector<32x128xbf16>
    %c4_76 = arith.constant 4 : index
    %c0_77 = arith.constant 0 : index
    %c0_78 = arith.constant 0 : index
    %95 = vector.load %arg4[%c4_76, %c0_77, %c0_78] : memref<9x32x32xbf16, #tpu.memory_space<vmem>>, vector<1x32x32xbf16>
    %96 = vector.shape_cast %95 : vector<1x32x32xbf16> to vector<32x32xbf16>
    %cst_79 = arith.constant dense<0.000000e+00> : vector<32x128xf32>
    %97 = tpu.matmul %96, %78, %cst_79 {dimension_numbers = #tpu.dot_dimension_numbers<[1], [0], [0], [1], [0, 0, 1, 1], [], []>} : vector<32x32xbf16>, vector<32x128xbf16>, vector<32x128xf32> -> vector<32x128xf32>
    %98 = arith.truncf %97 : vector<32x128xf32> to vector<32x128xbf16>
    %c5_80 = arith.constant 5 : index
    %c0_81 = arith.constant 0 : index
    %c0_82 = arith.constant 0 : index
    %99 = vector.load %arg4[%c5_80, %c0_81, %c0_82] : memref<9x32x32xbf16, #tpu.memory_space<vmem>>, vector<1x32x32xbf16>
    %100 = vector.shape_cast %99 : vector<1x32x32xbf16> to vector<32x32xbf16>
    %cst_83 = arith.constant dense<0.000000e+00> : vector<32x128xf32>
    %101 = tpu.matmul %100, %78, %cst_83 {dimension_numbers = #tpu.dot_dimension_numbers<[1], [0], [0], [1], [0, 0, 1, 1], [], []>} : vector<32x32xbf16>, vector<32x128xbf16>, vector<32x128xf32> -> vector<32x128xf32>
    %102 = arith.truncf %101 : vector<32x128xf32> to vector<32x128xbf16>
    %c6_84 = arith.constant 6 : index
    %c0_85 = arith.constant 0 : index
    %c0_86 = arith.constant 0 : index
    %103 = vector.load %arg4[%c6_84, %c0_85, %c0_86] : memref<9x32x32xbf16, #tpu.memory_space<vmem>>, vector<1x32x32xbf16>
    %104 = vector.shape_cast %103 : vector<1x32x32xbf16> to vector<32x32xbf16>
    %cst_87 = arith.constant dense<0.000000e+00> : vector<32x128xf32>
    %105 = tpu.matmul %104, %78, %cst_87 {dimension_numbers = #tpu.dot_dimension_numbers<[1], [0], [0], [1], [0, 0, 1, 1], [], []>} : vector<32x32xbf16>, vector<32x128xbf16>, vector<32x128xf32> -> vector<32x128xf32>
    %106 = arith.truncf %105 : vector<32x128xf32> to vector<32x128xbf16>
    %c7_88 = arith.constant 7 : index
    %c0_89 = arith.constant 0 : index
    %c0_90 = arith.constant 0 : index
    %107 = vector.load %arg4[%c7_88, %c0_89, %c0_90] : memref<9x32x32xbf16, #tpu.memory_space<vmem>>, vector<1x32x32xbf16>
    %108 = vector.shape_cast %107 : vector<1x32x32xbf16> to vector<32x32xbf16>
    %cst_91 = arith.constant dense<0.000000e+00> : vector<32x128xf32>
    %109 = tpu.matmul %108, %78, %cst_91 {dimension_numbers = #tpu.dot_dimension_numbers<[1], [0], [0], [1], [0, 0, 1, 1], [], []>} : vector<32x32xbf16>, vector<32x128xbf16>, vector<32x128xf32> -> vector<32x128xf32>
    %110 = arith.truncf %109 : vector<32x128xf32> to vector<32x128xbf16>
    %c8_92 = arith.constant 8 : index
    %c0_93 = arith.constant 0 : index
    %c0_94 = arith.constant 0 : index
    %111 = vector.load %arg4[%c8_92, %c0_93, %c0_94] : memref<9x32x32xbf16, #tpu.memory_space<vmem>>, vector<1x32x32xbf16>
    %112 = vector.shape_cast %111 : vector<1x32x32xbf16> to vector<32x32xbf16>
    %cst_95 = arith.constant dense<0.000000e+00> : vector<32x128xf32>
    %113 = tpu.matmul %112, %78, %cst_95 {dimension_numbers = #tpu.dot_dimension_numbers<[1], [0], [0], [1], [0, 0, 1, 1], [], []>} : vector<32x32xbf16>, vector<32x128xbf16>, vector<32x128xf32> -> vector<32x128xf32>
    %114 = arith.truncf %113 : vector<32x128xf32> to vector<32x128xbf16>
    %115 = tpu.concatenate %82, %86, %90, %94, %98, %102, %106, %110, %114 in 1 : vector<32x128xbf16>, vector<32x128xbf16>, vector<32x128xbf16>, vector<32x128xbf16>, vector<32x128xbf16>, vector<32x128xbf16>, vector<32x128xbf16>, vector<32x128xbf16>, vector<32x128xbf16> -> vector<32x1152xbf16>
    %c0_96 = arith.constant 0 : index
    %c0_97 = arith.constant 0 : index
    %116 = vector.load %arg16[%c0_96, %c0_97] : memref<1152x128xbf16, #tpu.memory_space<vmem>>, vector<1152x128xbf16>
    %cst_98 = arith.constant dense<0.000000e+00> : vector<32x128xf32>
    %117 = tpu.matmul %115, %116, %cst_98 {dimension_numbers = #tpu.dot_dimension_numbers<[1], [0], [0], [1], [0, 0, 1, 1], [], []>} : vector<32x1152xbf16>, vector<1152x128xbf16>, vector<32x128xf32> -> vector<32x128xf32>
    %c0_99 = arith.constant 0 : index
    %c0_100 = arith.constant 0 : index
    %118 = vector.load %arg17[%c0_99, %c0_100] : memref<1x128xf32, #tpu.memory_space<vmem>>, vector<1x128xf32>
    %119 = vector.broadcast %118 : vector<1x128xf32> to vector<32x128xf32>
    %120 = arith.addf %117, %119 : vector<32x128xf32>
    %cst_101 = arith.constant 0.000000e+00 : f32
    %121 = vector.broadcast %cst_101 : f32 to vector<32x128xf32>
    %122 = arith.maximumf %120, %121 : vector<32x128xf32>
    %123 = arith.truncf %122 : vector<32x128xf32> to vector<32x128xbf16>
    %c0_102 = arith.constant 0 : index
    %c0_103 = arith.constant 0 : index
    %124 = vector.load %arg18[%c0_102, %c0_103] : memref<128x512xbf16, #tpu.memory_space<vmem>>, vector<128x512xbf16>
    %cst_104 = arith.constant dense<0.000000e+00> : vector<32x512xf32>
    %125 = tpu.matmul %123, %124, %cst_104 {dimension_numbers = #tpu.dot_dimension_numbers<[1], [0], [0], [1], [0, 0, 1, 1], [], []>} : vector<32x128xbf16>, vector<128x512xbf16>, vector<32x512xf32> -> vector<32x512xf32>
    %c0_105 = arith.constant 0 : index
    %c0_106 = arith.constant 0 : index
    %126 = vector.load %arg19[%c0_105, %c0_106] : memref<1x512xf32, #tpu.memory_space<vmem>>, vector<1x512xf32>
    %127 = vector.broadcast %126 : vector<1x512xf32> to vector<32x512xf32>
    %128 = arith.addf %125, %127 : vector<32x512xf32>
    %129 = arith.addf %128, %69 : vector<32x512xf32>
    %cst_107 = arith.constant 0.000000e+00 : f32
    %130 = vector.broadcast %cst_107 : f32 to vector<32x512xf32>
    %131 = arith.maximumf %129, %130 : vector<32x512xf32>
    %132 = arith.truncf %131 : vector<32x512xf32> to vector<32x512xbf16>
    %c0_108 = arith.constant 0 : index
    %c0_109 = arith.constant 0 : index
    %133 = vector.load %arg20[%c0_108, %c0_109] : memref<512x128xbf16, #tpu.memory_space<vmem>>, vector<512x128xbf16>
    %cst_110 = arith.constant dense<0.000000e+00> : vector<32x128xf32>
    %134 = tpu.matmul %132, %133, %cst_110 {dimension_numbers = #tpu.dot_dimension_numbers<[1], [0], [0], [1], [0, 0, 1, 1], [], []>} : vector<32x512xbf16>, vector<512x128xbf16>, vector<32x128xf32> -> vector<32x128xf32>
    %c0_111 = arith.constant 0 : index
    %c0_112 = arith.constant 0 : index
    %135 = vector.load %arg21[%c0_111, %c0_112] : memref<1x128xf32, #tpu.memory_space<vmem>>, vector<1x128xf32>
    %136 = vector.broadcast %135 : vector<1x128xf32> to vector<32x128xf32>
    %137 = arith.addf %134, %136 : vector<32x128xf32>
    %cst_113 = arith.constant 0.000000e+00 : f32
    %138 = vector.broadcast %cst_113 : f32 to vector<32x128xf32>
    %139 = arith.maximumf %137, %138 : vector<32x128xf32>
    %140 = arith.truncf %139 : vector<32x128xf32> to vector<32x128xbf16>
    %c0_114 = arith.constant 0 : index
    %c0_115 = arith.constant 0 : index
    %c0_116 = arith.constant 0 : index
    %141 = vector.load %arg4[%c0_114, %c0_115, %c0_116] : memref<9x32x32xbf16, #tpu.memory_space<vmem>>, vector<1x32x32xbf16>
    %142 = vector.shape_cast %141 : vector<1x32x32xbf16> to vector<32x32xbf16>
    %cst_117 = arith.constant dense<0.000000e+00> : vector<32x128xf32>
    %143 = tpu.matmul %142, %140, %cst_117 {dimension_numbers = #tpu.dot_dimension_numbers<[1], [0], [0], [1], [0, 0, 1, 1], [], []>} : vector<32x32xbf16>, vector<32x128xbf16>, vector<32x128xf32> -> vector<32x128xf32>
    %144 = arith.truncf %143 : vector<32x128xf32> to vector<32x128xbf16>
    %c1_118 = arith.constant 1 : index
    %c0_119 = arith.constant 0 : index
    %c0_120 = arith.constant 0 : index
    %145 = vector.load %arg4[%c1_118, %c0_119, %c0_120] : memref<9x32x32xbf16, #tpu.memory_space<vmem>>, vector<1x32x32xbf16>
    %146 = vector.shape_cast %145 : vector<1x32x32xbf16> to vector<32x32xbf16>
    %cst_121 = arith.constant dense<0.000000e+00> : vector<32x128xf32>
    %147 = tpu.matmul %146, %140, %cst_121 {dimension_numbers = #tpu.dot_dimension_numbers<[1], [0], [0], [1], [0, 0, 1, 1], [], []>} : vector<32x32xbf16>, vector<32x128xbf16>, vector<32x128xf32> -> vector<32x128xf32>
    %148 = arith.truncf %147 : vector<32x128xf32> to vector<32x128xbf16>
    %c2_122 = arith.constant 2 : index
    %c0_123 = arith.constant 0 : index
    %c0_124 = arith.constant 0 : index
    %149 = vector.load %arg4[%c2_122, %c0_123, %c0_124] : memref<9x32x32xbf16, #tpu.memory_space<vmem>>, vector<1x32x32xbf16>
    %150 = vector.shape_cast %149 : vector<1x32x32xbf16> to vector<32x32xbf16>
    %cst_125 = arith.constant dense<0.000000e+00> : vector<32x128xf32>
    %151 = tpu.matmul %150, %140, %cst_125 {dimension_numbers = #tpu.dot_dimension_numbers<[1], [0], [0], [1], [0, 0, 1, 1], [], []>} : vector<32x32xbf16>, vector<32x128xbf16>, vector<32x128xf32> -> vector<32x128xf32>
    %152 = arith.truncf %151 : vector<32x128xf32> to vector<32x128xbf16>
    %c3_126 = arith.constant 3 : index
    %c0_127 = arith.constant 0 : index
    %c0_128 = arith.constant 0 : index
    %153 = vector.load %arg4[%c3_126, %c0_127, %c0_128] : memref<9x32x32xbf16, #tpu.memory_space<vmem>>, vector<1x32x32xbf16>
    %154 = vector.shape_cast %153 : vector<1x32x32xbf16> to vector<32x32xbf16>
    %cst_129 = arith.constant dense<0.000000e+00> : vector<32x128xf32>
    %155 = tpu.matmul %154, %140, %cst_129 {dimension_numbers = #tpu.dot_dimension_numbers<[1], [0], [0], [1], [0, 0, 1, 1], [], []>} : vector<32x32xbf16>, vector<32x128xbf16>, vector<32x128xf32> -> vector<32x128xf32>
    %156 = arith.truncf %155 : vector<32x128xf32> to vector<32x128xbf16>
    %c4_130 = arith.constant 4 : index
    %c0_131 = arith.constant 0 : index
    %c0_132 = arith.constant 0 : index
    %157 = vector.load %arg4[%c4_130, %c0_131, %c0_132] : memref<9x32x32xbf16, #tpu.memory_space<vmem>>, vector<1x32x32xbf16>
    %158 = vector.shape_cast %157 : vector<1x32x32xbf16> to vector<32x32xbf16>
    %cst_133 = arith.constant dense<0.000000e+00> : vector<32x128xf32>
    %159 = tpu.matmul %158, %140, %cst_133 {dimension_numbers = #tpu.dot_dimension_numbers<[1], [0], [0], [1], [0, 0, 1, 1], [], []>} : vector<32x32xbf16>, vector<32x128xbf16>, vector<32x128xf32> -> vector<32x128xf32>
    %160 = arith.truncf %159 : vector<32x128xf32> to vector<32x128xbf16>
    %c5_134 = arith.constant 5 : index
    %c0_135 = arith.constant 0 : index
    %c0_136 = arith.constant 0 : index
    %161 = vector.load %arg4[%c5_134, %c0_135, %c0_136] : memref<9x32x32xbf16, #tpu.memory_space<vmem>>, vector<1x32x32xbf16>
    %162 = vector.shape_cast %161 : vector<1x32x32xbf16> to vector<32x32xbf16>
    %cst_137 = arith.constant dense<0.000000e+00> : vector<32x128xf32>
    %163 = tpu.matmul %162, %140, %cst_137 {dimension_numbers = #tpu.dot_dimension_numbers<[1], [0], [0], [1], [0, 0, 1, 1], [], []>} : vector<32x32xbf16>, vector<32x128xbf16>, vector<32x128xf32> -> vector<32x128xf32>
    %164 = arith.truncf %163 : vector<32x128xf32> to vector<32x128xbf16>
    %c6_138 = arith.constant 6 : index
    %c0_139 = arith.constant 0 : index
    %c0_140 = arith.constant 0 : index
    %165 = vector.load %arg4[%c6_138, %c0_139, %c0_140] : memref<9x32x32xbf16, #tpu.memory_space<vmem>>, vector<1x32x32xbf16>
    %166 = vector.shape_cast %165 : vector<1x32x32xbf16> to vector<32x32xbf16>
    %cst_141 = arith.constant dense<0.000000e+00> : vector<32x128xf32>
    %167 = tpu.matmul %166, %140, %cst_141 {dimension_numbers = #tpu.dot_dimension_numbers<[1], [0], [0], [1], [0, 0, 1, 1], [], []>} : vector<32x32xbf16>, vector<32x128xbf16>, vector<32x128xf32> -> vector<32x128xf32>
    %168 = arith.truncf %167 : vector<32x128xf32> to vector<32x128xbf16>
    %c7_142 = arith.constant 7 : index
    %c0_143 = arith.constant 0 : index
    %c0_144 = arith.constant 0 : index
    %169 = vector.load %arg4[%c7_142, %c0_143, %c0_144] : memref<9x32x32xbf16, #tpu.memory_space<vmem>>, vector<1x32x32xbf16>
    %170 = vector.shape_cast %169 : vector<1x32x32xbf16> to vector<32x32xbf16>
    %cst_145 = arith.constant dense<0.000000e+00> : vector<32x128xf32>
    %171 = tpu.matmul %170, %140, %cst_145 {dimension_numbers = #tpu.dot_dimension_numbers<[1], [0], [0], [1], [0, 0, 1, 1], [], []>} : vector<32x32xbf16>, vector<32x128xbf16>, vector<32x128xf32> -> vector<32x128xf32>
    %172 = arith.truncf %171 : vector<32x128xf32> to vector<32x128xbf16>
    %c8_146 = arith.constant 8 : index
    %c0_147 = arith.constant 0 : index
    %c0_148 = arith.constant 0 : index
    %173 = vector.load %arg4[%c8_146, %c0_147, %c0_148] : memref<9x32x32xbf16, #tpu.memory_space<vmem>>, vector<1x32x32xbf16>
    %174 = vector.shape_cast %173 : vector<1x32x32xbf16> to vector<32x32xbf16>
    %cst_149 = arith.constant dense<0.000000e+00> : vector<32x128xf32>
    %175 = tpu.matmul %174, %140, %cst_149 {dimension_numbers = #tpu.dot_dimension_numbers<[1], [0], [0], [1], [0, 0, 1, 1], [], []>} : vector<32x32xbf16>, vector<32x128xbf16>, vector<32x128xf32> -> vector<32x128xf32>
    %176 = arith.truncf %175 : vector<32x128xf32> to vector<32x128xbf16>
    %177 = tpu.concatenate %144, %148, %152, %156, %160, %164, %168, %172, %176 in 1 : vector<32x128xbf16>, vector<32x128xbf16>, vector<32x128xbf16>, vector<32x128xbf16>, vector<32x128xbf16>, vector<32x128xbf16>, vector<32x128xbf16>, vector<32x128xbf16>, vector<32x128xbf16> -> vector<32x1152xbf16>
    %c0_150 = arith.constant 0 : index
    %c0_151 = arith.constant 0 : index
    %178 = vector.load %arg22[%c0_150, %c0_151] : memref<1152x128xbf16, #tpu.memory_space<vmem>>, vector<1152x128xbf16>
    %cst_152 = arith.constant dense<0.000000e+00> : vector<32x128xf32>
    %179 = tpu.matmul %177, %178, %cst_152 {dimension_numbers = #tpu.dot_dimension_numbers<[1], [0], [0], [1], [0, 0, 1, 1], [], []>} : vector<32x1152xbf16>, vector<1152x128xbf16>, vector<32x128xf32> -> vector<32x128xf32>
    %c0_153 = arith.constant 0 : index
    %c0_154 = arith.constant 0 : index
    %180 = vector.load %arg23[%c0_153, %c0_154] : memref<1x128xf32, #tpu.memory_space<vmem>>, vector<1x128xf32>
    %181 = vector.broadcast %180 : vector<1x128xf32> to vector<32x128xf32>
    %182 = arith.addf %179, %181 : vector<32x128xf32>
    %cst_155 = arith.constant 0.000000e+00 : f32
    %183 = vector.broadcast %cst_155 : f32 to vector<32x128xf32>
    %184 = arith.maximumf %182, %183 : vector<32x128xf32>
    %185 = arith.truncf %184 : vector<32x128xf32> to vector<32x128xbf16>
    %c0_156 = arith.constant 0 : index
    %c0_157 = arith.constant 0 : index
    %186 = vector.load %arg24[%c0_156, %c0_157] : memref<128x512xbf16, #tpu.memory_space<vmem>>, vector<128x512xbf16>
    %cst_158 = arith.constant dense<0.000000e+00> : vector<32x512xf32>
    %187 = tpu.matmul %185, %186, %cst_158 {dimension_numbers = #tpu.dot_dimension_numbers<[1], [0], [0], [1], [0, 0, 1, 1], [], []>} : vector<32x128xbf16>, vector<128x512xbf16>, vector<32x512xf32> -> vector<32x512xf32>
    %c0_159 = arith.constant 0 : index
    %c0_160 = arith.constant 0 : index
    %188 = vector.load %arg25[%c0_159, %c0_160] : memref<1x512xf32, #tpu.memory_space<vmem>>, vector<1x512xf32>
    %189 = vector.broadcast %188 : vector<1x512xf32> to vector<32x512xf32>
    %190 = arith.addf %187, %189 : vector<32x512xf32>
    %191 = arith.addf %190, %131 : vector<32x512xf32>
    %cst_161 = arith.constant 0.000000e+00 : f32
    %192 = vector.broadcast %cst_161 : f32 to vector<32x512xf32>
    %193 = arith.maximumf %191, %192 : vector<32x512xf32>
    %c0_162 = arith.constant 0 : index
    %c0_163 = arith.constant 0 : index
    %194 = vector.load %arg5[%c0_162, %c0_163] : memref<2x32xbf16, #tpu.memory_space<vmem>>, vector<2x32xbf16>
    %195 = arith.truncf %193 : vector<32x512xf32> to vector<32x512xbf16>
    %cst_164 = arith.constant dense<0.000000e+00> : vector<2x512xf32>
    %196 = tpu.matmul %194, %195, %cst_164 {dimension_numbers = #tpu.dot_dimension_numbers<[1], [0], [0], [1], [0, 0, 1, 1], [], []>} : vector<2x32xbf16>, vector<32x512xbf16>, vector<2x512xf32> -> vector<2x512xf32>
    %c0_165 = arith.constant 0 : index
    %c0_166 = arith.constant 0 : index
    %197 = vector.load %arg26[%c0_165, %c0_166] : memref<2x512xf32, #tpu.memory_space<vmem>>, vector<2x512xf32>
    tpu.vector_store %arg26[%c0_165, %c0_166], %196 {strides = array<i32>} : memref<2x512xf32, #tpu.memory_space<vmem>>, vector<2x512xf32>,
    return
  }
  func.func @transform_0(%arg0: i32) -> (i32, i32) {
    %c0_i32 = arith.constant 0 : i32
    %c0_i32_0 = arith.constant 0 : i32
    %c0_i32_1 = arith.constant 0 : i32
    return %c0_i32, %c0_i32_0 : i32, i32
  }
  func.func @transform_1(%arg0: i32) -> (i32, i32) {
    %c0_i32 = arith.constant 0 : i32
    %c0_i32_0 = arith.constant 0 : i32
    %c0_i32_1 = arith.constant 0 : i32
    return %c0_i32, %c0_i32_0 : i32, i32
  }
  func.func @transform_2(%arg0: i32) -> (i32, i32, i32) {
    %c0_i32 = arith.constant 0 : i32
    %c0_i32_0 = arith.constant 0 : i32
    %c0_i32_1 = arith.constant 0 : i32
    %c0_i32_2 = arith.constant 0 : i32
    return %c0_i32, %c0_i32_0, %c0_i32_1 : i32, i32, i32
  }
  func.func @transform_3(%arg0: i32) -> (i32, i32, i32) {
    %c0_i32 = arith.constant 0 : i32
    %c0_i32_0 = arith.constant 0 : i32
    %c0_i32_1 = arith.constant 0 : i32
    %c0_i32_2 = arith.constant 0 : i32
    return %c0_i32, %c0_i32_0, %c0_i32_1 : i32, i32, i32
  }
  func.func @transform_4(%arg0: i32) -> (i32, i32) {
    %c0_i32 = arith.constant 0 : i32
    %c0_i32_0 = arith.constant 0 : i32
    %c0_i32_1 = arith.constant 0 : i32
    return %c0_i32, %c0_i32_0 : i32, i32
  }
  func.func @transform_5(%arg0: i32) -> (i32, i32) {
    %c0_i32 = arith.constant 0 : i32
    %c0_i32_0 = arith.constant 0 : i32
    %c0_i32_1 = arith.constant 0 : i32
    return %c0_i32, %c0_i32_0 : i32, i32
  }
  func.func @transform_6(%arg0: i32) -> (i32, i32) {
    %c0_i32 = arith.constant 0 : i32
    %c0_i32_0 = arith.constant 0 : i32
    %c0_i32_1 = arith.constant 0 : i32
    return %c0_i32, %c0_i32_0 : i32, i32
  }
  func.func @transform_7(%arg0: i32) -> (i32, i32) {
    %c0_i32 = arith.constant 0 : i32
    %c0_i32_0 = arith.constant 0 : i32
    %c0_i32_1 = arith.constant 0 : i32
    return %c0_i32, %c0_i32_0 : i32, i32
  }
  func.func @transform_8(%arg0: i32) -> (i32, i32) {
    %c0_i32 = arith.constant 0 : i32
    %c0_i32_0 = arith.constant 0 : i32
    %c0_i32_1 = arith.constant 0 : i32
    return %c0_i32, %c0_i32_0 : i32, i32
  }
  func.func @transform_9(%arg0: i32) -> (i32, i32) {
    %c0_i32 = arith.constant 0 : i32
    %c0_i32_0 = arith.constant 0 : i32
    %c0_i32_1 = arith.constant 0 : i32
    return %c0_i32, %c0_i32_0 : i32, i32
  }
  func.func @transform_10(%arg0: i32) -> (i32, i32) {
    %c0_i32 = arith.constant 0 : i32
    %c0_i32_0 = arith.constant 0 : i32
    %c0_i32_1 = arith.constant 0 : i32
    return %c0_i32, %c0_i32_0 : i32, i32
  }
  func.func @transform_11(%arg0: i32) -> (i32, i32) {
    %c0_i32 = arith.constant 0 : i32
    %c0_i32_0 = arith.constant 0 : i32
    %c0_i32_1 = arith.constant 0 : i32
    return %c0_i32, %c0_i32_0 : i32, i32
  }
  func.func @transform_12(%arg0: i32) -> (i32, i32) {
    %c0_i32 = arith.constant 0 : i32
    %c0_i32_0 = arith.constant 0 : i32
    %c0_i32_1 = arith.constant 0 : i32
    return %c0_i32, %c0_i32_0 : i32, i32
  }
  func.func @transform_13(%arg0: i32) -> (i32, i32) {
    %c0_i32 = arith.constant 0 : i32
    %c0_i32_0 = arith.constant 0 : i32
    %c0_i32_1 = arith.constant 0 : i32
    return %c0_i32, %c0_i32_0 : i32, i32
  }
  func.func @transform_14(%arg0: i32) -> (i32, i32) {
    %c0_i32 = arith.constant 0 : i32
    %c0_i32_0 = arith.constant 0 : i32
    %c0_i32_1 = arith.constant 0 : i32
    return %c0_i32, %c0_i32_0 : i32, i32
  }
  func.func @transform_15(%arg0: i32) -> (i32, i32) {
    %c0_i32 = arith.constant 0 : i32
    %c0_i32_0 = arith.constant 0 : i32
    %c0_i32_1 = arith.constant 0 : i32
    return %c0_i32, %c0_i32_0 : i32, i32
  }
  func.func @transform_16(%arg0: i32) -> (i32, i32) {
    %c0_i32 = arith.constant 0 : i32
    %c0_i32_0 = arith.constant 0 : i32
    %c0_i32_1 = arith.constant 0 : i32
    return %c0_i32, %c0_i32_0 : i32, i32
  }
  func.func @transform_17(%arg0: i32) -> (i32, i32) {
    %c0_i32 = arith.constant 0 : i32
    %c0_i32_0 = arith.constant 0 : i32
    %c0_i32_1 = arith.constant 0 : i32
    return %c0_i32, %c0_i32_0 : i32, i32
  }
  func.func @transform_18(%arg0: i32) -> (i32, i32) {
    %c0_i32 = arith.constant 0 : i32
    %c0_i32_0 = arith.constant 0 : i32
    %c0_i32_1 = arith.constant 0 : i32
    return %c0_i32, %c0_i32_0 : i32, i32
  }
  func.func @transform_19(%arg0: i32) -> (i32, i32) {
    %c0_i32 = arith.constant 0 : i32
    %c0_i32_0 = arith.constant 0 : i32
    %c0_i32_1 = arith.constant 0 : i32
    return %c0_i32, %c0_i32_0 : i32, i32
  }
  func.func @transform_20(%arg0: i32) -> (i32, i32) {
    %c0_i32 = arith.constant 0 : i32
    %c0_i32_0 = arith.constant 0 : i32
    %c0_i32_1 = arith.constant 0 : i32
    return %c0_i32, %c0_i32_0 : i32, i32
  }
  func.func @transform_21(%arg0: i32) -> (i32, i32) {
    %c0_i32 = arith.constant 0 : i32
    %c0_i32_0 = arith.constant 0 : i32
    %c0_i32_1 = arith.constant 0 : i32
    return %c0_i32, %c0_i32_0 : i32, i32
  }
  func.func @transform_22(%arg0: i32) -> (i32, i32) {
    %c0_i32 = arith.constant 0 : i32
    %c0_i32_0 = arith.constant 0 : i32
    %c0_i32_1 = arith.constant 0 : i32
    return %c0_i32, %c0_i32_0 : i32, i32
  }
  func.func @transform_23(%arg0: i32) -> (i32, i32) {
    %c0_i32 = arith.constant 0 : i32
    %c0_i32_0 = arith.constant 0 : i32
    %c0_i32_1 = arith.constant 0 : i32
    return %c0_i32, %c0_i32_0 : i32, i32
  }
  func.func @transform_24(%arg0: i32) -> (i32, i32) {
    %c0_i32 = arith.constant 0 : i32
    %c0_i32_0 = arith.constant 0 : i32
    %c0_i32_1 = arith.constant 0 : i32
    return %c0_i32, %c0_i32_0 : i32, i32
  }
  func.func @transform_25(%arg0: i32) -> (i32, i32) {
    %c0_i32 = arith.constant 0 : i32
    %c0_i32_0 = arith.constant 0 : i32
    %c0_i32_1 = arith.constant 0 : i32
    return %c0_i32, %c0_i32_0 : i32, i32
  }
}

</mosaic_0001>

<bundles_post_ra>
// kernel: pool_to_feature_vector_forward.1
= control target key start
LH: loop header
LB: loop body
LE: loop exit
PB: predicated region body
PF: predicated region fallthrough
CT: control target
= control target key end

     0   :  { %s11017_s0 = inlined_call_operand.vmem [shape: bf16[98,256], index: 0, kind: input, shape index: {}]   ;;  %s11018_s1 = inlined_call_operand.hbm [shape: bf16[32,98], index: 1, kind: input, shape index: {}]   ;;  %s11019_s2 = inlined_call_operand.vmem [shape: bf16[9,32,98], index: 2, kind: input, shape index: {}]   ;;  %s11020_s3 = inlined_call_operand.hbm [shape: bf16[9,32,32], index: 3, kind: input, shape index: {}]   ;;  %s11021_s4 = inlined_call_operand.vmem [shape: bf16[2,32], index: 4, kind: input, shape index: {}]   ;;  %s11022_s5 = inlined_call_operand.hbm [shape: bf16[256,128], index: 5, kind: input, shape index: {}]   ;;  %s11023_s6 = inlined_call_operand.vmem [shape: f32[1,128], index: 6, kind: input, shape index: {}]   ;;  %s11024_s7 = inlined_call_operand.vmem [shape: bf16[1152,128], index: 7, kind: input, shape index: {}]   ;;  %s11025_s8 = inlined_call_operand.vmem [shape: f32[1,128], index: 8, kind: input, shape index: {}]   ;;  %s11026_s9 = inlined_call_operand.hbm [shape: bf16[128,512], index: 9, kind: input, shape index: {}]   ;;  %s11027_s10 = inlined_call_operand.hbm [shape: f32[1,512], index: 10, kind: input, shape index: {}]   ;;  %s11028_s11 = inlined_call_operand.hbm [shape: bf16[256,512], index: 11, kind: input, shape index: {}]   ;;  %s11029_s12 = inlined_call_operand.hbm [shape: f32[1,512], index: 12, kind: input, shape index: {}]   ;;  %s11030_s13 = inlined_call_operand.hbm [shape: bf16[512,128], index: 13, kind: input, shape index: {}]   ;;  %s11031_s14 = inlined_call_operand.hbm [shape: f32[1,128], index: 14, kind: input, shape index: {}]   ;;  %s11032_s15 = inlined_call_operand.hbm [shape: bf16[1152,128], index: 15, kind: input, shape index: {}]   ;;  %s11033_s16 = inlined_call_operand.hbm [shape: f32[1,128], index: 16, kind: input, shape index: {}]   ;;  %s11034_s17 = inlined_call_operand.hbm [shape: bf16[128,512], index: 17, kind: input, shape index: {}]   ;;  %s11035_s18 = inlined_call_operand.vmem [shape: f32[1,512], index: 18, kind: input, shape index: {}]   ;;  %s11036_s19 = inlined_call_operand.hbm [shape: bf16[512,128], index: 19, kind: input, shape index: {}]   ;;  %s11037_s20 = inlined_call_operand.hbm [shape: f32[1,128], index: 20, kind: input, shape index: {}]   ;;  %s11038_s21 = inlined_call_operand.hbm [shape: bf16[1152,128], index: 21, kind: input, shape index: {}]   ;;  %s11039_s22 = inlined_call_operand.vmem [shape: f32[1,128], index: 22, kind: input, shape index: {}]   ;;  %s11040_s23 = inlined_call_operand.hbm [shape: bf16[128,512], index: 23, kind: input, shape index: {}]   ;;  %s11041_s24 = inlined_call_operand.vmem [shape: f32[1,512], index: 24, kind: input, shape index: {}]   ;;  %s11042_s25 = inlined_call_operand.hbm [shape: f32[2,512], index: 25, kind: output, shape index: {}]  }
   0x1   :  { %11059 = sst [smem:[#allocation39_spill]] %s11017_s0 }
   0x2   :  { %11060 = sst [smem:[#allocation40_spill]] %s11018_s1 }
   0x3   :  { %11061 = sst [smem:[#allocation41_spill]] %s11019_s2 }
   0x4   :  { %11062 = sst [smem:[#allocation42_spill]] %s11020_s3 }
   0x5   :  { %11063 = sst [smem:[#allocation43_spill]] %s11021_s4 }
   0x6   :  { %11064 = sst [smem:[#allocation44_spill]] %s11022_s5 }
   0x7   :  { %11065 = sst [smem:[#allocation45_spill]] %s11023_s6 }
   0x8   :  { %11066 = sst [smem:[#allocation46_spill]] %s11024_s7 }
   0x9   :  { %11067 = sst [smem:[#allocation47_spill]] %s11025_s8 }
   0xa   :  { %11068 = sst [smem:[#allocation48_spill]] %s11026_s9 }
   0xb   :  { %30 = vsyncpa [#allocation3], 0 }
   0xc   :  { %31 = vsyncpa [#allocation6], 0 }
   0xd   :  { %32 = vsyncpa [#allocation9], 0 }
   0xe   :  { %33 = vsyncpa [#allocation12], 0 }
   0xf   :  { %34 = vsyncpa [#allocation15], 0 }
  0x10   :  { %35 = vsyncpa [#allocation18], 0 }
  0x11   :  { %36 = vsyncpa [#allocation21], 0 }
  0x12   :  { %37 = vsyncpa [#allocation24], 0 }
  0x13   :  { %38 = vsyncpa [#allocation27], 0 }
  0x14   :  { %39 = vsyncpa [#allocation4], 0  ;;  %s11069_s6 = sld [smem:[#allocation42_spill]]  ;;  %s9682_s7 = smov [#allocation5]  }
  0x15   :  { %s63_s3 = sshll.u32 %s9682_s7, 4  ;;  %s11070_s8 = sld [smem:[#allocation48_spill]]  ;;  %s64_s3 = int_to_ptr.vmem [resolvable:$true] %s63_s3 }
  0x16   :  { %s11046_s4 = smov 64   ;;  %s9684_s28 = smov 4  }
  0x17   :  { %s9685_s9 = smov [#allocation8]   ;;  %s9686_s0 = smov 256  }
  0x18   :  { %s97_s5 = sshll.u32 %s9685_s9, 4  ;;  %s9687_s29 = smov 16   ;;  %s98_s5 = int_to_ptr.vmem [resolvable:$true] %s97_s5 }
  0x19   :  { %s119_s7 = sshll.u32 %s11028_s11, 4  ;;  %s9688_s26 = smov [#allocation11]   ;;  %s120_s7 = int_to_ptr.hbm [resolvable:$true] %s119_s7 }
  0x1a   :  { %s61_s30 = sshll.u32 %s11069_s6, 4  ;;  %s121_s1 = sshll.u32 %s9688_s26, 4  ;;  %s62_s30 = int_to_ptr.hbm [resolvable:$true] %s61_s30  ;;  %s122_s1 = int_to_ptr.vmem [resolvable:$true] %s121_s1 }
  0x1b   :  { %s95_s27 = sshll.u32 %s11070_s8, 4  ;;  %s9689_s9 = smov [#allocation14]   ;;  %s96_s27 = int_to_ptr.hbm [resolvable:$true] %s95_s27 }
  0x1c   :  { %69 = dma.hbm_to_vmem [thread:$0]  %s62_s30, 2304, %s64_s3, [#allocation6], %s11046_s4, %s11046_s4, %s9684_s28  }
  0x1d   :  { %103 = dma.hbm_to_vmem [thread:$0]  %s96_s27, 4096, %s98_s5, [#allocation9], %s9686_s0, %s9686_s0, %s9687_s29  }
  0x1e   :  { %s143_s3 = sshll.u32 %s11030_s13, 4  ;;  %s145_s4 = sshll.u32 %s9689_s9, 4  ;;  %s144_s3 = int_to_ptr.hbm [resolvable:$true] %s143_s3  ;;  %s146_s4 = int_to_ptr.vmem [resolvable:$true] %s145_s4 }
  0x1f   :  { %127 = dma.hbm_to_vmem [thread:$0]  %s120_s7, 8192, %s122_s1, [#allocation12], %s9686_s0, %s9686_s0, %s9687_s29  }
  0x20   :  { %s167_s2 = sshll.u32 %s11032_s15, 4  ;;  %s11071_s11 = smov 64   ;;  %s168_s2 = int_to_ptr.hbm [resolvable:$true] %s167_s2 }
  0x21   :  { %151 = dma.hbm_to_vmem [thread:$0]  %s144_s3, 4096, %s146_s4, [#allocation15], %s11071_s11, %s11071_s11, %s9684_s28  }
  0x22   :  { %s191_s13 = sshll.u32 %s11034_s17, 4  ;;  %s9690_s8 = smov [#allocation17]   ;;  %s192_s13 = int_to_ptr.hbm [resolvable:$true] %s191_s13 }
  0x23   :  { %s169_s30 = sshll.u32 %s9690_s8, 4  ;;  %s9691_s7 = smov [#allocation20]   ;;  %s170_s30 = int_to_ptr.vmem [resolvable:$true] %s169_s30 }
  0x24   :  { %175 = dma.hbm_to_vmem [thread:$0]  %s168_s2, 9216, %s170_s30, [#allocation18], %s11071_s11, %s11071_s11, %s9684_s28  }
  0x25   :  { %s193_s15 = sshll.u32 %s9691_s7, 4  ;;  %s220_s27 = sshll.u32 %s11037_s20, 4  ;;  %s194_s15 = int_to_ptr.vmem [resolvable:$true] %s193_s15  ;;  %s221_s27 = int_to_ptr.hbm [resolvable:$true] %s220_s27 }
  0x26   :  { %199 = dma.hbm_to_vmem [thread:$0]  %s192_s13, 4096, %s194_s15, [#allocation21], %s9686_s0, %s9686_s0, %s9687_s29  }
  0x27   :  { %s11072_s3 = sld [smem:[#allocation40_spill]]  ;;  %s9692_s6 = smov [#allocation23]  }
  0x28   :  { %s222_s26 = sshll.u32 %s9692_s6, 4  ;;  %s9693_s2 = smov [#allocation2]   ;;  %s223_s26 = int_to_ptr.vmem [resolvable:$true] %s222_s26 }
  0x29   :  { %225 = dma.hbm_to_vmem [thread:$0]  %s221_s27, 16, %s223_s26, [#allocation24]  }
  0x2a   :  { %s48_s8 = sshll.u32 %s9693_s2, 4  ;;  %s11073_s20 = sld [smem:[#allocation44_spill]]  ;;  %s49_s8 = int_to_ptr.vmem [resolvable:$true] %s48_s8 }
  0x2b   :  { %s109_s9 = sshll.u32 %s11027_s10, 4  ;;  %s9694_s17 = smov [#allocation7]   ;;  %s110_s9 = int_to_ptr.hbm [resolvable:$true] %s109_s9 }
  0x2c   :  { %s78_s4 = sshll.u32 %s9694_s17, 4  ;;  %s9695_s27 = smov [#allocation10]   ;;  %s79_s4 = int_to_ptr.vmem [resolvable:$true] %s78_s4 }
  0x2d   :  { %s46_s5 = sshll.u32 %s11072_s3, 4  ;;  %s111_s3 = sshll.u32 %s9695_s27, 4  ;;  %s47_s5 = int_to_ptr.hbm [resolvable:$true] %s46_s5  ;;  %s112_s3 = int_to_ptr.vmem [resolvable:$true] %s111_s3 }
  0x2e   :  { %54 = dma.hbm_to_vmem [thread:$0]  %s47_s5, 256, %s49_s8, [#allocation3], %s11071_s11, %s11071_s11, %s9684_s28  }
  0x2f   :  { %s133_s2 = sshll.u32 %s11029_s12, 4  ;;  %s157_s10 = sshll.u32 %s11031_s14, 4  ;;  %s134_s2 = int_to_ptr.hbm [resolvable:$true] %s133_s2  ;;  %s158_s10 = int_to_ptr.hbm [resolvable:$true] %s157_s10 }
  0x30   :  { %s76_s1 = sshll.u32 %s11073_s20, 4  ;;  %s9696_s30 = smov [#allocation13]   ;;  %s77_s1 = int_to_ptr.hbm [resolvable:$true] %s76_s1 }
  0x31   :  { %84 = dma.hbm_to_vmem [thread:$0]  %s77_s1, 2048, %s79_s4, [#allocation6], %s11071_s11, %s11071_s11, %s9684_s28  }
  0x32   :  { %114 = dma.hbm_to_vmem [thread:$0]  %s110_s9, 64, %s112_s3, [#allocation9]  }
  0x33   :  { %s135_s7 = sshll.u32 %s9696_s30, 4  ;;  %s9697_s20 = smov [#allocation16]   ;;  %s136_s7 = int_to_ptr.vmem [resolvable:$true] %s135_s7 }
  0x34   :  { %138 = dma.hbm_to_vmem [thread:$0]  %s134_s2, 64, %s136_s7, [#allocation12]  }
  0x35   :  { %s159_s1 = sshll.u32 %s9697_s20, 4  ;;  %s181_s17 = sshll.u32 %s11033_s16, 4  ;;  %s160_s1 = int_to_ptr.vmem [resolvable:$true] %s159_s1  ;;  %s182_s17 = int_to_ptr.hbm [resolvable:$true] %s181_s17 }
  0x36   :  { %162 = dma.hbm_to_vmem [thread:$0]  %s158_s10, 16, %s160_s1, [#allocation15]  }
  0x37   :  { %s206_s4 = sshll.u32 %s11036_s19, 4  ;;  %s9698_s27 = smov [#allocation19]   ;;  %s207_s4 = int_to_ptr.hbm [resolvable:$true] %s206_s4 }
  0x38   :  { %s183_s14 = sshll.u32 %s9698_s27, 4  ;;  %s9699_s3 = smov [#allocation22]   ;;  %s184_s14 = int_to_ptr.vmem [resolvable:$true] %s183_s14 }
  0x39   :  { %186 = dma.hbm_to_vmem [thread:$0]  %s182_s17, 16, %s184_s14, [#allocation18]  }
  0x3a   :  { %s208_s6 = sshll.u32 %s9699_s3, 4  ;;  %s230_s5 = sshll.u32 %s11038_s21, 4  ;;  %s209_s6 = int_to_ptr.vmem [resolvable:$true] %s208_s6  ;;  %s231_s5 = int_to_ptr.hbm [resolvable:$true] %s230_s5 }
  0x3b   :  { %214 = dma.hbm_to_vmem [thread:$0]  %s207_s4, 4096, %s209_s6, [#allocation21], %s11071_s11, %s11071_s11, %s9684_s28  }
  0x3c   :  { %s245_s19 = sshll.u32 %s11040_s23, 4  ;;  %s9700_s10 = smov [#allocation25]   ;;  %s246_s19 = int_to_ptr.hbm [resolvable:$true] %s245_s19 }
  0x3d   :  { %s232_s30 = sshll.u32 %s9700_s10, 4  ;;  %s9701_s7 = smov [#allocation26]   ;;  %s233_s30 = int_to_ptr.vmem [resolvable:$true] %s232_s30 }
  0x3e   :  { %238 = dma.hbm_to_vmem [thread:$0]  %s231_s5, 9216, %s233_s30, [#allocation24], %s11071_s11, %s11071_s11, %s9684_s28  }
  0x3f   :  { %s247_s21 = sshll.u32 %s9701_s7, 4  ;;  %s248_s21 = int_to_ptr.vmem [resolvable:$true] %s247_s21 }
  0x40   :  { %253 = dma.hbm_to_vmem [thread:$0]  %s246_s19, 4096, %s248_s21, [#allocation27], %s9686_s0, %s9686_s0, %s9687_s29  }
  0x41   :  { %9662 = dma.done.wait [#allocation3], 256  }
  0x42   :  { %9663 = vsyncadd [#allocation3], 4294967040 }
  0x43   :  { %9664 = dma.done.wait [#allocation6], 4352  }
  0x44   :  { %9665 = vsyncadd [#allocation6], 4294962944 }
  0x45   :  { %9666 = dma.done.wait [#allocation9], 4160  }
  0x46   :  { %9667 = vsyncadd [#allocation9], 4294963136 }
  0x47   :  { %9668 = dma.done.wait [#allocation12], 8256  }
  0x48   :  { %9669 = vsyncadd [#allocation12], 4294959040 }
  0x49   :  { %9670 = dma.done.wait [#allocation15], 4112  }
  0x4a   :  { %9671 = vsyncadd [#allocation15], 4294963184 }
  0x4b   :  { %9672 = dma.done.wait [#allocation18], 9232  }
  0x4c   :  { %9673 = vsyncadd [#allocation18], 4294958064 }
  0x4d   :  { %9674 = dma.done.wait [#allocation21], 8192  }
  0x4e   :  { %9675 = vsyncadd [#allocation21], 4294959104 }
  0x4f   :  { %9676 = dma.done.wait [#allocation24], 9232  }
  0x50   :  { %9677 = vsyncadd [#allocation24], 4294958064 }
  0x51   :  { %9678 = dma.done.wait [#allocation27], 4096  }
  0x52   :  { %9679 = vsyncadd [#allocation27], 4294963200  ;;  %v8722_v0 = vld [vmem:[#allocation7 + $0x38] sm:$0xff]  ;;  %v8721_v2 = vld [vmem:[#allocation7 + $0x30] sm:$0xff]  ;;  %s11074_s0 = sld [smem:[#allocation39_spill]]  ;;  %vm660_vm0 = vcmask 1040384  }
  0x53   :  { %v8730_v1 = vld [vmem:[#allocation7 + $0x78] sm:$0xff]  ;;  %533 = vmatpush.bf16.msra.mxu0 %v8722_v0  ;;  %v8729_v3 = vld [vmem:[#allocation7 + $0x70] sm:$0xff]  ;;  %v8720_v4 = vld [vmem:[#allocation7 + $0x28] sm:$0xff]  ;;  %s11075_s23 = sld [smem:[#allocation45_spill]]  ;;  %vm653_vm1 = vcmask 801792   ;;  %vm3192_vm2 = vcmask 261120  }
  0x54   :  { %576 = vmatpush.bf16.msra.mxu1 %v8730_v1  ;;  %v8728_v5 = vld [vmem:[#allocation7 + $0x68] sm:$0xff]  ;;  %v8719_v6 = vld [vmem:[#allocation7 + $0x20] sm:$0xff]  ;;  %v8718_v8 = vld [vmem:[#allocation7 + $0x18] sm:$0xff]  ;;  %s11076_s29 = sld [smem:[#allocation41_spill]]  ;;  %vm6552_vm3 = vcmask 1041408   ;;  %vm6554_vm4 = vcmask 1045508  }
  0x55   :  { %v8727_v7 = vld [vmem:[#allocation7 + $0x60] sm:$0xff]  ;;  %v8726_v9 = vld [vmem:[#allocation7 + $0x58] sm:$0xff]  ;;  %v8717_v10 = vld [vmem:[#allocation7 + $0x10] sm:$0xff]  ;;  %s11077_s11 = sld [smem:[#allocation46_spill]]  ;;  %s9702_s12 = smov [#allocation28]   ;;  %vm6556_vm5 = vcmask 1043456  }
  0x56   :  { %v8725_v11 = vld [vmem:[#allocation7 + $0x50] sm:$0xff]  ;;  %v8716_v12 = vld [vmem:[#allocation7 + $0x8] sm:$0xff]  ;;  %v8715_v14 = vld [vmem:[#allocation7] sm:$0xff]  ;;  %s11090_s17 = sld [smem:[#allocation43_spill]]  ;;  %s6565_s9 = sshll.u32 %s9702_s12, 4  ;;  %s6566_s9 = int_to_ptr.vmem [resolvable:$true] %s6565_s9 }
  0x57   :  { %534 = vmatpush.bf16.msra.mxu0 %v8721_v2  ;;  %v8724_v13 = vld [vmem:[#allocation7 + $0x48] sm:$0xff]  ;;  %v8723_v15 = vld [vmem:[#allocation7 + $0x40] sm:$0xff]  ;;  %s6567_s14 = sshll.u32 %s11042_s25, 4  ;;  %s6568_s14 = int_to_ptr.hbm [resolvable:$true] %s6567_s14 }
  0x58   :  { %577 = vmatpush.bf16.msra.mxu1 %v8729_v3  ;;  %v6587_v16 = vld [vmem:[%s11074_s0] sm:$0xf]  ;;  %v8704_v17 = vld [vmem:[%s11074_s0 + $0x4] sm:$0xf0]  ;;  %v8703_v18 = vld [vmem:[%s11074_s0 + $0x4] sm:$0xf] }
  0x59   :  { %v6589_v19 = vld [vmem:[%s11074_s0 + $0x8] sm:$0xf0]  ;;  %v9926_v20 = vor.u32 %v8704_v17, %v6587_v16  ;;  %v6595_v22 = vld [vmem:[%s11074_s0 + $0x10] sm:$0xf]  ;;  %v8706_v23 = vld [vmem:[%s11074_s0 + $0x14] sm:$0xf0] }
  0x5a   :  { %v9928_v21 = vor.u32 %v8703_v18, %v6589_v19  ;;  %v8705_v24 = vld [vmem:[%s11074_s0 + $0x14] sm:$0xf]  ;;  %v6597_v25 = vld [vmem:[%s11074_s0 + $0x18] sm:$0xf0]  ;;  %v9944_v26 = vor.u32 %v8706_v23, %v6595_v22  ;;  %v6603_v28 = vld [vmem:[%s11074_s0 + $0x20] sm:$0xf] }
  0x5b   :  { %535 = vmatpush.bf16.msra.mxu0 %v8720_v4  ;;  %v9946_v27 = vor.u32 %v8705_v24, %v6597_v25  ;;  %v8708_v29 = vld [vmem:[%s11074_s0 + $0x24] sm:$0xf0]  ;;  %v8707_v30 = vld [vmem:[%s11074_s0 + $0x24] sm:$0xf]  ;;  %v6605_v31 = vld [vmem:[%s11074_s0 + $0x28] sm:$0xf0] }
  0x5c   :  { %578 = vmatpush.bf16.msra.mxu1 %v8728_v5  ;;  %v9962_v32 = vor.u32 %v8708_v29, %v6603_v28  ;;  %v9964_v33 = vor.u32 %v8707_v30, %v6605_v31  ;;  %v6611_v34 = vld [vmem:[%s11074_s0 + $0x30] sm:$0xf]  ;;  %v8710_v35 = vld [vmem:[%s11074_s0 + $0x34] sm:$0xf0]  ;;  %v8709_v36 = vld [vmem:[%s11074_s0 + $0x34] sm:$0xf] }
  0x5d   :  { %v6613_v37 = vld [vmem:[%s11074_s0 + $0x38] sm:$0xf0]  ;;  %v9980_v38 = vor.u32 %v8710_v35, %v6611_v34  ;;  %v6619_v40 = vld [vmem:[%s11074_s0 + $0x40] sm:$0xf]  ;;  %v8712_v41 = vld [vmem:[%s11074_s0 + $0x44] sm:$0xf0] }
  0x5e   :  { %v9982_v39 = vor.u32 %v8709_v36, %v6613_v37  ;;  %v8711_v42 = vld [vmem:[%s11074_s0 + $0x44] sm:$0xf]  ;;  %v6621_v43 = vld [vmem:[%s11074_s0 + $0x48] sm:$0xf0]  ;;  %v9998_v44 = vor.u32 %v8712_v41, %v6619_v40  ;;  %v6627_v46 = vld [vmem:[%s11074_s0 + $0x50] sm:$0xf] }
  0x5f   :  { %536 = vmatpush.bf16.msra.mxu0 %v8719_v6  ;;  %v10000_v45 = vor.u32 %v8711_v42, %v6621_v43  ;;  %v8714_v47 = vld [vmem:[%s11074_s0 + $0x54] sm:$0xf0]  ;;  %v8713_v48 = vld [vmem:[%s11074_s0 + $0x54] sm:$0xf]  ;;  %v6629_v49 = vld [vmem:[%s11074_s0 + $0x58] sm:$0xf0] }
  0x60   :  { %579 = vmatpush.bf16.msra.mxu1 %v8727_v7  ;;  %v10016_v50 = vor.u32 %v8714_v47, %v6627_v46  ;;  %v10018_v51 = vor.u32 %v8713_v48, %v6629_v49  ;;  %v333_v52 = vld [vmem:[%s11074_s0 + $0x60] sm:$0x11]  ;;  %s11078_s0 = sld [smem:[#allocation47_spill]] }
  0x61   :  { %v407_v53 = vunpack.c.l.b16 %v333_v52  ;;  %v408_v54 = vunpack.c.h.b16 %v333_v52  ;;  %v10034_v57 = vld [vmem:[%s11075_s23] ss:$0 sm:$0xff] }
  0x63   :  { %537 = vmatpush.bf16.msra.mxu0 %v8718_v8  ;;  %v10025_v55 = vpack.c.b16 %v407_v53, %v407_v53  ;;  %v10027_v56 = vpack.c.b16 %v408_v54, %v408_v54 }
  0x64   :  { %580 = vmatpush.bf16.msra.mxu1 %v8726_v9 }
  0x67   :  { %538 = vmatpush.bf16.msra.mxu0 %v8717_v10 }
  0x68   :  { %581 = vmatpush.bf16.msra.mxu1 %v8725_v11 }
  0x6b   :  { %539 = vmatpush.bf16.msra.mxu0 %v8716_v12 }
  0x6c   :  { %582 = vmatpush.bf16.msra.mxu1 %v8724_v13 }
  0x6f   :  { %540 = vmatpush.bf16.msra.mxu0 %v8715_v14 }
  0x70   :  { %583 = vmatpush.bf16.msra.mxu1 %v8723_v15 }
  0x72   :  { %541 = vmatmul.bf16.vlgmr.msra.gmra.mxu0 %v9926_v20 }
  0x73   :  { %584 = vmatmul.bf16.vlgmr.msra.gmra.mxu1 %v9928_v21 }
  0x82   :  { %546 = vmatmul.bf16.gmra.mxu0 %v9944_v26 }
  0x83   :  { %589 = vmatmul.bf16.gmra.mxu1 %v9946_v27 }
  0x92   :  { %551 = vmatmul.bf16.gmra.mxu0 %v9962_v32 }
  0x93   :  { %594 = vmatmul.bf16.gmra.mxu1 %v9964_v33 }
  0xa2   :  { %556 = vmatmul.bf16.gmra.mxu0 %v9980_v38 }
  0xa3   :  { %599 = vmatmul.bf16.gmra.mxu1 %v9982_v39 }
  0xb2   :  { %561 = vmatmul.bf16.gmra.mxu0 %v9998_v44 }
  0xb3   :  { %604 = vmatmul.bf16.gmra.mxu1 %v10000_v45 }
  0xc2   :  { %566 = vmatmul.bf16.gmra.mxu0 %v10016_v50 }
  0xc3   :  { %609 = vmatmul.bf16.gmra.mxu1 %v10018_v51 }
  0xd2   :  { %571 = vmatmul.bf16.gmra.mxu0 %v10025_v55 }
  0xd3   :  { %614 = vmatmul.bf16.gmra.mxu1 %v10027_v56 }
  0xef   :  { %v542_v58 = vpop.f32.mrf.mxu0 }
  0xf0   :  { %v585_v59 = vpop.f32.mrf.mxu1  ;;  %v543_v60 = vadd.f32 %v10034_v57, %v542_v58 }
  0xf2   :  { %v10037_v61 = vadd.f32 %v585_v59, %v543_v60 }
  0xf7   :  { %v10039_v62 = vpop.f32.mrf.mxu0 }
  0xf8   :  { %v10041_v63 = vpop.f32.mrf.mxu1 }
  0xff   :  { %v547_v0 = vpop.f32.mrf.mxu0 }
 0x100   :  { %v590_v1 = vpop.f32.mrf.mxu1  ;;  %v548_v2 = vadd.f32 %v10034_v57, %v547_v0 }
 0x102   :  { %v10044_v3 = vadd.f32 %v590_v1, %v548_v2 }
 0x107   :  { %v549_v4 = vpop.f32.mrf.mxu0 }
 0x108   :  { %v592_v5 = vpop.f32.mrf.mxu1 }
 0x10f   :  { %v552_v6 = vpop.f32.mrf.mxu0 }
 0x110   :  { %v595_v7 = vpop.f32.mrf.mxu1  ;;  %v553_v8 = vadd.f32 %v10034_v57, %v552_v6 }
 0x112   :  { %v10047_v9 = vadd.f32 %v595_v7, %v553_v8  ;;  %v550_v8 = vadd.f32 %v10034_v57, %v549_v4 }
 0x114   :  { %v623_v4 = vmax.f32 %v10047_v9, 0.0  ;;  %v8733_v9 = vld [vmem:[%s11076_s29 + $0x10] sm:$0xff] }
 0x117   :  { %v554_v10 = vpop.f32.mrf.mxu0 }
 0x118   :  { %v597_v11 = vpop.f32.mrf.mxu1  ;;  %v555_v60 = vadd.f32 %v10034_v57, %v554_v10  ;;  %v545_v10 = vadd.f32 %v10034_v57, %v10039_v62 }
 0x11f   :  { %v557_v12 = vpop.f32.mrf.mxu0 }
 0x120   :  { %v600_v13 = vpop.f32.mrf.mxu1  ;;  %v558_v54 = vadd.f32 %v10034_v57, %v557_v12  ;;  %v598_v12 = vadd.f32 %v597_v11, %v555_v60  ;;  %v588_v11 = vadd.f32 %v10041_v63, %v545_v10  ;;  %v8751_v60 = vld [vmem:[%s11077_s11 + $0x10] sm:$0xff]  ;;  %v8780_v10 = vld [vmem:[%s11077_s11 + $0xf8] sm:$0xff] }
 0x122   :  { %v601_v6 = vadd.f32 %v600_v13, %v558_v54  ;;  %v593_v13 = vadd.f32 %v592_v5, %v550_v8  ;;  %v619_v5 = vmax.f32 %v10037_v61, 0.0  ;;  %v8732_v61 = vld [vmem:[%s11076_s29 + $0x8] sm:$0xff]  ;;  %v8749_v8 = vld [vmem:[%s11077_s11] sm:$0xff] }
 0x123   :  { %v8748_v54 = vld [vmem:[%s11076_s29 + $0x88] sm:$0xff] }
 0x127   :  { %v559_v14 = vpop.f32.mrf.mxu0 }
 0x128   :  { %v602_v15 = vpop.f32.mrf.mxu1  ;;  %v560_v46 = vadd.f32 %v10034_v57, %v559_v14 }
 0x12a   :  { %v603_v0 = vadd.f32 %v602_v15, %v560_v46  ;;  %v624_v15 = vmax.f32 %v598_v12, 0.0  ;;  %v8754_v46 = vld [vmem:[%s11077_s11 + $0x28] sm:$0xff]  ;;  %v8757_v12 = vld [vmem:[%s11077_s11 + $0x40] sm:$0xff] }
 0x12c   :  { %v626_v14 = vmax.f32 %v603_v0, 0.0  ;;  %v8759_v0 = vld [vmem:[%s11077_s11 + $0x50] sm:$0xff] }
 0x12f   :  { %v562_v16 = vpop.f32.mrf.mxu0 }
 0x130   :  { %v605_v17 = vpop.f32.mrf.mxu1  ;;  %v563_v41 = vadd.f32 %v10034_v57, %v562_v16 }
 0x132   :  { %v606_v58 = vadd.f32 %v605_v17, %v563_v41  ;;  %v625_v17 = vmax.f32 %v601_v6, 0.0  ;;  %v8764_v41 = vld [vmem:[%s11077_s11 + $0x78] sm:$0xff]  ;;  %v8744_v6 = vld [vmem:[%s11076_s29 + $0x68] sm:$0xff] }
 0x134   :  { %v627_v7 = vmax.f32 %v606_v58, 0.0  ;;  %v8752_v58 = vld [vmem:[%s11077_s11 + $0x18] sm:$0xff] }
 0x137   :  { %v564_v18 = vpop.f32.mrf.mxu0 }
 0x138   :  { %v607_v19 = vpop.f32.mrf.mxu1  ;;  %v565_v36 = vadd.f32 %v10034_v57, %v564_v18  ;;  %v10076_v18 = vpack.c.bf16 %v626_v14, %v625_v17  ;;  %v8772_v14 = vld [vmem:[%s11077_s11 + $0xb8] sm:$0xff]  ;;  %v8770_v17 = vld [vmem:[%s11077_s11 + $0xa8] sm:$0xff] }
 0x13a   :  { %v608_v47 = vadd.f32 %v607_v19, %v565_v36  ;;  %v622_v19 = vmax.f32 %v593_v13, 0.0  ;;  %v8742_v36 = vld [vmem:[%s11076_s29 + $0x58] sm:$0xff]  ;;  %v8769_v13 = vld [vmem:[%s11077_s11 + $0xa0] sm:$0xff] }
 0x13c   :  { %v628_v1 = vmax.f32 %v608_v47, 0.0  ;;  %v8762_v47 = vld [vmem:[%s11077_s11 + $0x68] sm:$0xff] }
 0x13e   :  { %v10069_v16 = vpack.c.bf16 %v628_v1, %v627_v7  ;;  %v8750_v1 = vld [vmem:[%s11077_s11 + $0x8] sm:$0xff]  ;;  %v8746_v7 = vld [vmem:[%s11076_s29 + $0x78] sm:$0xff] }
 0x13f   :  { %v567_v22 = vpop.f32.mrf.mxu0 }
 0x140   :  { %v610_v23 = vpop.f32.mrf.mxu1  ;;  %v568_v34 = vadd.f32 %v10034_v57, %v567_v22  ;;  %v10083_v22 = vpack.c.bf16 %v624_v15, %v623_v4  ;;  %v8779_v15 = vld [vmem:[%s11077_s11 + $0xf0] sm:$0xff] }
 0x142   :  { %v611_v42 = vadd.f32 %v610_v23, %v568_v34  ;;  %v621_v23 = vmax.f32 %v10044_v3, 0.0  ;;  %v8731_v3 = vld [vmem:[%s11076_s29] sm:$0xff]  ;;  %v8741_v34 = vld [vmem:[%s11076_s29 + $0x50] sm:$0xff] }
 0x144   :  { %v629_v59 = vmax.f32 %v611_v42, 0.0  ;;  %v10089_v62 = vpack.c.bf16 %v622_v19, %v621_v23  ;;  %v8755_v42 = vld [vmem:[%s11077_s11 + $0x30] sm:$0xff]  ;;  %v8778_v19 = vld [vmem:[%s11077_s11 + $0xe8] sm:$0xff]  ;;  %v8777_v23 = vld [vmem:[%s11077_s11 + $0xe0] sm:$0xff] }
 0x147   :  { %v569_v24 = vpop.f32.mrf.mxu0 }
 0x148   :  { %v612_v25 = vpop.f32.mrf.mxu1  ;;  %v570_v28 = vadd.f32 %v10034_v57, %v569_v24  ;;  %v8734_v24 = vld [vmem:[%s11076_s29 + $0x18] sm:$0xff] }
 0x14a   :  { %v613_v37 = vadd.f32 %v612_v25, %v570_v28  ;;  %v8735_v25 = vld [vmem:[%s11076_s29 + $0x20] sm:$0xff]  ;;  %v8737_v28 = vld [vmem:[%s11076_s29 + $0x30] sm:$0xff] }
 0x14c   :  { %v630_v48 = vmax.f32 %v613_v37, 0.0  ;;  %v8747_v37 = vld [vmem:[%s11076_s29 + $0x80] sm:$0xff] }
 0x14e   :  { %v10063_v2 = vpack.c.bf16 %v630_v48, %v629_v59  ;;  %v8753_v48 = vld [vmem:[%s11077_s11 + $0x20] sm:$0xff]  ;;  %v8760_v59 = vld [vmem:[%s11077_s11 + $0x58] sm:$0xff] }
 0x14f   :  { %v572_v29 = vpop.f32.mrf.mxu0 }
 0x150   :  { %v615_v30 = vpop.f32.mrf.mxu1  ;;  %v573_v31 = vadd.f32 %v10034_v57, %v572_v29  ;;  %v620_v57 = vmax.f32 %v588_v11, 0.0  ;;  %v8736_v29 = vld [vmem:[%s11076_s29 + $0x28] sm:$0xff]  ;;  %v8768_v11 = vld [vmem:[%s11077_s11 + $0x98] sm:$0xff] }
 0x152   :  { %v616_v35 = vadd.f32 %v615_v30, %v573_v31  ;;  %v10095_v63 = vpack.c.bf16 %v620_v57, %v619_v5  ;;  %v8738_v30 = vld [vmem:[%s11076_s29 + $0x38] sm:$0xff]  ;;  %v8739_v31 = vld [vmem:[%s11076_s29 + $0x40] sm:$0xff] }
 0x154   :  { %v631_v40 = vmax.f32 %v616_v35, 0.0  ;;  %v8740_v35 = vld [vmem:[%s11076_s29 + $0x48] sm:$0xff] }
 0x156   :  { %v638_v43 = vpack.c.bf16 %v631_v40, %v631_v40  ;;  %v8756_v40 = vld [vmem:[%s11077_s11 + $0x38] sm:$0xff] }
 0x157   :  { %v574_v49 = vpop.f32.mrf.mxu0  ;;  %1727 = vmatpush.bf16.msrb.mxu1 %v8756_v40 }
 0x158   :  { %v617_v52 = vpop.f32.mrf.mxu1  ;;  %v10056_v53 = vsel %vm660_vm0, %v638_v43, 0  ;;  %v8763_v43 = vld [vmem:[%s11077_s11 + $0x70] sm:$0xff]  ;;  %v8761_v49 = vld [vmem:[%s11077_s11 + $0x60] sm:$0xff] }
 0x159   :  { %665 = vmatpush.bf16.msra.mxu2 %v10056_v53  ;;  %709 = vmatpush.bf16.msra.mxu3 %v10056_v53  ;;  %v8743_v52 = vld [vmem:[%s11076_s29 + $0x60] sm:$0xff] }
 0x15a   :  { %1017 = vmatpush.bf16.msrb.mxu0 %v10056_v53 }
 0x15b   :  { %1728 = vmatpush.bf16.msrb.mxu1 %v8755_v42  ;;  %v8788_v42 = vld [vmem:[%s11077_s11 + $0x138] sm:$0xff] }
 0x15d   :  { %666 = vmatpush.bf16.msra.mxu2 %v10063_v2  ;;  %710 = vmatpush.bf16.msra.mxu3 %v10063_v2 }
 0x15e   :  { %1018 = vmatpush.bf16.msrb.mxu0 %v10063_v2 }
 0x15f   :  { %1729 = vmatpush.bf16.msrb.mxu1 %v8754_v46  ;;  %v8773_v46 = vld [vmem:[%s11077_s11 + $0xc0] sm:$0xff] }
 0x161   :  { %667 = vmatpush.bf16.msra.mxu2 %v10069_v16  ;;  %711 = vmatpush.bf16.msra.mxu3 %v10069_v16 }
 0x162   :  { %1019 = vmatpush.bf16.msrb.mxu0 %v10069_v16 }
 0x163   :  { %1730 = vmatpush.bf16.msrb.mxu1 %v8753_v48  ;;  %v8795_v48 = vld [vmem:[%s11077_s11 + $0x170] sm:$0xff] }
 0x165   :  { %668 = vmatpush.bf16.msra.mxu2 %v10076_v18  ;;  %712 = vmatpush.bf16.msra.mxu3 %v10076_v18 }
 0x166   :  { %1020 = vmatpush.bf16.msrb.mxu0 %v10076_v18 }
 0x167   :  { %1731 = vmatpush.bf16.msrb.mxu1 %v8752_v58  ;;  %v8786_v58 = vld [vmem:[%s11077_s11 + $0x128] sm:$0xff] }
 0x169   :  { %669 = vmatpush.bf16.msra.mxu2 %v10083_v22  ;;  %713 = vmatpush.bf16.msra.mxu3 %v10083_v22 }
 0x16a   :  { %1021 = vmatpush.bf16.msrb.mxu0 %v10083_v22 }
 0x16b   :  { %1732 = vmatpush.bf16.msrb.mxu1 %v8751_v60 }
 0x16d   :  { %670 = vmatpush.bf16.msra.mxu2 %v10089_v62  ;;  %714 = vmatpush.bf16.msra.mxu3 %v10089_v62 }
 0x16e   :  { %1022 = vmatpush.bf16.msrb.mxu0 %v10089_v62 }
 0x16f   :  { %1733 = vmatpush.bf16.msrb.mxu1 %v8750_v1 }
 0x171   :  { %671 = vmatpush.bf16.msra.mxu2 %v10095_v63  ;;  %715 = vmatpush.bf16.msra.mxu3 %v10095_v63 }
 0x172   :  { %1023 = vmatpush.bf16.msrb.mxu0 %v10095_v63 }
 0x173   :  { %1734 = vmatpush.bf16.msrb.mxu1 %v8749_v8  ;;  %v8785_v8 = vld [vmem:[%s11077_s11 + $0x120] sm:$0xff] }
 0x174   :  { %6705 = vmatmul.msk.bf16.vlgmr.msra.gmra.mxu2 %vm653_vm1, %v8731_v3  ;;  %6719 = vmatmul.msk.bf16.vlgmr.msra.gmra.mxu3 %vm653_vm1, %v8733_v9  ;;  %v8766_v3 = vld [vmem:[%s11077_s11 + $0x88] sm:$0xff]  ;;  %v8776_v9 = vld [vmem:[%s11077_s11 + $0xd8] sm:$0xff] }
 0x175   :  { %753 = vmatpush.bf16.msrb.mxu2 %v10056_v53  ;;  %797 = vmatpush.bf16.msrb.mxu3 %v10056_v53 }
 0x176   :  { %6817 = vmatmul.msk.bf16.vlgmr.msrb.gmra.mxu0 %vm653_vm1, %v8747_v37 }
 0x177   :  { %1784 = vmatpush.bf16.msra.mxu0 %v8780_v10  ;;  %1803 = vmatpush.bf16.msra.mxu1 %v8788_v42  ;;  %v8784_v10 = vld [vmem:[%s11077_s11 + $0x118] sm:$0xff] }
 0x179   :  { %754 = vmatpush.bf16.msrb.mxu2 %v10063_v2  ;;  %798 = vmatpush.bf16.msrb.mxu3 %v10063_v2 }
 0x17b   :  { %1785 = vmatpush.bf16.msra.mxu0 %v8779_v15 }
 0x17d   :  { %755 = vmatpush.bf16.msrb.mxu2 %v10069_v16  ;;  %799 = vmatpush.bf16.msrb.mxu3 %v10069_v16 }
 0x17f   :  { %1786 = vmatpush.bf16.msra.mxu0 %v8778_v19 }
 0x181   :  { %756 = vmatpush.bf16.msrb.mxu2 %v10076_v18  ;;  %800 = vmatpush.bf16.msrb.mxu3 %v10076_v18 }
 0x183   :  { %1787 = vmatpush.bf16.msra.mxu0 %v8777_v23  ;;  %v8782_v23 = vld [vmem:[%s11077_s11 + $0x108] sm:$0xff] }
 0x184   :  { %6706 = vmatmul.msk.bf16.gmra.mxu2 %vm653_vm1, %v8732_v61  ;;  %6720 = vmatmul.msk.bf16.gmra.mxu3 %vm653_vm1, %v8734_v24 }
 0x185   :  { %757 = vmatpush.bf16.msrb.mxu2 %v10083_v22  ;;  %801 = vmatpush.bf16.msrb.mxu3 %v10083_v22 }
 0x186   :  { %6818 = vmatmul.msk.bf16.gmra.mxu0 %vm653_vm1, %v8748_v54 }
 0x187   :  { %1788 = vmatpush.bf16.msra.mxu0 %v8776_v9 }
 0x189   :  { %758 = vmatpush.bf16.msrb.mxu2 %v10089_v62  ;;  %802 = vmatpush.bf16.msrb.mxu3 %v10089_v62 }
 0x18d   :  { %759 = vmatpush.bf16.msrb.mxu2 %v10095_v63  ;;  %803 = vmatpush.bf16.msrb.mxu3 %v10095_v63 }
 0x191   :  { %841 = vmatpush.bf16.msra.mxu2 %v10056_v53  ;;  %885 = vmatpush.bf16.msra.mxu3 %v10056_v53 }
 0x194   :  { %6733 = vmatmul.msk.bf16.vlgmr.msrb.gmra.mxu2 %vm653_vm1, %v8735_v25  ;;  %6747 = vmatmul.msk.bf16.vlgmr.msrb.gmra.mxu3 %vm653_vm1, %v8737_v28 }
 0x195   :  { %842 = vmatpush.bf16.msra.mxu2 %v10063_v2  ;;  %886 = vmatpush.bf16.msra.mxu3 %v10063_v2 }
 0x199   :  { %843 = vmatpush.bf16.msra.mxu2 %v10069_v16  ;;  %887 = vmatpush.bf16.msra.mxu3 %v10069_v16 }
 0x19d   :  { %844 = vmatpush.bf16.msra.mxu2 %v10076_v18  ;;  %888 = vmatpush.bf16.msra.mxu3 %v10076_v18 }
 0x1a1   :  { %845 = vmatpush.bf16.msra.mxu2 %v10083_v22  ;;  %889 = vmatpush.bf16.msra.mxu3 %v10083_v22 }
 0x1a4   :  { %6734 = vmatmul.msk.bf16.gmra.mxu2 %vm653_vm1, %v8736_v29  ;;  %6748 = vmatmul.msk.bf16.gmra.mxu3 %vm653_vm1, %v8738_v30 }
 0x1a5   :  { %846 = vmatpush.bf16.msra.mxu2 %v10089_v62  ;;  %890 = vmatpush.bf16.msra.mxu3 %v10089_v62 }
 0x1a9   :  { %847 = vmatpush.bf16.msra.mxu2 %v10095_v63  ;;  %891 = vmatpush.bf16.msra.mxu3 %v10095_v63 }
 0x1ad   :  { %929 = vmatpush.bf16.msrb.mxu2 %v10056_v53  ;;  %973 = vmatpush.bf16.msrb.mxu3 %v10056_v53  ;;  %v8745_v53 = vld [vmem:[%s11076_s29 + $0x70] sm:$0xff] }
 0x1b1   :  { %930 = vmatpush.bf16.msrb.mxu2 %v10063_v2  ;;  %974 = vmatpush.bf16.msrb.mxu3 %v10063_v2  ;;  %v8758_v2 = vld [vmem:[%s11077_s11 + $0x48] sm:$0xff] }
 0x1b4   :  { %6761 = vmatmul.msk.bf16.vlgmr.msra.gmra.mxu2 %vm653_vm1, %v8739_v31  ;;  %6775 = vmatmul.msk.bf16.vlgmr.msra.gmra.mxu3 %vm653_vm1, %v8741_v34  ;;  %v8765_v31 = vld [vmem:[%s11077_s11 + $0x80] sm:$0xff]  ;;  %v8775_v34 = vld [vmem:[%s11077_s11 + $0xd0] sm:$0xff] }
 0x1b5   :  { %931 = vmatpush.bf16.msrb.mxu2 %v10069_v16  ;;  %975 = vmatpush.bf16.msrb.mxu3 %v10069_v16  ;;  %v8771_v16 = vld [vmem:[%s11077_s11 + $0xb0] sm:$0xff] }
 0x1b6   :  { %1789 = vmatpush.bf16.msra.mxu0 %v8775_v34  ;;  %v8804_v34 = vld [vmem:[%s11077_s11 + $0x1b8] sm:$0xff] }
 0x1b9   :  { %932 = vmatpush.bf16.msrb.mxu2 %v10076_v18  ;;  %976 = vmatpush.bf16.msrb.mxu3 %v10076_v18 }
 0x1bd   :  { %933 = vmatpush.bf16.msrb.mxu2 %v10083_v22  ;;  %977 = vmatpush.bf16.msrb.mxu3 %v10083_v22  ;;  %v8767_v22 = vld [vmem:[%s11077_s11 + $0x90] sm:$0xff] }
 0x1c1   :  { %934 = vmatpush.bf16.msrb.mxu2 %v10089_v62  ;;  %978 = vmatpush.bf16.msrb.mxu3 %v10089_v62 }
 0x1c4   :  { %6762 = vmatmul.msk.bf16.gmra.mxu2 %vm653_vm1, %v8740_v35  ;;  %6776 = vmatmul.msk.bf16.gmra.mxu3 %vm653_vm1, %v8742_v36 }
 0x1c5   :  { %935 = vmatpush.bf16.msrb.mxu2 %v10095_v63  ;;  %979 = vmatpush.bf16.msrb.mxu3 %v10095_v63 }
 0x1c9   :  { %1746 = vmatpush.bf16.msra.mxu2 %v8764_v41  ;;  %1765 = vmatpush.bf16.msra.mxu3 %v8772_v14  ;;  %v8774_v41 = vld [vmem:[%s11077_s11 + $0xc8] sm:$0xff] }
 0x1ca   :  { %1790 = vmatpush.bf16.msra.mxu0 %v8774_v41 }
 0x1cd   :  { %1747 = vmatpush.bf16.msra.mxu2 %v8763_v43  ;;  %1766 = vmatpush.bf16.msra.mxu3 %v8771_v16  ;;  %v8796_v43 = vld [vmem:[%s11077_s11 + $0x178] sm:$0xff] }
 0x1ce   :  { %1791 = vmatpush.bf16.msra.mxu0 %v8773_v46  ;;  %v8812_v46 = vld [vmem:[%s11077_s11 + $0x1f8] sm:$0xff] }
 0x1d1   :  { %1748 = vmatpush.bf16.msra.mxu2 %v8762_v47  ;;  %1767 = vmatpush.bf16.msra.mxu3 %v8770_v17  ;;  %v8787_v47 = vld [vmem:[%s11077_s11 + $0x130] sm:$0xff] }
 0x1d2   :  { %1804 = vmatpush.bf16.msra.mxu1 %v8787_v47  ;;  %1860 = vmatpush.bf16.msrb.mxu0 %v8812_v46 }
 0x1d4   :  { %6789 = vmatmul.msk.bf16.vlgmr.msrb.gmra.mxu2 %vm653_vm1, %v8743_v52  ;;  %6803 = vmatmul.msk.bf16.vlgmr.msrb.gmra.mxu3 %vm653_vm1, %v8745_v53 }
 0x1d5   :  { %1749 = vmatpush.bf16.msra.mxu2 %v8761_v49  ;;  %1768 = vmatpush.bf16.msra.mxu3 %v8769_v13  ;;  %v8792_v13 = vld [vmem:[%s11077_s11 + $0x158] sm:$0xff] }
 0x1d6   :  { %1805 = vmatpush.bf16.msra.mxu1 %v8786_v58 }
 0x1d9   :  { %1750 = vmatpush.bf16.msra.mxu2 %v8760_v59  ;;  %1769 = vmatpush.bf16.msra.mxu3 %v8768_v11  ;;  %v8794_v59 = vld [vmem:[%s11077_s11 + $0x168] sm:$0xff] }
 0x1da   :  { %1806 = vmatpush.bf16.msra.mxu1 %v8785_v8 }
 0x1dd   :  { %1751 = vmatpush.bf16.msra.mxu2 %v8759_v0  ;;  %1770 = vmatpush.bf16.msra.mxu3 %v8767_v22 }
 0x1de   :  { %1807 = vmatpush.bf16.msra.mxu1 %v8784_v10 }
 0x1e1   :  { %1752 = vmatpush.bf16.msra.mxu2 %v8758_v2  ;;  %1771 = vmatpush.bf16.msra.mxu3 %v8766_v3 }
 0x1e4   :  { %6790 = vmatmul.msk.bf16.gmra.mxu2 %vm653_vm1, %v8744_v6  ;;  %6804 = vmatmul.msk.bf16.gmra.mxu3 %vm653_vm1, %v8746_v7 }
 0x1e5   :  { %1753 = vmatpush.bf16.msra.mxu2 %v8757_v12  ;;  %1772 = vmatpush.bf16.msra.mxu3 %v8765_v31  ;;  %v8793_v12 = vld [vmem:[%s11077_s11 + $0x160] sm:$0xff] }
 0x1e9   :  { %1822 = vmatpush.bf16.msrb.mxu2 %v8796_v43  ;;  %1841 = vmatpush.bf16.msrb.mxu3 %v8804_v34  ;;  %v8802_v43 = vld [vmem:[%s11077_s11 + $0x1a8] sm:$0xff] }
 0x1ed   :  { %1823 = vmatpush.bf16.msrb.mxu2 %v8795_v48 }
 0x1f1   :  { %1824 = vmatpush.bf16.msrb.mxu2 %v8794_v59  ;;  %v8801_v59 = vld [vmem:[%s11077_s11 + $0x1a0] sm:$0xff] }
 0x1f5   :  { %1825 = vmatpush.bf16.msrb.mxu2 %v8793_v12  ;;  %v8799_v12 = vld [vmem:[%s11077_s11 + $0x190] sm:$0xff] }
 0x1f7   :  { %v673_v18 = vpop.f32.mrf.mxu2  ;;  %v717_v4 = vpop.f32.mrf.mxu3 }
 0x1f8   :  { %v727_v57 = vpack.c.bf16 %v717_v4, %v717_v4  ;;  %v683_v62 = vpack.c.bf16 %v673_v18, %v673_v18  ;;  %v8783_v18 = vld [vmem:[%s11077_s11 + $0x110] sm:$0xff] }
 0x1f9   :  { %1826 = vmatpush.bf16.msrb.mxu2 %v8792_v13  ;;  %v8791_v4 = vld [vmem:[%s11077_s11 + $0x150] sm:$0xff]  ;;  %1808 = vmatpush.bf16.msra.mxu1 %v8783_v18  ;;  %v8798_v13 = vld [vmem:[%s11077_s11 + $0x188] sm:$0xff] }
 0x1fa   :  { %v1055_v61 = vunpack.c.l.b16 %v727_v57  ;;  %v1043_v28 = vunpack.c.l.b16 %v683_v62  ;;  %v8790_v57 = vld [vmem:[%s11077_s11 + $0x148] sm:$0xff] }
 0x1fd   :  { %1827 = vmatpush.bf16.msrb.mxu2 %v8791_v4  ;;  %1809 = vmatpush.bf16.msra.mxu1 %v8782_v23 }
 0x1ff   :  { %v675_v5 = vpop.f32.mrf.mxu2  ;;  %v719_v63 = vpop.f32.mrf.mxu3 }
 0x200   :  { %v684_v24 = vpack.c.bf16 %v675_v5, %v675_v5  ;;  %v728_v25 = vpack.c.bf16 %v719_v63, %v719_v63 }
 0x201   :  { %1828 = vmatpush.bf16.msrb.mxu2 %v8790_v57 }
 0x202   :  { %v1044_v29 = vunpack.c.l.b16 %v684_v24  ;;  %v1056_v30 = vunpack.c.l.b16 %v728_v25  ;;  %v8781_v25 = vld [vmem:[%s11077_s11 + $0x100] sm:$0xff] }
 0x203   :  { %1810 = vmatpush.bf16.msra.mxu1 %v8781_v25  ;;  %v1025_v25 = vpop.f32.mrf.mxu0 }
 0x204   :  { %v1059_v35 = vpack.c.b16 %v1056_v30, %v1055_v61  ;;  %v1047_v36 = vpack.c.b16 %v1044_v29, %v1043_v28  ;;  %v8789_v28 = vld [vmem:[%s11077_s11 + $0x140] sm:$0xff] }
 0x205   :  { %1829 = vmatpush.bf16.msrb.mxu2 %v8789_v28  ;;  %v8805_v28 = vld [vmem:[%s11077_s11 + $0x1c0] sm:$0xff] }
 0x206   :  { %1735 = vmatmul.bf16.vlgmr.msrb.gmra.mxu1 %v1047_v36  ;;  %1754 = vmatmul.bf16.vlgmr.msra.gmra.mxu2 %v1059_v35  ;;  %v8803_v36 = vld [vmem:[%s11077_s11 + $0x1b0] sm:$0xff] }
 0x207   :  { %v678_v37 = vpop.f32.mrf.mxu2  ;;  %v722_v40 = vpop.f32.mrf.mxu3  ;;  %1842 = vmatpush.bf16.msrb.mxu3 %v8803_v36 }
 0x208   :  { %v729_v49 = vpack.c.bf16 %v722_v40, %v722_v40  ;;  %v685_v52 = vpack.c.bf16 %v678_v37, %v678_v37  ;;  %v1925_v37 = vsel %vm660_vm0, %v10025_v55, 0  ;;  %v8820_v55 = vld [vmem:[%s11077_s11 + $0x238] sm:$0xff] }
 0x209   :  { %1931 = vmatpush.bf16.msra.mxu2 %v1925_v37  ;;  %1879 = vmatpush.bf16.msrb.mxu1 %v8820_v55  ;;  %v1035_v55 = vpack.c.bf16 %v1025_v25, %v1025_v25 }
 0x20a   :  { %v1057_v60 = vunpack.c.l.b16 %v729_v49  ;;  %v1045_v2 = vunpack.c.l.b16 %v685_v52 }
 0x20b   :  { %1843 = vmatpush.bf16.msrb.mxu3 %v8802_v43  ;;  %v1027_v46 = vpop.f32.mrf.mxu0 }
 0x20d   :  { %1932 = vmatpush.bf16.msra.mxu2 %v10016_v50  ;;  %v8811_v50 = vld [vmem:[%s11077_s11 + $0x1f0] sm:$0xff] }
 0x20e   :  { %1861 = vmatpush.bf16.msrb.mxu0 %v8811_v50 }
 0x20f   :  { %v680_v53 = vpop.f32.mrf.mxu2  ;;  %v724_v54 = vpop.f32.mrf.mxu3  ;;  %1844 = vmatpush.bf16.msrb.mxu3 %v8801_v59  ;;  %v1139_v59 = vunpack.c.l.b16 %v1035_v55 }
 0x210   :  { %v686_v0 = vpack.c.bf16 %v680_v53, %v680_v53  ;;  %v730_v1 = vpack.c.bf16 %v724_v54, %v724_v54 }
 0x211   :  { %1933 = vmatpush.bf16.msra.mxu2 %v9998_v44  ;;  %v8818_v44 = vld [vmem:[%s11077_s11 + $0x228] sm:$0xff] }
 0x212   :  { %v1046_v6 = vunpack.c.l.b16 %v686_v0  ;;  %v1058_v7 = vunpack.c.l.b16 %v730_v1 }
 0x214   :  { %v1048_v14 = vpack.c.b16 %v1046_v6, %v1045_v2  ;;  %v1060_v16 = vpack.c.b16 %v1058_v7, %v1057_v60  ;;  %v8819_v60 = vld [vmem:[%s11077_s11 + $0x230] sm:$0xff]  ;;  %v8800_v6 = vld [vmem:[%s11077_s11 + $0x198] sm:$0xff]  ;;  %v8810_v7 = vld [vmem:[%s11077_s11 + $0x1e8] sm:$0xff] }
 0x215   :  { %1880 = vmatpush.bf16.msrb.mxu1 %v8819_v60  ;;  %1934 = vmatpush.bf16.msra.mxu2 %v9980_v38 }
 0x216   :  { %1740 = vmatmul.bf16.gmra.mxu1 %v1048_v14  ;;  %1759 = vmatmul.bf16.gmra.mxu2 %v1060_v16  ;;  %v8809_v14 = vld [vmem:[%s11077_s11 + $0x1e0] sm:$0xff] }
 0x217   :  { %v761_v17 = vpop.f32.mrf.mxu2  ;;  %v805_v15 = vpop.f32.mrf.mxu3  ;;  %1845 = vmatpush.bf16.msrb.mxu3 %v8800_v6  ;;  %1862 = vmatpush.bf16.msrb.mxu0 %v8810_v7  ;;  %v8817_v16 = vld [vmem:[%s11077_s11 + $0x220] sm:$0xff] }
 0x218   :  { %v815_v11 = vpack.c.bf16 %v805_v15, %v805_v15  ;;  %v771_v19 = vpack.c.bf16 %v761_v17, %v761_v17  ;;  %v8808_v15 = vld [vmem:[%s11077_s11 + $0x1d8] sm:$0xff] }
 0x219   :  { %1881 = vmatpush.bf16.msrb.mxu1 %v8818_v44  ;;  %1935 = vmatpush.bf16.msra.mxu2 %v9962_v32 }
 0x21a   :  { %v1079_v63 = vunpack.c.l.b16 %v815_v11  ;;  %v1067_v9 = vunpack.c.l.b16 %v771_v19  ;;  %v8816_v19 = vld [vmem:[%s11077_s11 + $0x218] sm:$0xff] }
 0x21b   :  { %1846 = vmatpush.bf16.msrb.mxu3 %v8799_v12  ;;  %1863 = vmatpush.bf16.msrb.mxu0 %v8809_v14 }
 0x21d   :  { %1882 = vmatpush.bf16.msrb.mxu1 %v8817_v16  ;;  %1936 = vmatpush.bf16.msra.mxu2 %v9944_v26  ;;  %v8807_v26 = vld [vmem:[%s11077_s11 + $0x1d0] sm:$0xff] }
 0x21f   :  { %v763_v22 = vpop.f32.mrf.mxu2  ;;  %v807_v5 = vpop.f32.mrf.mxu3  ;;  %1847 = vmatpush.bf16.msrb.mxu3 %v8798_v13  ;;  %1864 = vmatpush.bf16.msrb.mxu0 %v8808_v15 }
 0x220   :  { %v772_v62 = vpack.c.bf16 %v763_v22, %v763_v22  ;;  %v816_v3 = vpack.c.bf16 %v807_v5, %v807_v5 }
 0x221   :  { %1883 = vmatpush.bf16.msrb.mxu1 %v8816_v19  ;;  %1937 = vmatpush.bf16.msra.mxu2 %v9926_v20  ;;  %v8814_v20 = vld [vmem:[%s11077_s11 + $0x208] sm:$0xff] }
 0x222   :  { %v1068_v61 = vunpack.c.l.b16 %v772_v62  ;;  %v1080_v24 = vunpack.c.l.b16 %v816_v3  ;;  %v8797_v62 = vld [vmem:[%s11077_s11 + $0x180] sm:$0xff] }
 0x223   :  { %1848 = vmatpush.bf16.msrb.mxu3 %v8797_v62  ;;  %1865 = vmatpush.bf16.msrb.mxu0 %v8807_v26  ;;  %v8822_v62 = vld [vmem:[#allocation2 + $0x8] sm:$0xff] }
 0x224   :  { %v1071_v29 = vpack.c.b16 %v1068_v61, %v1067_v9  ;;  %v1083_v30 = vpack.c.b16 %v1080_v24, %v1079_v63  ;;  %v8815_v63 = vld [vmem:[%s11077_s11 + $0x210] sm:$0xff]  ;;  %v8806_v61 = vld [vmem:[%s11077_s11 + $0x1c8] sm:$0xff] }
 0x225   :  { %1884 = vmatpush.bf16.msrb.mxu1 %v8815_v63 }
 0x226   :  { %1773 = vmatmul.bf16.vlgmr.msra.gmra.mxu3 %v1071_v29  ;;  %1792 = vmatmul.bf16.vlgmr.msra.gmra.mxu0 %v1083_v30  ;;  %v1928_v29 = vsel %vm660_vm0, %v10027_v56, 0  ;;  %v8813_v30 = vld [vmem:[%s11077_s11 + $0x200] sm:$0xff] }
 0x227   :  { %v766_v31 = vpop.f32.mrf.mxu2  ;;  %v810_v35 = vpop.f32.mrf.mxu3  ;;  %1866 = vmatpush.bf16.msrb.mxu0 %v8806_v61  ;;  %1950 = vmatpush.bf16.msra.mxu3 %v1928_v29  ;;  %v10453_v61 = vld [vmem:[%s11078_s0] ss:$0 sm:$0xff] }
 0x228   :  { %v817_v40 = vpack.c.bf16 %v810_v35, %v810_v35  ;;  %v773_v41 = vpack.c.bf16 %v766_v31, %v766_v31 }
 0x229   :  { %1885 = vmatpush.bf16.msrb.mxu1 %v8814_v20 }
 0x22a   :  { %v1081_v49 = vunpack.c.l.b16 %v817_v40  ;;  %v1069_v53 = vunpack.c.l.b16 %v773_v41 }
 0x22b   :  { %1867 = vmatpush.bf16.msrb.mxu0 %v8805_v28  ;;  %1951 = vmatpush.bf16.msra.mxu3 %v10018_v51  ;;  %v1036_v51 = vpack.c.bf16 %v1027_v46, %v1027_v46 }
 0x22d   :  { %1886 = vmatpush.bf16.msrb.mxu1 %v8813_v30  ;;  %v1140_v50 = vunpack.c.l.b16 %v1036_v51  ;;  %v7219_v51 = vld [vmem:[#allocation11 + $0xd0] sm:$0xf0] }
 0x22f   :  { %v768_v42 = vpop.f32.mrf.mxu2  ;;  %v812_v48 = vpop.f32.mrf.mxu3  ;;  %1952 = vmatpush.bf16.msra.mxu3 %v10000_v45 }
 0x230   :  { %v774_v47 = vpack.c.bf16 %v768_v42, %v768_v42  ;;  %v818_v52 = vpack.c.bf16 %v812_v48, %v812_v48 }
 0x232   :  { %v1070_v54 = vunpack.c.l.b16 %v774_v47  ;;  %v1082_v58 = vunpack.c.l.b16 %v818_v52 }
 0x233   :  { %1953 = vmatpush.bf16.msra.mxu3 %v9982_v39  ;;  %v1143_v39 = vpack.c.b16 %v1140_v50, %v1139_v59  ;;  %v7201_v59 = vld [vmem:[#allocation11 + $0xa0] sm:$0xf]  ;;  %v8845_v50 = vld [vmem:[#allocation11 + $0xac] sm:$0xf0] }
 0x234   :  { %v1072_v0 = vpack.c.b16 %v1070_v54, %v1069_v53  ;;  %v1084_v1 = vpack.c.b16 %v1082_v58, %v1081_v49  ;;  %v1030_v54 = vpop.f32.mrf.mxu0 }
 0x236   :  { %1778 = vmatmul.bf16.gmra.mxu3 %v1072_v0  ;;  %1797 = vmatmul.bf16.gmra.mxu0 %v1084_v1 }
 0x237   :  { %v849_v2 = vpop.f32.mrf.mxu2  ;;  %v893_v8 = vpop.f32.mrf.mxu3  ;;  %1954 = vmatpush.bf16.msra.mxu3 %v9964_v33 }
 0x238   :  { %v903_v38 = vpack.c.bf16 %v893_v8, %v893_v8  ;;  %v859_v17 = vpack.c.bf16 %v849_v2, %v849_v2  ;;  %v8821_v8 = vld [vmem:[#allocation2] sm:$0xff] }
 0x23a   :  { %v1103_v11 = vunpack.c.l.b16 %v903_v38  ;;  %v1091_v22 = vunpack.c.l.b16 %v859_v17  ;;  %v1037_v38 = vpack.c.bf16 %v1030_v54, %v1030_v54 }
 0x23b   :  { %1955 = vmatpush.bf16.msra.mxu3 %v9946_v27 }
 0x23c   :  { %v1032_v27 = vpop.f32.mrf.mxu0  ;;  %v1141_v15 = vunpack.c.l.b16 %v1037_v38  ;;  %v8835_v38 = vld [vmem:[#allocation11 + $0x64] sm:$0xf] }
 0x23d   :  { %v1038_v17 = vpack.c.bf16 %v1032_v27, %v1032_v27  ;;  %v7169_v27 = vld [vmem:[#allocation11 + $0x60] sm:$0xf] }
 0x23f   :  { %v851_v10 = vpop.f32.mrf.mxu2  ;;  %v895_v4 = vpop.f32.mrf.mxu3  ;;  %1956 = vmatpush.bf16.msra.mxu3 %v9928_v21 }
 0x240   :  { %v860_v18 = vpack.c.bf16 %v851_v10, %v851_v10  ;;  %v904_v32 = vpack.c.bf16 %v895_v4, %v895_v4 }
 0x242   :  { %v1092_v23 = vunpack.c.l.b16 %v860_v18  ;;  %v1104_v57 = vunpack.c.l.b16 %v904_v32  ;;  %v1142_v18 = vunpack.c.l.b16 %v1038_v17 }
 0x244   :  { %v1095_v5 = vpack.c.b16 %v1092_v23, %v1091_v22  ;;  %v1107_v3 = vpack.c.b16 %v1104_v57, %v1103_v11  ;;  %v1144_v57 = vpack.c.b16 %v1142_v18, %v1141_v15  ;;  %v7153_v18 = vld [vmem:[#allocation11 + $0x40] sm:$0xf] }
 0x246   :  { %1811 = vmatmul.bf16.vlgmr.msra.gmra.mxu1 %v1095_v5  ;;  %1830 = vmatmul.bf16.vlgmr.msrb.gmra.mxu2 %v1107_v3 }
 0x247   :  { %v854_v9 = vpop.f32.mrf.mxu2  ;;  %v898_v24 = vpop.f32.mrf.mxu3 }
 0x248   :  { %v905_v31 = vpack.c.bf16 %v898_v24, %v898_v24  ;;  %v861_v34 = vpack.c.bf16 %v854_v9, %v854_v9 }
 0x24a   :  { %v1105_v40 = vunpack.c.l.b16 %v905_v31  ;;  %v1093_v42 = vunpack.c.l.b16 %v861_v34 }
 0x24f   :  { %v856_v35 = vpop.f32.mrf.mxu2  ;;  %v900_v37 = vpop.f32.mrf.mxu3 }
 0x250   :  { %v862_v36 = vpack.c.bf16 %v856_v35, %v856_v35  ;;  %v906_v41 = vpack.c.bf16 %v900_v37, %v900_v37  ;;  %v7233_v35 = vld [vmem:[#allocation11 + $0xe0] sm:$0xf]  ;;  %v8851_v37 = vld [vmem:[#allocation11 + $0xe4] sm:$0xf] }
 0x252   :  { %v1094_v43 = vunpack.c.l.b16 %v862_v36  ;;  %v1106_v56 = vunpack.c.l.b16 %v906_v41  ;;  %v8853_v36 = vld [vmem:[#allocation11 + $0xec] sm:$0xf0] }
 0x253   :  { %v7234_v41 = vor.u32 %v8853_v36, %v7233_v35  ;;  %v7123_v36 = vld [vmem:[#allocation11 + $0x10] sm:$0xf0] }
 0x254   :  { %v1096_v47 = vpack.c.b16 %v1094_v43, %v1093_v42  ;;  %v1108_v48 = vpack.c.b16 %v1106_v56, %v1105_v40  ;;  %v7235_v42 = vld [vmem:[#allocation11 + $0xf0] sm:$0xf0] }
 0x255   :  { %v7238_v56 = vor.u32 %v8851_v37, %v7235_v42  ;;  %2366 = vmatpush.bf16.msra.mxu0 %v7234_v41  ;;  %v7361_v42 = vld [vmem:[#allocation11 + $0x1e0] sm:$0xf] }
 0x256   :  { %1816 = vmatmul.bf16.gmra.mxu1 %v1096_v47  ;;  %1835 = vmatmul.bf16.gmra.mxu2 %v1108_v48  ;;  %v7217_v47 = vld [vmem:[#allocation11 + $0xc0] sm:$0xf]  ;;  %v8849_v48 = vld [vmem:[#allocation11 + $0xcc] sm:$0xf0] }
 0x257   :  { %v937_v49 = vpop.f32.mrf.mxu2  ;;  %v981_v52 = vpop.f32.mrf.mxu3  ;;  %2404 = vmatpush.bf16.msrb.mxu2 %v7238_v56  ;;  %v7218_v55 = vor.u32 %v8849_v48, %v7217_v47  ;;  %v8883_v56 = vld [vmem:[#allocation11 + $0x1e4] sm:$0xf]  ;;  %v7363_v47 = vld [vmem:[#allocation11 + $0x1f0] sm:$0xf0]  ;;  %v7241_v48 = vld [vmem:[#allocation11 + $0xe8] sm:$0xf] }
 0x258   :  { %v991_v53 = vpack.c.bf16 %v981_v52, %v981_v52  ;;  %v947_v58 = vpack.c.bf16 %v937_v49, %v937_v49  ;;  %v8847_v49 = vld [vmem:[#allocation11 + $0xc4] sm:$0xf] }
 0x259   :  { %v7222_v54 = vor.u32 %v8847_v49, %v7219_v51  ;;  %2367 = vmatpush.bf16.msra.mxu0 %v7218_v55  ;;  %v8854_v49 = vld [vmem:[#allocation11 + $0xf4] sm:$0xf0]  ;;  %v7366_v55 = vor.u32 %v8883_v56, %v7363_v47  ;;  %v8869_v56 = vld [vmem:[#allocation11 + $0x16c] sm:$0xf0] }
 0x25a   :  { %v1127_v1 = vunpack.c.l.b16 %v991_v53  ;;  %v1115_v6 = vunpack.c.l.b16 %v947_v58  ;;  %v7242_v51 = vor.u32 %v8854_v49, %v7241_v48  ;;  %v7299_v48 = vld [vmem:[#allocation11 + $0x170] sm:$0xf0]  ;;  %v7177_v49 = vld [vmem:[#allocation11 + $0x68] sm:$0xf] }
 0x25b   :  { %2405 = vmatpush.bf16.msrb.mxu2 %v7222_v54  ;;  %v8852_v54 = vld [vmem:[#allocation11 + $0xec] sm:$0xf] }
 0x25f   :  { %v939_v60 = vpop.f32.mrf.mxu2  ;;  %v983_v0 = vpop.f32.mrf.mxu3 }
 0x260   :  { %v948_v45 = vpack.c.bf16 %v939_v60, %v939_v60  ;;  %v992_v2 = vpack.c.bf16 %v983_v0, %v983_v0  ;;  %v8843_v60 = vld [vmem:[#allocation11 + $0xa4] sm:$0xf]  ;;  %v7203_v0 = vld [vmem:[#allocation11 + $0xb0] sm:$0xf0] }
 0x262   :  { %v1116_v7 = vunpack.c.l.b16 %v948_v45  ;;  %v1128_v44 = vunpack.c.l.b16 %v992_v2  ;;  %v7202_v45 = vor.u32 %v8845_v50, %v7201_v59  ;;  %v7243_v59 = vld [vmem:[#allocation11 + $0xf8] sm:$0xf0] }
 0x264   :  { %v1119_v33 = vpack.c.b16 %v1116_v7, %v1115_v6  ;;  %v1131_v12 = vpack.c.b16 %v1128_v44, %v1127_v1  ;;  %v7206_v1 = vor.u32 %v8843_v60, %v7203_v0  ;;  %2368 = vmatpush.bf16.msra.mxu0 %v7202_v45  ;;  %v7185_v6 = vld [vmem:[#allocation11 + $0x80] sm:$0xf]  ;;  %v8841_v7 = vld [vmem:[#allocation11 + $0x8c] sm:$0xf0]  ;;  %v7187_v44 = vld [vmem:[#allocation11 + $0x90] sm:$0xf0]  ;;  %v7246_v60 = vor.u32 %v8852_v54, %v7243_v59 }
 0x265   :  { %v7345_v45 = vld [vmem:[#allocation11 + $0x1c0] sm:$0xf]  ;;  %v8881_v0 = vld [vmem:[#allocation11 + $0x1cc] sm:$0xf0]  ;;  %v8836_v54 = vld [vmem:[#allocation11 + $0x6c] sm:$0xf] }
 0x266   :  { %1849 = vmatmul.bf16.vlgmr.msrb.gmra.mxu3 %v1119_v33  ;;  %1887 = vmatmul.bf16.vlgmr.msrb.gmra.mxu1 %v1143_v39  ;;  %v8839_v39 = vld [vmem:[#allocation11 + $0x84] sm:$0xf]  ;;  %v7179_v59 = vld [vmem:[#allocation11 + $0x78] sm:$0xf0] }
 0x267   :  { %7115 = vmatmul.msk.bf16.vlgmr.msra.gmra.mxu2 %vm653_vm1, %v8821_v8  ;;  %v942_v14 = vpop.f32.mrf.mxu2  ;;  %1868 = vmatmul.bf16.vlgmr.msrb.gmra.mxu0 %v1131_v12  ;;  %v986_v16 = vpop.f32.mrf.mxu3  ;;  %v7190_v12 = vor.u32 %v8839_v39, %v7187_v44  ;;  %v7225_v39 = vld [vmem:[#allocation11 + $0xc8] sm:$0xf] }
 0x268   :  { %v993_v10 = vpack.c.bf16 %v986_v16, %v986_v16  ;;  %v949_v13 = vpack.c.bf16 %v942_v14, %v942_v14  ;;  %2406 = vmatpush.bf16.msrb.mxu2 %v7206_v1  ;;  %v8837_v16 = vld [vmem:[#allocation11 + $0x6c] sm:$0xf0]  ;;  %2423 = vmatpush.bf16.msrb.mxu3 %v7366_v55  ;;  %v8879_v1 = vld [vmem:[#allocation11 + $0x1c4] sm:$0xf] }
 0x269   :  { %v7170_v17 = vor.u32 %v8837_v16, %v7169_v27  ;;  %v8848_v27 = vld [vmem:[#allocation11 + $0xcc] sm:$0xf]  ;;  %v7227_v16 = vld [vmem:[#allocation11 + $0xd8] sm:$0xf0] }
 0x26a   :  { %v1129_v21 = vunpack.c.l.b16 %v993_v10  ;;  %v1117_v22 = vunpack.c.l.b16 %v949_v13  ;;  %v7171_v10 = vld [vmem:[#allocation11 + $0x70] sm:$0xf0] }
 0x26b   :  { %v7174_v13 = vor.u32 %v8835_v38, %v7171_v10  ;;  %v8877_v10 = vld [vmem:[#allocation11 + $0x1ac] sm:$0xf0] }
 0x26c   :  { %2407 = vmatpush.bf16.msrb.mxu2 %v7190_v12 }
 0x26f   :  { %v944_v4 = vpop.f32.mrf.mxu2  ;;  %v988_v32 = vpop.f32.mrf.mxu3 }
 0x270   :  { %v950_v11 = vpack.c.bf16 %v944_v4, %v944_v4  ;;  %v994_v19 = vpack.c.bf16 %v988_v32, %v988_v32  ;;  %2408 = vmatpush.bf16.msrb.mxu2 %v7174_v13  ;;  %v8833_v4 = vld [vmem:[#allocation11 + $0x4c] sm:$0xf0]  ;;  %v8875_v13 = vld [vmem:[#allocation11 + $0x1a4] sm:$0xf] }
 0x272   :  { %v1118_v23 = vunpack.c.l.b16 %v950_v11  ;;  %v1130_v26 = vunpack.c.l.b16 %v994_v19  ;;  %v8831_v11 = vld [vmem:[#allocation11 + $0x44] sm:$0xf]  ;;  %v7155_v19 = vld [vmem:[#allocation11 + $0x50] sm:$0xf0] }
 0x274   :  { %v1120_v5 = vpack.c.b16 %v1118_v23, %v1117_v22  ;;  %v1132_v63 = vpack.c.b16 %v1130_v26, %v1129_v21  ;;  %v7154_v21 = vor.u32 %v8833_v4, %v7153_v18  ;;  %v7331_v18 = vld [vmem:[#allocation11 + $0x1b0] sm:$0xf0]  ;;  %v7209_v4 = vld [vmem:[#allocation11 + $0xa8] sm:$0xf] }
 0x276   :  { %1854 = vmatmul.bf16.gmra.mxu3 %v1120_v5  ;;  %1892 = vmatmul.bf16.gmra.mxu1 %v1144_v57  ;;  %v7158_v57 = vor.u32 %v8831_v11, %v7155_v19  ;;  %v7137_v5 = vld [vmem:[#allocation11 + $0x20] sm:$0xf]  ;;  %v8846_v11 = vld [vmem:[#allocation11 + $0xb4] sm:$0xf0]  ;;  %v8844_v19 = vld [vmem:[#allocation11 + $0xac] sm:$0xf] }
 0x277   :  { %7116 = vmatmul.msk.bf16.gmra.mxu2 %vm653_vm1, %v8822_v62  ;;  %1873 = vmatmul.bf16.gmra.mxu0 %v1132_v63  ;;  %v8829_v63 = vld [vmem:[#allocation11 + $0x2c] sm:$0xf0] }
 0x278   :  { %2409 = vmatpush.bf16.msrb.mxu2 %v7158_v57 }
 0x283   :  { %v1736_v3 = vpop.f32.mrf.mxu1 }
 0x284   :  { %v1737_v24 = vadd.f32 %v10453_v61, %v1736_v3  ;;  %v8827_v3 = vld [vmem:[#allocation11 + $0x24] sm:$0xf] }
 0x286   :  { %7117 = vmatmul.msk.bf16.vlgmr.msra.gmra.mxu3 %vm653_vm1, %v8821_v8  ;;  %v7186_v8 = vor.u32 %v8841_v7, %v7185_v6  ;;  %v7346_v6 = vor.u32 %v8881_v0, %v7345_v45  ;;  %v7347_v7 = vld [vmem:[#allocation11 + $0x1d0] sm:$0xf0]  ;;  %v8865_v45 = vld [vmem:[#allocation11 + $0x14c] sm:$0xf0]  ;;  %v8863_v0 = vld [vmem:[#allocation11 + $0x144] sm:$0xf] }
 0x287   :  { %v7350_v12 = vor.u32 %v8879_v1, %v7347_v7  ;;  %v7161_v7 = vld [vmem:[#allocation11 + $0x48] sm:$0xf] }
 0x288   :  { %2369 = vmatpush.bf16.msra.mxu0 %v7186_v8  ;;  %v8850_v8 = vld [vmem:[#allocation11 + $0xd4] sm:$0xf0] }
 0x289   :  { %v1755_v9 = vpop.f32.mrf.mxu2  ;;  %2424 = vmatpush.bf16.msrb.mxu3 %v7350_v12 }
 0x28a   :  { %v1756_v20 = vadd.f32 %v1755_v9, %v1737_v24  ;;  %v7138_v9 = vor.u32 %v8829_v63, %v7137_v5  ;;  %v7139_v24 = vld [vmem:[#allocation11 + $0x30] sm:$0xf0]  ;;  %v7313_v5 = vld [vmem:[#allocation11 + $0x180] sm:$0xf]  ;;  %v8873_v63 = vld [vmem:[#allocation11 + $0x18c] sm:$0xf0] }
 0x28b   :  { %v10456_v25 = vpop.f32.mrf.mxu1 }
 0x28c   :  { %2370 = vmatpush.bf16.msra.mxu0 %v7170_v17  ;;  %v7329_v17 = vld [vmem:[#allocation11 + $0x1a0] sm:$0xf] }
 0x290   :  { %2371 = vmatpush.bf16.msra.mxu0 %v7154_v21  ;;  %v7210_v21 = vor.u32 %v8846_v11, %v7209_v4  ;;  %v7145_v11 = vld [vmem:[#allocation11 + $0x28] sm:$0xf] }
 0x291   :  { %v10458_v30 = vpop.f32.mrf.mxu2 }
 0x293   :  { %v1741_v31 = vpop.f32.mrf.mxu1 }
 0x294   :  { %v1742_v43 = vadd.f32 %v10453_v61, %v1741_v31  ;;  %2372 = vmatpush.bf16.msra.mxu0 %v7138_v9  ;;  %v8823_v31 = vld [vmem:[#allocation11 + $0x4] sm:$0xf] }
 0x296   :  { %7118 = vmatmul.msk.bf16.gmra.mxu3 %vm653_vm1, %v8822_v62 }
 0x299   :  { %v1760_v40 = vpop.f32.mrf.mxu2 }
 0x29a   :  { %v1761_v46 = vadd.f32 %v1760_v40, %v1742_v43  ;;  %v7126_v40 = vor.u32 %v8823_v31, %v7123_v36  ;;  %v8885_v43 = vld [vmem:[#allocation11 + $0x1ec] sm:$0xf0] }
 0x29b   :  { %v10465_v58 = vpop.f32.mrf.mxu1 }
 0x2a1   :  { %v10467_v33 = vpop.f32.mrf.mxu2 }
 0x2a3   :  { %v1793_v2 = vpop.f32.mrf.mxu0 }
 0x2a9   :  { %v1774_v28 = vpop.f32.mrf.mxu3 }
 0x2aa   :  { %v1775_v29 = vadd.f32 %v1774_v28, %v1756_v20  ;;  %v7142_v20 = vor.u32 %v8827_v3, %v7139_v24  ;;  %v7121_v28 = vld [vmem:[#allocation11] sm:$0xf]  ;;  %v8871_v3 = vld [vmem:[#allocation11 + $0x184] sm:$0xf]  ;;  %v7314_v24 = vor.u32 %v8873_v63, %v7313_v5  ;;  %v8857_v5 = vld [vmem:[#allocation11 + $0x10c] sm:$0xf0] }
 0x2ab   :  { %v10469_v22 = vpop.f32.mrf.mxu0 }
 0x2ac   :  { %v1794_v15 = vadd.f32 %v1793_v2, %v1775_v29  ;;  %2410 = vmatpush.bf16.msrb.mxu2 %v7142_v20  ;;  %v8825_v29 = vld [vmem:[#allocation11 + $0xc] sm:$0xf0]  ;;  %v7315_v20 = vld [vmem:[#allocation11 + $0x190] sm:$0xf0] }
 0x2ad   :  { %v7122_v35 = vor.u32 %v8825_v29, %v7121_v28  ;;  %v7193_v28 = vld [vmem:[#allocation11 + $0x88] sm:$0xf]  ;;  %v8842_v29 = vld [vmem:[#allocation11 + $0x94] sm:$0xf0] }
 0x2ae   :  { %v7194_v36 = vor.u32 %v8842_v29, %v7193_v28  ;;  %v7129_v28 = vld [vmem:[#allocation11 + $0x8] sm:$0xf] }
 0x2af   :  { %2373 = vmatpush.bf16.msra.mxu0 %v7122_v35  ;;  %v7318_v35 = vor.u32 %v8871_v3, %v7315_v20  ;;  %v7251_v20 = vld [vmem:[#allocation11 + $0x110] sm:$0xf0] }
 0x2b0   :  { %2411 = vmatpush.bf16.msrb.mxu2 %v7126_v40  ;;  %v8840_v40 = vld [vmem:[#allocation11 + $0x8c] sm:$0xf] }
 0x2b1   :  { %v10460_v34 = vpop.f32.mrf.mxu3 }
 0x2b3   :  { %v1798_v41 = vpop.f32.mrf.mxu0  ;;  %2442 = vmatpush.bf16.msrb.mxu0 %v7242_v51 }
 0x2b4   :  { %2480 = vmatpush.bf16.msra.mxu2 %v7246_v60  ;;  %v7281_v60 = vld [vmem:[#allocation11 + $0x140] sm:$0xf] }
 0x2b9   :  { %v1779_v52 = vpop.f32.mrf.mxu3 }
 0x2ba   :  { %v10463_v53 = vadd.f32 %v1779_v52, %v1761_v46  ;;  %v7362_v46 = vor.u32 %v8885_v43, %v7361_v42  ;;  %v7297_v43 = vld [vmem:[#allocation11 + $0x160] sm:$0xf] }
 0x2bb   :  { %v7298_v47 = vor.u32 %v8869_v56, %v7297_v43 }
 0x2bc   :  { %v1799_v50 = vadd.f32 %v1798_v41, %v10463_v53  ;;  %2385 = vmatpush.bf16.msra.mxu1 %v7362_v46  ;;  %v7230_v53 = vor.u32 %v8848_v27, %v7227_v16  ;;  %v7195_v41 = vld [vmem:[#allocation11 + $0x98] sm:$0xf0]  ;;  %v8867_v46 = vld [vmem:[#allocation11 + $0x164] sm:$0xf]  ;;  %v8832_v27 = vld [vmem:[#allocation11 + $0x4c] sm:$0xf] }
 0x2bd   :  { %v7198_v42 = vor.u32 %v8840_v40, %v7195_v41  ;;  %v7302_v55 = vor.u32 %v8867_v46, %v7299_v48  ;;  %v7163_v16 = vld [vmem:[#allocation11 + $0x58] sm:$0xf0]  ;;  %v8824_v40 = vld [vmem:[#allocation11 + $0xc] sm:$0xf]  ;;  %v7369_v46 = vld [vmem:[#allocation11 + $0x1e8] sm:$0xf] }
 0x2be   :  { %2481 = vmatpush.bf16.msra.mxu2 %v7230_v53  ;;  %v7265_v53 = vld [vmem:[#allocation11 + $0x120] sm:$0xf]  ;;  %v7131_v41 = vld [vmem:[#allocation11 + $0x18] sm:$0xf0]  ;;  %v8884_v48 = vld [vmem:[#allocation11 + $0x1ec] sm:$0xf] }
 0x2bf   :  { %v7134_v56 = vor.u32 %v8824_v40, %v7131_v41 }
 0x2c0   :  { %2386 = vmatpush.bf16.msra.mxu1 %v7346_v6  ;;  %v7283_v6 = vld [vmem:[#allocation11 + $0x150] sm:$0xf0] }
 0x2c1   :  { %v10480_v9 = vpop.f32.mrf.mxu3  ;;  %v7286_v12 = vor.u32 %v8863_v0, %v7283_v6  ;;  %v7353_v0 = vld [vmem:[#allocation11 + $0x1c8] sm:$0xf] }
 0x2c3   :  { %v1812_v14 = vpop.f32.mrf.mxu1 }
 0x2c4   :  { %v1813_v32 = vadd.f32 %v1812_v14, %v1794_v15  ;;  %v7226_v14 = vor.u32 %v8850_v8, %v7225_v39  ;;  %v7330_v15 = vor.u32 %v8877_v10, %v7329_v17  ;;  %v8834_v39 = vld [vmem:[#allocation11 + $0x54] sm:$0xf0]  ;;  %v7166_v17 = vor.u32 %v8832_v27, %v7163_v16  ;;  %v8861_v10 = vld [vmem:[#allocation11 + $0x12c] sm:$0xf0]  ;;  %v8913_v16 = vld [vmem:[#allocation8 + $0xcc] sm:$0xf0] }
 0x2c6   :  { %2443 = vmatpush.bf16.msrb.mxu0 %v7226_v14  ;;  %2387 = vmatpush.bf16.msra.mxu1 %v7330_v15  ;;  %v7162_v14 = vor.u32 %v8834_v39, %v7161_v7  ;;  %v7267_v15 = vld [vmem:[#allocation11 + $0x130] sm:$0xf0]  ;;  %v8880_v7 = vld [vmem:[#allocation11 + $0x1cc] sm:$0xf]  ;;  %v7355_v39 = vld [vmem:[#allocation11 + $0x1d8] sm:$0xf0] }
 0x2c7   :  { %v7358_v27 = vor.u32 %v8880_v7, %v7355_v39  ;;  %v8866_v39 = vld [vmem:[#allocation11 + $0x154] sm:$0xf0] }
 0x2c9   :  { %v1831_v23 = vpop.f32.mrf.mxu2 }
 0x2ca   :  { %v10471_v62 = vadd.f32 %v1831_v23, %v1813_v32  ;;  %v7334_v32 = vor.u32 %v8875_v13, %v7331_v18  ;;  %v7211_v23 = vld [vmem:[#allocation11 + $0xb8] sm:$0xf0]  ;;  %2444 = vmatpush.bf16.msrb.mxu0 %v7210_v21  ;;  %2388 = vmatpush.bf16.msra.mxu1 %v7314_v24  ;;  %v8859_v13 = vld [vmem:[#allocation11 + $0x124] sm:$0xf]  ;;  %v7266_v18 = vor.u32 %v8861_v10, %v7265_v53  ;;  %v8828_v21 = vld [vmem:[#allocation11 + $0x2c] sm:$0xf] }
 0x2cb   :  { %v10473_v26 = vpop.f32.mrf.mxu1  ;;  %v7214_v57 = vor.u32 %v8844_v19, %v7211_v23  ;;  %v7270_v4 = vor.u32 %v8859_v13, %v7267_v15  ;;  %v7147_v19 = vld [vmem:[#allocation11 + $0x38] sm:$0xf0]  ;;  %v8855_v24 = vld [vmem:[#allocation11 + $0x104] sm:$0xf]  ;;  %v7337_v15 = vld [vmem:[#allocation11 + $0x1a8] sm:$0xf] }
 0x2cc   :  { %2425 = vmatpush.bf16.msrb.mxu3 %v7334_v32  ;;  %v8830_v32 = vld [vmem:[#allocation11 + $0x34] sm:$0xf0]  ;;  %v7150_v23 = vor.u32 %v8828_v21, %v7147_v19  ;;  %v7481_v53 = vld [vmem:[#allocation8 + $0xc8] sm:$0xf]  ;;  %v7457_v21 = vld [vmem:[#allocation8 + $0xa0] sm:$0xf] }
 0x2cd   :  { %2482 = vmatpush.bf16.msra.mxu2 %v7214_v57  ;;  %v7249_v57 = vld [vmem:[#allocation11 + $0x100] sm:$0xf] }
 0x2ce   :  { %2445 = vmatpush.bf16.msrb.mxu0 %v7194_v36  ;;  %2389 = vmatpush.bf16.msra.mxu1 %v7298_v47  ;;  %v7250_v3 = vor.u32 %v8857_v5, %v7249_v57  ;;  %v8826_v36 = vld [vmem:[#allocation11 + $0x14] sm:$0xf0]  ;;  %v8910_v57 = vld [vmem:[#allocation8 + $0xb4] sm:$0xf0] }
 0x2cf   :  { %v7130_v43 = vor.u32 %v8826_v36, %v7129_v28  ;;  %v8886_v47 = vld [vmem:[#allocation11 + $0x1f4] sm:$0xf0]  ;;  %v7441_v36 = vld [vmem:[#allocation8 + $0x80] sm:$0xf] }
 0x2d0   :  { %2426 = vmatpush.bf16.msrb.mxu3 %v7318_v35  ;;  %v7254_v35 = vor.u32 %v8855_v24, %v7251_v20  ;;  %v8874_v24 = vld [vmem:[#allocation11 + $0x194] sm:$0xf0] }
 0x2d1   :  { %v10475_v37 = vpop.f32.mrf.mxu2  ;;  %2483 = vmatpush.bf16.msra.mxu2 %v7198_v42 }
 0x2d3   :  { %v1817_v52 = vpop.f32.mrf.mxu1 }
 0x2d4   :  { %v1818_v2 = vadd.f32 %v1817_v52, %v1799_v50  ;;  %v8838_v52 = vld [vmem:[#allocation11 + $0x74] sm:$0xf0]  ;;  %v7182_v50 = vor.u32 %v8836_v54, %v7179_v59  ;;  %2427 = vmatpush.bf16.msrb.mxu3 %v7302_v55  ;;  %v7489_v55 = vld [vmem:[#allocation8 + $0xe0] sm:$0xf] }
 0x2d5   :  { %v7178_v51 = vor.u32 %v8838_v52, %v7177_v49  ;;  %v7370_v49 = vor.u32 %v8886_v47, %v7369_v46  ;;  %v7371_v52 = vld [vmem:[#allocation11 + $0x1f8] sm:$0xf0]  ;;  %v8906_v46 = vld [vmem:[#allocation8 + $0x94] sm:$0xf0] }
 0x2d6   :  { %2484 = vmatpush.bf16.msra.mxu2 %v7182_v50  ;;  %v7374_v54 = vor.u32 %v8884_v48, %v7371_v52  ;;  %v7497_v50 = vld [vmem:[#allocation8 + $0xe8] sm:$0xf]  ;;  %v7305_v52 = vld [vmem:[#allocation11 + $0x168] sm:$0xf] }
 0x2d7   :  { %2446 = vmatpush.bf16.msrb.mxu0 %v7178_v51  ;;  %v8917_v51 = vld [vmem:[#allocation8 + $0xec] sm:$0xf0] }
 0x2d8   :  { %2428 = vmatpush.bf16.msrb.mxu3 %v7286_v12  ;;  %v7490_v59 = vor.u32 %v8917_v51, %v7489_v55  ;;  %v8870_v55 = vld [vmem:[#allocation11 + $0x174] sm:$0xf0]  ;;  %v8868_v51 = vld [vmem:[#allocation11 + $0x16c] sm:$0xf] }
 0x2d9   :  { %v1836_v44 = vpop.f32.mrf.mxu2 }
 0x2da   :  { %v10478_v38 = vadd.f32 %v1836_v44, %v1818_v2  ;;  %v7282_v2 = vor.u32 %v8865_v45, %v7281_v60  ;;  %2485 = vmatpush.bf16.msra.mxu2 %v7166_v17  ;;  %v8918_v60 = vld [vmem:[#allocation8 + $0xf4] sm:$0xf0] }
 0x2db   :  { %2447 = vmatpush.bf16.msrb.mxu0 %v7162_v14  ;;  %v7498_v45 = vor.u32 %v8918_v60, %v7497_v50  ;;  %v8914_v17 = vld [vmem:[#allocation8 + $0xd4] sm:$0xf0]  ;;  %v7425_v50 = vld [vmem:[#allocation8 + $0x60] sm:$0xf]  ;;  %v8901_v60 = vld [vmem:[#allocation8 + $0x6c] sm:$0xf0] }
 0x2dc   :  { %2390 = vmatpush.bf16.msra.mxu1 %v7282_v2  ;;  %2429 = vmatpush.bf16.msrb.mxu3 %v7270_v4  ;;  %v7482_v13 = vor.u32 %v8914_v17, %v7481_v53  ;;  %v8876_v4 = vld [vmem:[#allocation11 + $0x1ac] sm:$0xf]  ;;  %v7409_v53 = vld [vmem:[#allocation8 + $0x40] sm:$0xf] }
 0x2dd   :  { %v8897_v17 = vld [vmem:[#allocation8 + $0x4c] sm:$0xf0] }
 0x2de   :  { %2486 = vmatpush.bf16.msra.mxu2 %v7150_v23  ;;  %v7465_v23 = vld [vmem:[#allocation8 + $0xa8] sm:$0xf] }
 0x2df   :  { %v7466_v5 = vor.u32 %v8910_v57, %v7465_v23  ;;  %v8893_v23 = vld [vmem:[#allocation8 + $0x2c] sm:$0xf0]  ;;  %v7401_v57 = vld [vmem:[#allocation8 + $0x28] sm:$0xf] }
 0x2e0   :  { %2391 = vmatpush.bf16.msra.mxu1 %v7266_v18  ;;  %2430 = vmatpush.bf16.msrb.mxu3 %v7254_v35  ;;  %v8878_v18 = vld [vmem:[#allocation11 + $0x1b4] sm:$0xf0]  ;;  %v7323_v35 = vld [vmem:[#allocation11 + $0x198] sm:$0xf0] }
 0x2e1   :  { %v10482_v31 = vpop.f32.mrf.mxu2 }
 0x2e2   :  { %2487 = vmatpush.bf16.msra.mxu2 %v7134_v56  ;;  %v7449_v56 = vld [vmem:[#allocation8 + $0x88] sm:$0xf] }
 0x2e4   :  { %2392 = vmatpush.bf16.msra.mxu1 %v7250_v3  ;;  %2499 = vmatpush.bf16.msra.mxu3 %v7374_v54  ;;  %v7321_v3 = vld [vmem:[#allocation11 + $0x188] sm:$0xf]  ;;  %v7306_v54 = vor.u32 %v8870_v55, %v7305_v52  ;;  %v10504_v55 = vpop.f32.mrf.mxu1 }
 0x2e5   :  { %v7322_v28 = vor.u32 %v8874_v24, %v7321_v3  ;;  %v8894_v3 = vld [vmem:[#allocation8 + $0x34] sm:$0xf0]  ;;  %v7257_v24 = vld [vmem:[#allocation11 + $0x108] sm:$0xf] }
 0x2e8   :  { %2461 = vmatpush.bf16.msrb.mxu1 %v7370_v49  ;;  %2500 = vmatpush.bf16.msra.mxu3 %v7358_v27  ;;  %v7450_v49 = vor.u32 %v8906_v46, %v7449_v56  ;;  %v7377_v56 = vld [vmem:[#allocation8] sm:$0xf]  ;;  %v8889_v46 = vld [vmem:[#allocation8 + $0xc] sm:$0xf0] }
 0x2e9   :  { %v1850_v1 = vpop.f32.mrf.mxu3 }
 0x2ea   :  { %v10485_v8 = vadd.f32 %v1850_v1, %v10471_v62  ;;  %v1939_v44 = vpop.f32.mrf.mxu2  ;;  %v7146_v62 = vor.u32 %v8830_v32, %v7145_v11  ;;  %v8882_v1 = vld [vmem:[#allocation11 + $0x1d4] sm:$0xf0]  ;;  %v7338_v11 = vor.u32 %v8878_v18, %v7337_v15  ;;  %v7339_v32 = vld [vmem:[#allocation11 + $0x1b8] sm:$0xf0]  ;;  %v8898_v15 = vld [vmem:[#allocation8 + $0x54] sm:$0xf0] }
 0x2eb   :  { %v7354_v6 = vor.u32 %v8882_v1, %v7353_v0  ;;  %v7426_v0 = vor.u32 %v8901_v60, %v7425_v50  ;;  %v7433_v1 = vld [vmem:[#allocation8 + $0x68] sm:$0xf]  ;;  %v7273_v18 = vld [vmem:[#allocation11 + $0x128] sm:$0xf]  ;;  %v8915_v60 = vld [vmem:[#allocation8 + $0xe4] sm:$0xf] }
 0x2ec   :  { %2448 = vmatpush.bf16.msrb.mxu0 %v7146_v62  ;;  %v8909_v62 = vld [vmem:[#allocation8 + $0xac] sm:$0xf0] }
 0x2ed   :  { %2462 = vmatpush.bf16.msrb.mxu1 %v7354_v6  ;;  %v7458_v19 = vor.u32 %v8909_v62, %v7457_v21  ;;  %v7289_v6 = vld [vmem:[#allocation11 + $0x148] sm:$0xf]  ;;  %v8860_v21 = vld [vmem:[#allocation11 + $0x12c] sm:$0xf]  ;;  %v7275_v62 = vld [vmem:[#allocation11 + $0x138] sm:$0xf0] }
 0x2ee   :  { %v7290_v27 = vor.u32 %v8866_v39, %v7289_v6  ;;  %v7499_v6 = vld [vmem:[#allocation8 + $0xf8] sm:$0xf0]  ;;  %v7475_v39 = vld [vmem:[#allocation8 + $0xd0] sm:$0xf0] }
 0x2f0   :  { %2449 = vmatpush.bf16.msrb.mxu0 %v7130_v43  ;;  %v8905_v43 = vld [vmem:[#allocation8 + $0x8c] sm:$0xf0] }
 0x2f1   :  { %v10487_v63 = vpop.f32.mrf.mxu3  ;;  %2463 = vmatpush.bf16.msrb.mxu1 %v7338_v11  ;;  %v7442_v48 = vor.u32 %v8905_v43, %v7441_v36  ;;  %v7402_v36 = vor.u32 %v8894_v3, %v7401_v57  ;;  %v7259_v43 = vld [vmem:[#allocation11 + $0x118] sm:$0xf0]  ;;  %v8904_v57 = vld [vmem:[#allocation8 + $0x8c] sm:$0xf] }
 0x2f2   :  { %v1941_v29 = vpop.f32.mrf.mxu2 }
 0x2f3   :  { %v10489_v42 = vpack.c.bf16 %v1941_v29, %v1939_v44  ;;  %v7473_v44 = vld [vmem:[#allocation8 + $0xc0] sm:$0xf]  ;;  %v8872_v29 = vld [vmem:[#allocation11 + $0x18c] sm:$0xf] }
 0x2f4   :  { %v7474_v10 = vor.u32 %v8913_v16, %v7473_v44  ;;  %v7326_v41 = vor.u32 %v8872_v29, %v7323_v35  ;;  %v8864_v44 = vld [vmem:[#allocation11 + $0x14c] sm:$0xf]  ;;  %v10502_v29 = vpop.f32.mrf.mxu0 }
 0x2f5   :  { %2374 = vmatmul.bf16.vlgmr.msra.gmra.mxu0 %v10489_v42  ;;  %2412 = vmatmul.bf16.vlgmr.msrb.gmra.mxu2 %v10489_v42 }
 0x2f6   :  { %2720 = vmatpush.bf16.msra.mxu0 %v7490_v59  ;;  %2758 = vmatpush.bf16.msrb.mxu2 %v7498_v45  ;;  %v7307_v59 = vld [vmem:[#allocation11 + $0x178] sm:$0xf0] }
 0x2f7   :  { %2464 = vmatpush.bf16.msrb.mxu1 %v7322_v28  ;;  %v7310_v45 = vor.u32 %v8868_v51, %v7307_v59  ;;  %v8858_v28 = vld [vmem:[#allocation11 + $0x114] sm:$0xf0]  ;;  %v7378_v59 = vor.u32 %v8889_v46, %v7377_v56  ;;  %v8895_v46 = vld [vmem:[#allocation8 + $0x44] sm:$0xf] }
 0x2f8   :  { %v7435_v56 = vld [vmem:[#allocation8 + $0x78] sm:$0xf0] }
 0x2f9   :  { %v1855_v2 = vpop.f32.mrf.mxu3 }
 0x2fa   :  { %v10494_v12 = vadd.f32 %v1855_v2, %v10478_v38  ;;  %v1944_v14 = vpop.f32.mrf.mxu2  ;;  %2721 = vmatpush.bf16.msra.mxu0 %v7474_v10  ;;  %2759 = vmatpush.bf16.msrb.mxu2 %v7482_v13  ;;  %v7342_v38 = vor.u32 %v8876_v4, %v7339_v32  ;;  %v8902_v2 = vld [vmem:[#allocation8 + $0x74] sm:$0xf0]  ;;  %v7417_v13 = vld [vmem:[#allocation8 + $0x48] sm:$0xf]  ;;  %v7410_v4 = vor.u32 %v8897_v17, %v7409_v53  ;;  %v8862_v32 = vld [vmem:[#allocation11 + $0x134] sm:$0xf0] }
 0x2fb   :  { %2465 = vmatpush.bf16.msrb.mxu1 %v7306_v54  ;;  %v7434_v7 = vor.u32 %v8902_v2, %v7433_v1  ;;  %v7418_v11 = vor.u32 %v8898_v15, %v7417_v13  ;;  %v1739_v1 = vadd.f32 %v10453_v61, %v10456_v25 }
 0x2fc   :  { %2501 = vmatpush.bf16.msra.mxu3 %v7342_v38  ;;  %v7274_v38 = vor.u32 %v8862_v32, %v7273_v18  ;;  %v8908_v18 = vld [vmem:[#allocation8 + $0xac] sm:$0xf] }
 0x2fd   :  { %v1758_v53 = vadd.f32 %v10458_v30, %v1739_v1 }
 0x2fe   :  { %2722 = vmatpush.bf16.msra.mxu0 %v7458_v19  ;;  %2760 = vmatpush.bf16.msrb.mxu2 %v7466_v5  ;;  %v7393_v19 = vld [vmem:[#allocation8 + $0x20] sm:$0xf]  ;;  %v7278_v5 = vor.u32 %v8860_v21, %v7275_v62  ;;  %v8903_v62 = vld [vmem:[#allocation8 + $0x84] sm:$0xf] }
 0x2ff   :  { %2466 = vmatpush.bf16.msrb.mxu1 %v7290_v27  ;;  %v7394_v35 = vor.u32 %v8893_v23, %v7393_v19  ;;  %v8912_v27 = vld [vmem:[#allocation8 + $0xcc] sm:$0xf]  ;;  %v1777_v13 = vadd.f32 %v10460_v34, %v1758_v53 }
 0x300   :  { %2502 = vmatpush.bf16.msra.mxu3 %v7326_v41  ;;  %v7258_v41 = vor.u32 %v8858_v28, %v7257_v24 }
 0x301   :  { %v10496_v20 = vpop.f32.mrf.mxu3  ;;  %v1796_v30 = vadd.f32 %v10469_v22, %v1777_v13  ;;  %v8899_v22 = vld [vmem:[#allocation8 + $0x64] sm:$0xf] }
 0x302   :  { %v1946_v40 = vpop.f32.mrf.mxu2  ;;  %2723 = vmatpush.bf16.msra.mxu0 %v7442_v48  ;;  %2761 = vmatpush.bf16.msrb.mxu2 %v7450_v49  ;;  %v7385_v48 = vld [vmem:[#allocation8 + $0x8] sm:$0xf]  ;;  %v8890_v49 = vld [vmem:[#allocation8 + $0x14] sm:$0xf0] }
 0x303   :  { %v10498_v47 = vpack.c.bf16 %v1946_v40, %v1944_v14  ;;  %v7291_v14 = vld [vmem:[#allocation11 + $0x158] sm:$0xf0]  ;;  %v8856_v40 = vld [vmem:[#allocation11 + $0x10c] sm:$0xf]  ;;  %2467 = vmatpush.bf16.msrb.mxu1 %v7274_v38  ;;  %v7386_v50 = vor.u32 %v8890_v49, %v7385_v48  ;;  %v7443_v38 = vld [vmem:[#allocation8 + $0x90] sm:$0xf0]  ;;  %v1815_v19 = vadd.f32 %v10473_v26, %v1796_v30 }
 0x304   :  { %2503 = vmatpush.bf16.msra.mxu3 %v7310_v45  ;;  %v7294_v16 = vor.u32 %v8864_v44, %v7291_v14  ;;  %v7262_v54 = vor.u32 %v8856_v40, %v7259_v43  ;;  %v7491_v45 = vld [vmem:[#allocation8 + $0xf0] sm:$0xf0]  ;;  %v10514_v44 = vpop.f32.mrf.mxu0  ;;  %v7446_v23 = vor.u32 %v8903_v62, %v7443_v38  ;;  %v1744_v43 = vadd.f32 %v10453_v61, %v10465_v58 }
 0x305   :  { %2379 = vmatmul.bf16.gmra.mxu0 %v10498_v47  ;;  %2417 = vmatmul.bf16.gmra.mxu2 %v10498_v47  ;;  %v7494_v2 = vor.u32 %v8915_v60, %v7491_v45  ;;  %v1834_v34 = vadd.f32 %v10475_v37, %v1815_v19  ;;  %v7427_v26 = vld [vmem:[#allocation8 + $0x70] sm:$0xf0]  ;;  %v8891_v60 = vld [vmem:[#allocation8 + $0x24] sm:$0xf]  ;;  %v1870_v58 = vadd.f32 %v10514_v44, %v10485_v8  ;;  %v8888_v44 = vld [vmem:[#allocation8 + $0xc] sm:$0xf] }
 0x306   :  { %2724 = vmatpush.bf16.msra.mxu0 %v7426_v0  ;;  %2762 = vmatpush.bf16.msrb.mxu2 %v7434_v7  ;;  %v8916_v0 = vld [vmem:[#allocation8 + $0xec] sm:$0xf]  ;;  %v8911_v7 = vld [vmem:[#allocation8 + $0xc4] sm:$0xf]  ;;  %v7430_v37 = vor.u32 %v8899_v22, %v7427_v26  ;;  %v1763_v49 = vadd.f32 %v10467_v33, %v1744_v43  ;;  %v7395_v45 = vld [vmem:[#allocation8 + $0x30] sm:$0xf0] }
 0x307   :  { %2468 = vmatpush.bf16.msrb.mxu1 %v7258_v41  ;;  %v7502_v14 = vor.u32 %v8916_v0, %v7499_v6  ;;  %v7478_v25 = vor.u32 %v8911_v7, %v7475_v39  ;;  %v8900_v41 = vld [vmem:[#allocation8 + $0x6c] sm:$0xf]  ;;  %v7403_v33 = vld [vmem:[#allocation8 + $0x38] sm:$0xf0]  ;;  %v8887_v7 = vld [vmem:[#allocation8 + $0x4] sm:$0xf] }
 0x308   :  { %2504 = vmatpush.bf16.msra.mxu3 %v7294_v16  ;;  %v7483_v16 = vld [vmem:[#allocation8 + $0xd8] sm:$0xf0]  ;;  %v7438_v48 = vor.u32 %v8900_v41, %v7435_v56  ;;  %v1782_v61 = vadd.f32 %v10480_v9, %v1763_v49  ;;  %v8892_v6 = vld [vmem:[#allocation8 + $0x2c] sm:$0xf]  ;;  %v7379_v39 = vld [vmem:[#allocation8 + $0x10] sm:$0xf0] }
 0x309   :  { %v1958_v10 = vpop.f32.mrf.mxu3  ;;  %v7486_v17 = vor.u32 %v8912_v27, %v7483_v16  ;;  %v7406_v53 = vor.u32 %v8892_v6, %v7403_v33  ;;  %v7382_v8 = vor.u32 %v8887_v7, %v7379_v39  ;;  %v8940_v26 = vld [vmem:[#allocation14 + $0xa8] sm:$0xff]  ;;  %v8939_v56 = vld [vmem:[#allocation14 + $0xa0] sm:$0xff]  ;;  %v8934_v6 = vld [vmem:[#allocation14 + $0x78] sm:$0xff] }
 0x30a   :  { %2725 = vmatpush.bf16.msra.mxu0 %v7410_v4  ;;  %2763 = vmatpush.bf16.msrb.mxu2 %v7418_v11  ;;  %v7467_v4 = vld [vmem:[#allocation8 + $0xb8] sm:$0xf0]  ;;  %v1888_v11 = vpop.f32.mrf.mxu1  ;;  %v8935_v33 = vld [vmem:[#allocation14 + $0x80] sm:$0xff] }
 0x30b   :  { %v7470_v21 = vor.u32 %v8908_v18, %v7467_v4  ;;  %v1889_v27 = vadd.f32 %v1888_v11, %v1870_v58  ;;  %v8919_v58 = vld [vmem:[#allocation14] sm:$0xff] }
 0x30c   :  { %2505 = vmatpush.bf16.msra.mxu3 %v7278_v5  ;;  %v7451_v5 = vld [vmem:[#allocation8 + $0x98] sm:$0xf0]  ;;  %v1871_v3 = vpop.f32.mrf.mxu0 }
 0x30e   :  { %2726 = vmatpush.bf16.msra.mxu0 %v7394_v35  ;;  %2764 = vmatpush.bf16.msrb.mxu2 %v7402_v36  ;;  %v7454_v35 = vor.u32 %v8904_v57, %v7451_v5  ;;  %v1853_v36 = vadd.f32 %v10487_v63, %v1834_v34  ;;  %v7411_v63 = vld [vmem:[#allocation8 + $0x50] sm:$0xf0]  ;;  %v8925_v57 = vld [vmem:[#allocation14 + $0x30] sm:$0xff] }
 0x310   :  { %2506 = vmatpush.bf16.msra.mxu3 %v7262_v54  ;;  %v7414_v54 = vor.u32 %v8895_v46, %v7411_v63 }
 0x311   :  { %v1960_v52 = vpop.f32.mrf.mxu3 }
 0x312   :  { %v10506_v51 = vpack.c.bf16 %v1960_v52, %v1958_v10  ;;  %2727 = vmatpush.bf16.msra.mxu0 %v7378_v59  ;;  %2765 = vmatpush.bf16.msrb.mxu2 %v7386_v50  ;;  %v8907_v10 = vld [vmem:[#allocation8 + $0xa4] sm:$0xf]  ;;  %v1890_v40 = vpop.f32.mrf.mxu1  ;;  %v1872_v52 = vadd.f32 %v1871_v3, %v1853_v36  ;;  %v8896_v59 = vld [vmem:[#allocation8 + $0x4c] sm:$0xf]  ;;  %v7419_v50 = vld [vmem:[#allocation8 + $0x58] sm:$0xf0] }
 0x313   :  { %v7422_v0 = vor.u32 %v8896_v59, %v7419_v50  ;;  %v8942_v3 = vld [vmem:[#allocation14 + $0xb8] sm:$0xff] }
 0x314   :  { %2393 = vmatmul.bf16.vlgmr.msra.gmra.mxu1 %v10506_v51  ;;  %2431 = vmatmul.bf16.vlgmr.msrb.gmra.mxu3 %v10506_v51  ;;  %v1891_v1 = vadd.f32 %v1890_v40, %v1872_v52  ;;  %v10555_v40 = vld [vmem:[#allocation13] sm:$0xf] }
 0x315   :  { %2450 = vmatmul.bf16.vlgmr.msrb.gmra.mxu0 %v10489_v42  ;;  %2488 = vmatmul.bf16.vlgmr.msra.gmra.mxu2 %v10489_v42  ;;  %v7459_v42 = vld [vmem:[#allocation8 + $0xb0] sm:$0xf0]  ;;  %v10560_v41 = vperm.slane %v10555_v40, 1  ;;  %v8938_v59 = vld [vmem:[#allocation14 + $0x98] sm:$0xff] }
 0x316   :  { %2739 = vmatpush.bf16.msra.mxu1 %v7494_v2  ;;  %2777 = vmatpush.bf16.msrb.mxu3 %v7502_v14  ;;  %v7462_v32 = vor.u32 %v8907_v10, %v7459_v42  ;;  %v7398_v2 = vor.u32 %v8891_v60, %v7395_v45  ;;  %v1801_v14 = vadd.f32 %v10502_v29, %v1782_v61  ;;  %v1898_v42 = vmax.f32 %v1889_v27, 0.0  ;;  %v8920_v60 = vld [vmem:[#allocation14 + $0x8] sm:$0xff]  ;;  %v8937_v45 = vld [vmem:[#allocation14 + $0x90] sm:$0xff] }
 0x317   :  { %3134 = vmatpush.bf16.msra.mxu2 %v8942_v3 }
 0x318   :  { %v1820_v9 = vadd.f32 %v10504_v55, %v1801_v14  ;;  %v8933_v14 = vld [vmem:[#allocation14 + $0x70] sm:$0xff] }
 0x319   :  { %v1963_v15 = vpop.f32.mrf.mxu3 }
 0x31a   :  { %2740 = vmatpush.bf16.msra.mxu1 %v7478_v25  ;;  %2778 = vmatpush.bf16.msrb.mxu3 %v7486_v17  ;;  %v1893_v16 = vpop.f32.mrf.mxu1  ;;  %v1899_v25 = vmax.f32 %v1891_v1, 0.0  ;;  %v7387_v17 = vld [vmem:[#allocation8 + $0x18] sm:$0xf0]  ;;  %v1839_v10 = vadd.f32 %v10482_v31, %v1820_v9  ;;  %v8936_v1 = vld [vmem:[#allocation14 + $0x88] sm:$0xff]  ;;  %v8950_v9 = vld [vmem:[#allocation14 + $0xf8] sm:$0xff] }
 0x31b   :  { %v7390_v13 = vor.u32 %v8888_v44, %v7387_v17  ;;  %v8949_v44 = vld [vmem:[#allocation14 + $0xf0] sm:$0xff] }
 0x31c   :  { %v1858_v18 = vadd.f32 %v10496_v20, %v1839_v10  ;;  %v8931_v10 = vld [vmem:[#allocation14 + $0x60] sm:$0xff] }
 0x31e   :  { %2741 = vmatpush.bf16.msra.mxu1 %v7462_v32  ;;  %2779 = vmatpush.bf16.msrb.mxu3 %v7470_v21 }
 0x321   :  { %v1965_v24 = vpop.f32.mrf.mxu3 }
 0x322   :  { %v10521_v28 = vpack.c.bf16 %v1965_v24, %v1963_v15  ;;  %2742 = vmatpush.bf16.msra.mxu1 %v7446_v23  ;;  %2780 = vmatpush.bf16.msrb.mxu3 %v7454_v35  ;;  %v1902_v15 = vpack.c.bf16 %v1899_v25, %v1898_v42  ;;  %v1895_v4 = vpop.f32.mrf.mxu1  ;;  %v8926_v23 = vld [vmem:[#allocation14 + $0x38] sm:$0xff]  ;;  %v8924_v24 = vld [vmem:[#allocation14 + $0x28] sm:$0xff]  ;;  %v8923_v35 = vld [vmem:[#allocation14 + $0x20] sm:$0xff] }
 0x323   :  { %3096 = vmatpush.bf16.msrb.mxu0 %v8926_v23 }
 0x324   :  { %2398 = vmatmul.bf16.gmra.mxu1 %v10521_v28  ;;  %2436 = vmatmul.bf16.gmra.mxu3 %v10521_v28 }
 0x325   :  { %2455 = vmatmul.bf16.gmra.mxu0 %v10498_v47  ;;  %2493 = vmatmul.bf16.gmra.mxu2 %v10498_v47  ;;  %v1874_v47 = vpop.f32.mrf.mxu0 }
 0x326   :  { %2743 = vmatpush.bf16.msra.mxu1 %v7430_v37  ;;  %2781 = vmatpush.bf16.msrb.mxu3 %v7438_v48  ;;  %v1875_v11 = vadd.f32 %v1874_v47, %v10494_v12  ;;  %v8922_v37 = vld [vmem:[#allocation14 + $0x18] sm:$0xff]  ;;  %v8921_v48 = vld [vmem:[#allocation14 + $0x10] sm:$0xff] }
 0x327   :  { %3097 = vmatpush.bf16.msrb.mxu0 %v8925_v57 }
 0x328   :  { %v1894_v32 = vadd.f32 %v1893_v16, %v1875_v11  ;;  %v8930_v11 = vld [vmem:[#allocation14 + $0x58] sm:$0xff] }
 0x32a   :  { %2744 = vmatpush.bf16.msra.mxu1 %v7414_v54  ;;  %2782 = vmatpush.bf16.msrb.mxu3 %v7422_v0  ;;  %v1900_v62 = vmax.f32 %v1894_v32, 0.0 }
 0x32b   :  { %3098 = vmatpush.bf16.msrb.mxu0 %v8924_v24 }
 0x32d   :  { %v1876_v29 = vpop.f32.mrf.mxu0 }
 0x32e   :  { %2745 = vmatpush.bf16.msra.mxu1 %v7398_v2  ;;  %2783 = vmatpush.bf16.msrb.mxu3 %v7406_v53  ;;  %v1877_v55 = vadd.f32 %v1876_v29, %v1858_v18  ;;  %v8948_v18 = vld [vmem:[#allocation14 + $0xe8] sm:$0xff] }
 0x32f   :  { %3099 = vmatpush.bf16.msrb.mxu0 %v8923_v35 }
 0x330   :  { %v1896_v31 = vadd.f32 %v1895_v4, %v1877_v55  ;;  %v2038_v55 = vperm.slane %v10555_v40, 0 }
 0x332   :  { %2746 = vmatpush.bf16.msra.mxu1 %v7382_v8  ;;  %2784 = vmatpush.bf16.msrb.mxu3 %v7390_v13  ;;  %v1901_v21 = vmax.f32 %v1896_v31, 0.0  ;;  %v8932_v8 = vld [vmem:[#allocation14 + $0x68] sm:$0xff]  ;;  %v10594_v13 = vld [vmem:[#allocation10] sm:$0xf]  ;;  %v8947_v31 = vld [vmem:[#allocation14 + $0xe0] sm:$0xff] }
 0x333   :  { %3100 = vmatpush.bf16.msrb.mxu0 %v8922_v37  ;;  %v10598_v4 = vperm.slane %v10594_v13, 0  ;;  %v2554_v3 = vperm.slane %v10594_v13, 2 }
 0x334   :  { %2469 = vmatmul.bf16.vlgmr.msrb.gmra.mxu1 %v10506_v51  ;;  %2507 = vmatmul.bf16.vlgmr.msra.gmra.mxu3 %v10506_v51  ;;  %v1903_v38 = vpack.c.bf16 %v1901_v21, %v1900_v62 }
 0x335   :  { %2728 = vmatmul.bf16.vlgmr.msra.gmra.mxu0 %v1902_v15  ;;  %2766 = vmatmul.bf16.vlgmr.msrb.gmra.mxu2 %v1902_v15 }
 0x336   :  { %3115 = vmatpush.bf16.msrb.mxu1 %v8934_v6  ;;  %3153 = vmatpush.bf16.msra.mxu3 %v8950_v9 }
 0x337   :  { %3101 = vmatpush.bf16.msrb.mxu0 %v8921_v48 }
 0x33a   :  { %3116 = vmatpush.bf16.msrb.mxu1 %v8933_v14  ;;  %3154 = vmatpush.bf16.msra.mxu3 %v8949_v44 }
 0x33b   :  { %3102 = vmatpush.bf16.msrb.mxu0 %v8920_v60 }
 0x33e   :  { %3117 = vmatpush.bf16.msrb.mxu1 %v8932_v8  ;;  %3155 = vmatpush.bf16.msra.mxu3 %v8948_v18 }
 0x33f   :  { %3103 = vmatpush.bf16.msrb.mxu0 %v8919_v58  ;;  %v8927_v58 = vld [vmem:[#allocation14 + $0x40] sm:$0xff] }
 0x342   :  { %3118 = vmatpush.bf16.msrb.mxu1 %v8931_v10  ;;  %3156 = vmatpush.bf16.msra.mxu3 %v8947_v31  ;;  %v8943_v10 = vld [vmem:[#allocation14 + $0xc0] sm:$0xff] }
 0x344   :  { %2474 = vmatmul.bf16.gmra.mxu1 %v10521_v28  ;;  %2512 = vmatmul.bf16.gmra.mxu3 %v10521_v28  ;;  %v8941_v28 = vld [vmem:[#allocation14 + $0xb0] sm:$0xff] }
 0x345   :  { %2733 = vmatmul.bf16.gmra.mxu0 %v1903_v38  ;;  %2771 = vmatmul.bf16.gmra.mxu2 %v1903_v38 }
 0x346   :  { %3135 = vmatpush.bf16.msra.mxu2 %v8941_v28  ;;  %3119 = vmatpush.bf16.msrb.mxu1 %v8930_v11  ;;  %v8946_v28 = vld [vmem:[#allocation14 + $0xd8] sm:$0xff] }
 0x347   :  { %3157 = vmatpush.bf16.msra.mxu3 %v8946_v28 }
 0x34a   :  { %3136 = vmatpush.bf16.msra.mxu2 %v8940_v26 }
 0x34e   :  { %3137 = vmatpush.bf16.msra.mxu2 %v8939_v56  ;;  %v8928_v56 = vld [vmem:[#allocation14 + $0x48] sm:$0xff] }
 0x352   :  { %3138 = vmatpush.bf16.msra.mxu2 %v8938_v59 }
 0x354   :  { %2747 = vmatmul.bf16.vlgmr.msra.gmra.mxu1 %v1902_v15  ;;  %2785 = vmatmul.bf16.vlgmr.msrb.gmra.mxu3 %v1902_v15 }
 0x356   :  { %3139 = vmatpush.bf16.msra.mxu2 %v8937_v45 }
 0x35a   :  { %3140 = vmatpush.bf16.msra.mxu2 %v8936_v1 }
 0x35e   :  { %3141 = vmatpush.bf16.msra.mxu2 %v8935_v33 }
 0x364   :  { %2752 = vmatmul.bf16.gmra.mxu1 %v1903_v38  ;;  %2790 = vmatmul.bf16.gmra.mxu3 %v1903_v38  ;;  %v8929_v38 = vld [vmem:[#allocation14 + $0x50] sm:$0xff] }
 0x365   :  { %3120 = vmatpush.bf16.msrb.mxu1 %v8929_v38 }
 0x369   :  { %3121 = vmatpush.bf16.msrb.mxu1 %v8928_v56 }
 0x36d   :  { %3122 = vmatpush.bf16.msrb.mxu1 %v8927_v58 }
 0x372   :  { %v10543_v20 = vpop.f32.mrf.mxu0 }
 0x373   :  { %v2376_v32 = vadd.f32 %v10543_v20, %v2038_v55 }
 0x378   :  { %v2413_v51 = vpop.f32.mrf.mxu2 }
 0x379   :  { %v2414_v46 = vadd.f32 %v2413_v51, %v10560_v41 }
 0x37a   :  { %v10545_v30 = vpop.f32.mrf.mxu0 }
 0x37b   :  { %v2378_v23 = vadd.f32 %v10545_v30, %v2038_v55 }
 0x380   :  { %v10547_v12 = vpop.f32.mrf.mxu2 }
 0x382   :  { %v10549_v19 = vpop.f32.mrf.mxu0 }
 0x388   :  { %v2418_v5 = vpop.f32.mrf.mxu2 }
 0x389   :  { %v2419_v7 = vadd.f32 %v2418_v5, %v10560_v41  ;;  %v2040_v5 = vperm.slane %v10555_v40, 2 }
 0x38a   :  { %v10551_v34 = vpop.f32.mrf.mxu0 }
 0x390   :  { %v10553_v36 = vpop.f32.mrf.mxu2 }
 0x391   :  { %v10557_v22 = vpop.f32.mrf.mxu1 }
 0x392   :  { %v10562_v43 = vpop.f32.mrf.mxu0  ;;  %v2395_v57 = vadd.f32 %v10557_v22, %v2376_v32  ;;  %v2383_v32 = vadd.f32 %v10551_v34, %v2038_v55 }
 0x393   :  { %v2452_v30 = vadd.f32 %v10562_v43, %v2040_v5 }
 0x397   :  { %v2432_v63 = vpop.f32.mrf.mxu3 }
 0x398   :  { %v10565_v49 = vadd.f32 %v2432_v63, %v2414_v46  ;;  %v10567_v52 = vpop.f32.mrf.mxu2  ;;  %v8945_v63 = vld [vmem:[#allocation14 + $0xd0] sm:$0xff] }
 0x399   :  { %v10569_v54 = vpop.f32.mrf.mxu1  ;;  %3158 = vmatpush.bf16.msra.mxu3 %v8945_v63 }
 0x39a   :  { %v10571_v50 = vpop.f32.mrf.mxu0  ;;  %v2397_v20 = vadd.f32 %v10569_v54, %v2378_v23 }
 0x39b   :  { %v2454_v48 = vadd.f32 %v10571_v50, %v2040_v5 }
 0x39f   :  { %v10573_v61 = vpop.f32.mrf.mxu3 }
 0x3a0   :  { %v10575_v47 = vpop.f32.mrf.mxu2 }
 0x3a1   :  { %v10577_v0 = vpop.f32.mrf.mxu1 }
 0x3a2   :  { %v10579_v2 = vpop.f32.mrf.mxu0 }
 0x3a7   :  { %v2437_v39 = vpop.f32.mrf.mxu3 }
 0x3a8   :  { %v10582_v27 = vadd.f32 %v2437_v39, %v2419_v7  ;;  %v10584_v16 = vpop.f32.mrf.mxu2  ;;  %v8944_v39 = vld [vmem:[#allocation14 + $0xc8] sm:$0xff] }
 0x3a9   :  { %v10586_v53 = vpop.f32.mrf.mxu1  ;;  %3159 = vmatpush.bf16.msra.mxu3 %v8944_v39 }
 0x3aa   :  { %v10588_v25 = vpop.f32.mrf.mxu0 }
 0x3ad   :  { %3160 = vmatpush.bf16.msra.mxu3 %v8943_v10 }
 0x3af   :  { %v10590_v17 = vpop.f32.mrf.mxu3 }
 0x3b0   :  { %v10592_v42 = vpop.f32.mrf.mxu2 }
 0x3b1   :  { %v2470_v15 = vpop.f32.mrf.mxu1 }
 0x3b2   :  { %v2729_v29 = vpop.f32.mrf.mxu0  ;;  %v2471_v59 = vadd.f32 %v2470_v15, %v2452_v30  ;;  %v2381_v15 = vadd.f32 %v10549_v19, %v2038_v55  ;;  %v2402_v19 = vadd.f32 %v10586_v53, %v2383_v32 }
 0x3b3   :  { %v2730_v21 = vadd.f32 %v2729_v29, %v10598_v4 }
 0x3b5   :  { %v10609_v26 = vadd.f32 %v2730_v21, %v2395_v57  ;;  %v2400_v21 = vadd.f32 %v10577_v0, %v2381_v15 }
 0x3b7   :  { %v10602_v62 = vpop.f32.mrf.mxu3  ;;  %v2812_v60 = vmax.f32 %v10609_v26, 0.0 }
 0x3b8   :  { %v2767_v51 = vpop.f32.mrf.mxu2 }
 0x3b9   :  { %v2472_v24 = vpop.f32.mrf.mxu1  ;;  %v2768_v46 = vadd.f32 %v2767_v51, %v2554_v3 }
 0x3ba   :  { %v2731_v35 = vpop.f32.mrf.mxu0  ;;  %v2473_v43 = vadd.f32 %v2472_v24, %v2454_v48  ;;  %v2457_v24 = vadd.f32 %v10579_v2, %v2040_v5 }
 0x3bb   :  { %v2732_v37 = vadd.f32 %v2731_v35, %v10598_v4  ;;  %v10620_v6 = vadd.f32 %v2768_v46, %v2471_v59 }
 0x3bd   :  { %v10613_v22 = vadd.f32 %v2732_v37, %v2397_v20  ;;  %v2814_v8 = vmax.f32 %v10620_v6, 0.0  ;;  %v2459_v20 = vadd.f32 %v10588_v25, %v2040_v5 }
 0x3bf   :  { %v2816_v54 = vmax.f32 %v10613_v22, 0.0  ;;  %v10618_v45 = vpop.f32.mrf.mxu3 }
 0x3c0   :  { %v2769_v1 = vpop.f32.mrf.mxu2 }
 0x3c1   :  { %v2828_v33 = vpack.c.bf16 %v2816_v54, %v2812_v60  ;;  %v2770_v7 = vadd.f32 %v2769_v1, %v2554_v3  ;;  %v2475_v50 = vpop.f32.mrf.mxu1  ;;  %v2416_v1 = vadd.f32 %v10547_v12, %v10560_v41 }
 0x3c2   :  { %v2734_v14 = vpop.f32.mrf.mxu0  ;;  %v2476_v37 = vadd.f32 %v2475_v50, %v2457_v24 }
 0x3c3   :  { %v10626_v9 = vadd.f32 %v2770_v7, %v2473_v43  ;;  %3104 = vmatmul.bf16.vlgmr.msrb.gmra.mxu0 %v2828_v33  ;;  %v2735_v29 = vadd.f32 %v2734_v14, %v10598_v4  ;;  %v2041_v43 = vperm.slane %v10555_v40, 3  ;;  %v2555_v33 = vperm.slane %v10594_v13, 3 }
 0x3c4   :  { %v2435_v50 = vadd.f32 %v10573_v61, %v2416_v1 }
 0x3c5   :  { %v2818_v44 = vmax.f32 %v10626_v9, 0.0  ;;  %v10641_v23 = vadd.f32 %v2735_v29, %v2400_v21  ;;  %v2490_v10 = vadd.f32 %v10567_v52, %v2041_v43  ;;  %v2492_v29 = vadd.f32 %v10575_v47, %v2041_v43 }
 0x3c7   :  { %v2830_v18 = vpack.c.bf16 %v2818_v44, %v2814_v8  ;;  %v10636_v11 = vpop.f32.mrf.mxu3  ;;  %v11051_v34 = vmax.f32 %v10641_v23, 0.0  ;;  %v2509_v12 = vadd.f32 %v10602_v62, %v2490_v10  ;;  %v2511_v61 = vadd.f32 %v10618_v45, %v2492_v29 }
 0x3c8   :  { %v2772_v31 = vpop.f32.mrf.mxu2 }
 0x3c9   :  { %3142 = vmatmul.bf16.vlgmr.msra.gmra.mxu2 %v2830_v18  ;;  %v2477_v38 = vpop.f32.mrf.mxu1  ;;  %v2773_v28 = vadd.f32 %v2772_v31, %v2554_v3 }
 0x3ca   :  { %v2736_v51 = vpop.f32.mrf.mxu0  ;;  %v2478_v53 = vadd.f32 %v2477_v38, %v2459_v20 }
 0x3cb   :  { %v2737_v57 = vadd.f32 %v2736_v51, %v10598_v4  ;;  %v10650_v30 = vadd.f32 %v2773_v28, %v2476_v37  ;;  %v2553_v4 = vperm.slane %v10594_v13, 1 }
 0x3cd   :  { %v10645_v35 = vadd.f32 %v2737_v57, %v2402_v19  ;;  %v2822_v5 = vmax.f32 %v10650_v30, 0.0  ;;  %v2421_v57 = vadd.f32 %v10553_v36, %v10560_v41 }
 0x3cf   :  { %v11049_v0 = vmax.f32 %v10645_v35, 0.0  ;;  %v2515_v55 = vpop.f32.mrf.mxu3  ;;  %v2440_v28 = vadd.f32 %v10590_v17, %v2421_v57 }
 0x3d0   :  { %v2774_v56 = vpop.f32.mrf.mxu2 }
 0x3d1   :  { %v2775_v46 = vadd.f32 %v2774_v56, %v2554_v3  ;;  %v2748_v63 = vpop.f32.mrf.mxu1  ;;  %v2832_v2 = vpack.c.bf16 %v11049_v0, %v11051_v34  ;;  %v2495_v56 = vadd.f32 %v10584_v16, %v2041_v43 }
 0x3d2   :  { %v2749_v59 = vadd.f32 %v2748_v63, %v2553_v4  ;;  %v2497_v63 = vadd.f32 %v10592_v42, %v2041_v43 }
 0x3d3   :  { %v10657_v25 = vadd.f32 %v2775_v46, %v2478_v53  ;;  %3109 = vmatmul.bf16.gmra.mxu0 %v2832_v2  ;;  %v2514_v2 = vadd.f32 %v10636_v11, %v2495_v56 }
 0x3d4   :  { %v10671_v39 = vadd.f32 %v2749_v59, %v10565_v49 }
 0x3d5   :  { %v2826_v48 = vmax.f32 %v10657_v25, 0.0 }
 0x3d6   :  { %v2813_v40 = vmax.f32 %v10671_v39, 0.0 }
 0x3d7   :  { %v2786_v58 = vpop.f32.mrf.mxu3  ;;  %v2834_v3 = vpack.c.bf16 %v2826_v48, %v2822_v5 }
 0x3d8   :  { %v2787_v15 = vadd.f32 %v2786_v58, %v2555_v33  ;;  %v2516_v58 = vadd.f32 %v2515_v55, %v2497_v63 }
 0x3d9   :  { %3147 = vmatmul.bf16.gmra.mxu2 %v2834_v3  ;;  %v2750_v7 = vpop.f32.mrf.mxu1 }
 0x3da   :  { %v2751_v14 = vadd.f32 %v2750_v7, %v2553_v4  ;;  %v10681_v32 = vadd.f32 %v2787_v15, %v2509_v12 }
 0x3dc   :  { %v10674_v18 = vadd.f32 %v2751_v14, %v2435_v50  ;;  %v2815_v47 = vmax.f32 %v10681_v32, 0.0 }
 0x3de   :  { %v2817_v13 = vmax.f32 %v10674_v18, 0.0 }
 0x3df   :  { %v2788_v31 = vpop.f32.mrf.mxu3 }
 0x3e0   :  { %v2829_v49 = vpack.c.bf16 %v2817_v13, %v2813_v40  ;;  %v2789_v52 = vadd.f32 %v2788_v31, %v2555_v33  ;;  %v9232_v31 = vld [vmem:[#allocation16] ss:$0 sm:$0xff] }
 0x3e1   :  { %v2753_v21 = vpop.f32.mrf.mxu1 }
 0x3e2   :  { %v10687_v38 = vadd.f32 %v2789_v52, %v2511_v61  ;;  %3123 = vmatmul.bf16.vlgmr.msrb.gmra.mxu1 %v2829_v49  ;;  %v2754_v51 = vadd.f32 %v2753_v21, %v2553_v4 }
 0x3e4   :  { %v2819_v62 = vmax.f32 %v10687_v38, 0.0  ;;  %v10699_v20 = vadd.f32 %v2754_v51, %v10582_v27 }
 0x3e6   :  { %v2831_v45 = vpack.c.bf16 %v2819_v62, %v2815_v47  ;;  %v11050_v59 = vmax.f32 %v10699_v20, 0.0  ;;  %v11081_v25 = vmax.f32 %v10699_v20, 0.0 }
 0x3e7   :  { %v2791_v19 = vpop.f32.mrf.mxu3 }
 0x3e8   :  { %3161 = vmatmul.bf16.vlgmr.msra.gmra.mxu3 %v2831_v45  ;;  %v2792_v53 = vadd.f32 %v2791_v19, %v2555_v33 }
 0x3e9   :  { %v2755_v24 = vpop.f32.mrf.mxu1 }
 0x3ea   :  { %v2756_v37 = vadd.f32 %v2755_v24, %v2553_v4  ;;  %v10708_v17 = vadd.f32 %v2792_v53, %v2514_v2 }
 0x3ec   :  { %v10702_v46 = vadd.f32 %v2756_v37, %v2440_v28  ;;  %v2823_v42 = vmax.f32 %v10708_v17, 0.0 }
 0x3ee   :  { %v11048_v36 = vmax.f32 %v10702_v46, 0.0  ;;  %v11083_v20 = vmax.f32 %v10702_v46, 0.0 }
 0x3ef   :  { %v2793_v41 = vpop.f32.mrf.mxu3 }
 0x3f0   :  { %v2794_v27 = vadd.f32 %v2793_v41, %v2555_v33  ;;  %v2833_v16 = vpack.c.bf16 %v11048_v36, %v11050_v59 }
 0x3f2   :  { %v10714_v4 = vadd.f32 %v2794_v27, %v2516_v58  ;;  %3128 = vmatmul.bf16.gmra.mxu1 %v2833_v16 }
 0x3f4   :  { %v11052_v11 = vmax.f32 %v10714_v4, 0.0 }
 0x3f6   :  { %v2835_v55 = vpack.c.bf16 %v11052_v11, %v2823_v42 }
 0x3f8   :  { %3166 = vmatmul.bf16.gmra.mxu3 %v2835_v55 }
 0x440   :  { %v3105_v3 = vpop.f32.mrf.mxu0 }
 0x441   :  { %v3106_v57 = vadd.f32 %v9232_v31, %v3105_v3 }
 0x448   :  { %v3107_v33 = vpop.f32.mrf.mxu0 }
 0x449   :  { %v3108_v45 = vadd.f32 %v9232_v31, %v3107_v33 }
 0x44c   :  { %v3143_v43 = vpop.f32.mrf.mxu2 }
 0x450   :  { %v3110_v10 = vpop.f32.mrf.mxu0 }
 0x451   :  { %v3111_v49 = vadd.f32 %v9232_v31, %v3110_v10 }
 0x454   :  { %v3145_v14 = vpop.f32.mrf.mxu2 }
 0x458   :  { %v3112_v61 = vpop.f32.mrf.mxu0 }
 0x459   :  { %v3113_v51 = vadd.f32 %v9232_v31, %v3112_v61  ;;  %v8965_v31 = vld [vmem:[#allocation5 + $0x70] sm:$0xff] }
 0x45c   :  { %v3148_v12 = vpop.f32.mrf.mxu2 }
 0x45f   :  { %v3124_v1 = vpop.f32.mrf.mxu1 }
 0x460   :  { %v3125_v37 = vadd.f32 %v3124_v1, %v3106_v57  ;;  %v8951_v1 = vld [vmem:[#allocation5] sm:$0xff]  ;;  %v8992_v57 = vld [vmem:[#allocation17 + $0xb8] sm:$0xff] }
 0x462   :  { %v3144_v27 = vadd.f32 %v3143_v43, %v3125_v37  ;;  %v8955_v43 = vld [vmem:[#allocation5 + $0x20] sm:$0xff]  ;;  %v8991_v37 = vld [vmem:[#allocation17 + $0xb0] sm:$0xff] }
 0x464   :  { %v3150_v53 = vpop.f32.mrf.mxu2 }
 0x467   :  { %v3126_v7 = vpop.f32.mrf.mxu1 }
 0x468   :  { %v3127_v24 = vadd.f32 %v3126_v7, %v3108_v45  ;;  %v8953_v7 = vld [vmem:[#allocation5 + $0x10] sm:$0xff]  ;;  %v8966_v45 = vld [vmem:[#allocation5 + $0x78] sm:$0xff] }
 0x46a   :  { %v3146_v63 = vadd.f32 %v3145_v14, %v3127_v24  ;;  %v8957_v14 = vld [vmem:[#allocation5 + $0x30] sm:$0xff] }
 0x46b   :  { %v3162_v50 = vpop.f32.mrf.mxu3  ;;  %v8975_v24 = vld [vmem:[#allocation17 + $0x30] sm:$0xff] }
 0x46c   :  { %v3163_v36 = vadd.f32 %v3162_v50, %v3144_v27  ;;  %v8958_v50 = vld [vmem:[#allocation5 + $0x38] sm:$0xff]  ;;  %v8967_v27 = vld [vmem:[#allocation5 + $0x80] sm:$0xff] }
 0x46e   :  { %v3172_v61 = vmax.f32 %v3163_v36, 0.0  ;;  %v8956_v36 = vld [vmem:[#allocation5 + $0x28] sm:$0xff] }
 0x46f   :  { %v3129_v15 = vpop.f32.mrf.mxu1 }
 0x470   :  { %v3130_v19 = vadd.f32 %v3129_v15, %v3111_v49  ;;  %v8959_v15 = vld [vmem:[#allocation5 + $0x40] sm:$0xff]  ;;  %v8960_v49 = vld [vmem:[#allocation5 + $0x48] sm:$0xff] }
 0x472   :  { %v3149_v56 = vadd.f32 %v3148_v12, %v3130_v19  ;;  %v8963_v12 = vld [vmem:[#allocation5 + $0x60] sm:$0xff]  ;;  %v8984_v19 = vld [vmem:[#allocation17 + $0x78] sm:$0xff] }
 0x473   :  { %v3164_v29 = vpop.f32.mrf.mxu3 }
 0x474   :  { %v3165_v16 = vadd.f32 %v3164_v29, %v3146_v63  ;;  %v8961_v29 = vld [vmem:[#allocation5 + $0x50] sm:$0xff]  ;;  %v8982_v63 = vld [vmem:[#allocation17 + $0x68] sm:$0xff] }
 0x476   :  { %v3173_v59 = vmax.f32 %v3165_v16, 0.0  ;;  %v8968_v16 = vld [vmem:[#allocation5 + $0x88] sm:$0xff] }
 0x477   :  { %v3131_v52 = vpop.f32.mrf.mxu1 }
 0x478   :  { %v3132_v28 = vadd.f32 %v3131_v52, %v3113_v51  ;;  %v3176_v3 = vpack.c.bf16 %v3173_v59, %v3172_v61  ;;  %v8954_v59 = vld [vmem:[#allocation5 + $0x18] sm:$0xff]  ;;  %v8999_v61 = vld [vmem:[#allocation17 + $0xf0] sm:$0xff] }
 0x479   :  { %v8962_v52 = vld [vmem:[#allocation5 + $0x58] sm:$0xff] }
 0x47a   :  { %v3151_v41 = vadd.f32 %v3150_v53, %v3132_v28  ;;  %v8976_v51 = vld [vmem:[#allocation17 + $0x38] sm:$0xff]  ;;  %v8983_v28 = vld [vmem:[#allocation17 + $0x70] sm:$0xff]  ;;  %v8974_v53 = vld [vmem:[#allocation17 + $0x28] sm:$0xff] }
 0x47b   :  { %v3167_v21 = vpop.f32.mrf.mxu3 }
 0x47c   :  { %v3168_v2 = vadd.f32 %v3167_v21, %v3149_v56  ;;  %v8964_v21 = vld [vmem:[#allocation5 + $0x68] sm:$0xff]  ;;  %v9000_v56 = vld [vmem:[#allocation17 + $0xf8] sm:$0xff] }
 0x47e   :  { %v3174_v10 = vmax.f32 %v3168_v2, 0.0  ;;  %v8990_v2 = vld [vmem:[#allocation17 + $0xa8] sm:$0xff] }
 0x483   :  { %v3169_v58 = vpop.f32.mrf.mxu3 }
 0x484   :  { %v3170_v55 = vadd.f32 %v3169_v58, %v3151_v41  ;;  %v8973_v41 = vld [vmem:[#allocation17 + $0x20] sm:$0xff] }
 0x485   :  { %v8981_v58 = vld [vmem:[#allocation17 + $0x60] sm:$0xff] }
 0x486   :  { %v3175_v0 = vmax.f32 %v3170_v55, 0.0  ;;  %v8972_v55 = vld [vmem:[#allocation17 + $0x18] sm:$0xff] }
 0x488   :  { %v3177_v33 = vpack.c.bf16 %v3175_v0, %v3174_v10  ;;  %v8952_v0 = vld [vmem:[#allocation5 + $0x8] sm:$0xff]  ;;  %v8980_v10 = vld [vmem:[#allocation17 + $0x58] sm:$0xff] }
 0x48a   :  { %3205 = vmatpush.bf16.msra.mxu0 %v3177_v33  ;;  %3249 = vmatpush.bf16.msra.mxu1 %v3177_v33 }
 0x48b   :  { %3293 = vmatpush.bf16.msrb.mxu2 %v3177_v33  ;;  %3337 = vmatpush.bf16.msrb.mxu3 %v3177_v33 }
 0x48e   :  { %3206 = vmatpush.bf16.msra.mxu0 %v3176_v3  ;;  %3250 = vmatpush.bf16.msra.mxu1 %v3176_v3 }
 0x48f   :  { %3294 = vmatpush.bf16.msrb.mxu2 %v3176_v3  ;;  %3338 = vmatpush.bf16.msrb.mxu3 %v3176_v3 }
 0x491   :  { %7639 = vmatmul.msk.bf16.vlgmr.msra.gmra.mxu0 %vm3192_vm2, %v8951_v1  ;;  %7649 = vmatmul.msk.bf16.vlgmr.msra.gmra.mxu1 %vm3192_vm2, %v8953_v7  ;;  %v8979_v1 = vld [vmem:[#allocation17 + $0x50] sm:$0xff]  ;;  %v8988_v7 = vld [vmem:[#allocation17 + $0x98] sm:$0xff] }
 0x492   :  { %3381 = vmatpush.bf16.msrb.mxu0 %v3177_v33  ;;  %3425 = vmatpush.bf16.msrb.mxu1 %v3177_v33 }
 0x493   :  { %3469 = vmatpush.bf16.msra.mxu2 %v3177_v33  ;;  %3513 = vmatpush.bf16.msra.mxu3 %v3177_v33 }
 0x494   :  { %7659 = vmatmul.msk.bf16.vlgmr.msrb.gmra.mxu2 %vm3192_vm2, %v8955_v43  ;;  %7669 = vmatmul.msk.bf16.vlgmr.msrb.gmra.mxu3 %vm3192_vm2, %v8957_v14  ;;  %v8998_v43 = vld [vmem:[#allocation17 + $0xe8] sm:$0xff] }
 0x495   :  { %v8970_v14 = vld [vmem:[#allocation17 + $0x8] sm:$0xff] }
 0x496   :  { %3382 = vmatpush.bf16.msrb.mxu0 %v3176_v3  ;;  %3426 = vmatpush.bf16.msrb.mxu1 %v3176_v3 }
 0x497   :  { %3470 = vmatpush.bf16.msra.mxu2 %v3176_v3  ;;  %3514 = vmatpush.bf16.msra.mxu3 %v3176_v3 }
 0x49a   :  { %3557 = vmatpush.bf16.msra.mxu0 %v3177_v33  ;;  %4262 = vmatpush.bf16.msra.mxu1 %v8976_v51  ;;  %v8989_v33 = vld [vmem:[#allocation17 + $0xa0] sm:$0xff]  ;;  %v9015_v51 = vld [vmem:[#allocation17 + $0x170] sm:$0xff] }
 0x49b   :  { %4281 = vmatpush.bf16.msrb.mxu2 %v8984_v19  ;;  %4300 = vmatpush.bf16.msrb.mxu3 %v8992_v57  ;;  %v8994_v19 = vld [vmem:[#allocation17 + $0xc8] sm:$0xff]  ;;  %v9024_v57 = vld [vmem:[#allocation17 + $0x1b8] sm:$0xff] }
 0x49e   :  { %3558 = vmatpush.bf16.msra.mxu0 %v3176_v3  ;;  %4263 = vmatpush.bf16.msra.mxu1 %v8975_v24  ;;  %v8971_v3 = vld [vmem:[#allocation17 + $0x10] sm:$0xff]  ;;  %v9006_v24 = vld [vmem:[#allocation17 + $0x128] sm:$0xff] }
 0x49f   :  { %4282 = vmatpush.bf16.msrb.mxu2 %v8983_v28  ;;  %4301 = vmatpush.bf16.msrb.mxu3 %v8991_v37  ;;  %v9014_v28 = vld [vmem:[#allocation17 + $0x168] sm:$0xff]  ;;  %v8993_v37 = vld [vmem:[#allocation17 + $0xc0] sm:$0xff] }
 0x4a1   :  { %7640 = vmatmul.msk.bf16.gmra.mxu0 %vm3192_vm2, %v8952_v0  ;;  %7650 = vmatmul.msk.bf16.gmra.mxu1 %vm3192_vm2, %v8954_v59  ;;  %v8978_v0 = vld [vmem:[#allocation17 + $0x48] sm:$0xff]  ;;  %v8987_v59 = vld [vmem:[#allocation17 + $0x90] sm:$0xff] }
 0x4a2   :  { %4264 = vmatpush.bf16.msra.mxu1 %v8974_v53  ;;  %v9005_v53 = vld [vmem:[#allocation17 + $0x120] sm:$0xff] }
 0x4a3   :  { %4283 = vmatpush.bf16.msrb.mxu2 %v8982_v63  ;;  %4302 = vmatpush.bf16.msrb.mxu3 %v8990_v2  ;;  %v9013_v63 = vld [vmem:[#allocation17 + $0x160] sm:$0xff]  ;;  %v9022_v2 = vld [vmem:[#allocation17 + $0x1a8] sm:$0xff] }
 0x4a4   :  { %7660 = vmatmul.msk.bf16.gmra.mxu2 %vm3192_vm2, %v8956_v36  ;;  %7670 = vmatmul.msk.bf16.gmra.mxu3 %vm3192_vm2, %v8958_v50  ;;  %v8997_v36 = vld [vmem:[#allocation17 + $0xe0] sm:$0xff] }
 0x4a5   :  { %v8969_v50 = vld [vmem:[#allocation17] sm:$0xff] }
 0x4a6   :  { %4265 = vmatpush.bf16.msra.mxu1 %v8973_v41  ;;  %v9032_v41 = vld [vmem:[#allocation17 + $0x1f8] sm:$0xff] }
 0x4a7   :  { %4284 = vmatpush.bf16.msrb.mxu2 %v8981_v58  ;;  %4303 = vmatpush.bf16.msrb.mxu3 %v8989_v33  ;;  %v9004_v58 = vld [vmem:[#allocation17 + $0x118] sm:$0xff]  ;;  %v9031_v33 = vld [vmem:[#allocation17 + $0x1f0] sm:$0xff] }
 0x4aa   :  { %4266 = vmatpush.bf16.msra.mxu1 %v8972_v55 }
 0x4ab   :  { %4285 = vmatpush.bf16.msrb.mxu2 %v8980_v10  ;;  %4304 = vmatpush.bf16.msrb.mxu3 %v8988_v7  ;;  %v9021_v10 = vld [vmem:[#allocation17 + $0x1a0] sm:$0xff]  ;;  %v9020_v7 = vld [vmem:[#allocation17 + $0x198] sm:$0xff] }
 0x4ae   :  { %4267 = vmatpush.bf16.msra.mxu1 %v8971_v3  ;;  %v9011_v3 = vld [vmem:[#allocation17 + $0x150] sm:$0xff] }
 0x4af   :  { %4286 = vmatpush.bf16.msrb.mxu2 %v8979_v1  ;;  %4305 = vmatpush.bf16.msrb.mxu3 %v8987_v59 }
 0x4b1   :  { %7679 = vmatmul.msk.bf16.vlgmr.msrb.gmra.mxu0 %vm3192_vm2, %v8959_v15  ;;  %7689 = vmatmul.msk.bf16.vlgmr.msrb.gmra.mxu1 %vm3192_vm2, %v8961_v29  ;;  %v8977_v15 = vld [vmem:[#allocation17 + $0x40] sm:$0xff]  ;;  %v8986_v29 = vld [vmem:[#allocation17 + $0x88] sm:$0xff] }
 0x4b2   :  { %4319 = vmatpush.bf16.msrb.mxu0 %v9000_v56  ;;  %4268 = vmatpush.bf16.msra.mxu1 %v8970_v14  ;;  %v9023_v56 = vld [vmem:[#allocation17 + $0x1b0] sm:$0xff] }
 0x4b3   :  { %4287 = vmatpush.bf16.msrb.mxu2 %v8978_v0  ;;  %4306 = vmatpush.bf16.msrb.mxu3 %v8986_v29 }
 0x4b4   :  { %7699 = vmatmul.msk.bf16.vlgmr.msra.gmra.mxu2 %vm3192_vm2, %v8963_v12  ;;  %7709 = vmatmul.msk.bf16.vlgmr.msra.gmra.mxu3 %vm3192_vm2, %v8965_v31  ;;  %v8996_v12 = vld [vmem:[#allocation17 + $0xd8] sm:$0xff] }
 0x4b5   :  { %v9008_v31 = vld [vmem:[#allocation17 + $0x138] sm:$0xff] }
 0x4b6   :  { %4320 = vmatpush.bf16.msrb.mxu0 %v8999_v61  ;;  %4269 = vmatpush.bf16.msra.mxu1 %v8969_v50  ;;  %v9003_v61 = vld [vmem:[#allocation17 + $0x110] sm:$0xff]  ;;  %v9010_v50 = vld [vmem:[#allocation17 + $0x148] sm:$0xff] }
 0x4b7   :  { %4288 = vmatpush.bf16.msrb.mxu2 %v8977_v15 }
 0x4ba   :  { %4321 = vmatpush.bf16.msrb.mxu0 %v8998_v43  ;;  %4338 = vmatpush.bf16.msrb.mxu1 %v9008_v31  ;;  %v9030_v43 = vld [vmem:[#allocation17 + $0x1e8] sm:$0xff] }
 0x4be   :  { %4322 = vmatpush.bf16.msrb.mxu0 %v8997_v36  ;;  %v9002_v36 = vld [vmem:[#allocation17 + $0x108] sm:$0xff] }
 0x4c1   :  { %7680 = vmatmul.msk.bf16.gmra.mxu0 %vm3192_vm2, %v8960_v49  ;;  %7690 = vmatmul.msk.bf16.gmra.mxu1 %vm3192_vm2, %v8962_v52  ;;  %v9016_v49 = vld [vmem:[#allocation17 + $0x178] sm:$0xff]  ;;  %v8985_v52 = vld [vmem:[#allocation17 + $0x80] sm:$0xff] }
 0x4c2   :  { %4323 = vmatpush.bf16.msrb.mxu0 %v8996_v12  ;;  %4357 = vmatpush.bf16.msra.mxu2 %v9016_v49 }
 0x4c3   :  { %4307 = vmatpush.bf16.msrb.mxu3 %v8985_v52  ;;  %v9019_v52 = vld [vmem:[#allocation17 + $0x190] sm:$0xff] }
 0x4c4   :  { %7700 = vmatmul.msk.bf16.gmra.mxu2 %vm3192_vm2, %v8964_v21  ;;  %7710 = vmatmul.msk.bf16.gmra.mxu3 %vm3192_vm2, %v8966_v45  ;;  %v8995_v21 = vld [vmem:[#allocation17 + $0xd0] sm:$0xff] }
 0x4c5   :  { %v9007_v45 = vld [vmem:[#allocation17 + $0x130] sm:$0xff] }
 0x4c6   :  { %4324 = vmatpush.bf16.msrb.mxu0 %v8995_v21  ;;  %4339 = vmatpush.bf16.msrb.mxu1 %v9007_v45  ;;  %v9029_v21 = vld [vmem:[#allocation17 + $0x1e0] sm:$0xff] }
 0x4c7   :  { %4358 = vmatpush.bf16.msra.mxu2 %v9015_v51  ;;  %4376 = vmatpush.bf16.msra.mxu3 %v9024_v57  ;;  %v9001_v57 = vld [vmem:[#allocation17 + $0x100] sm:$0xff] }
 0x4ca   :  { %4325 = vmatpush.bf16.msrb.mxu0 %v8994_v19  ;;  %4340 = vmatpush.bf16.msrb.mxu1 %v9006_v24  ;;  %v9009_v24 = vld [vmem:[#allocation17 + $0x140] sm:$0xff] }
 0x4cb   :  { %4359 = vmatpush.bf16.msra.mxu2 %v9014_v28  ;;  %4377 = vmatpush.bf16.msra.mxu3 %v9023_v56 }
 0x4ce   :  { %4326 = vmatpush.bf16.msrb.mxu0 %v8993_v37  ;;  %4341 = vmatpush.bf16.msrb.mxu1 %v9005_v53 }
 0x4cf   :  { %4360 = vmatpush.bf16.msra.mxu2 %v9013_v63  ;;  %4378 = vmatpush.bf16.msra.mxu3 %v9022_v2  ;;  %v9018_v63 = vld [vmem:[#allocation17 + $0x188] sm:$0xff]  ;;  %v9028_v2 = vld [vmem:[#allocation17 + $0x1d8] sm:$0xff] }
 0x4d1   :  { %7719 = vmatmul.msk.bf16.vlgmr.msra.gmra.mxu0 %vm3192_vm2, %v8967_v27  ;;  %v9012_v27 = vld [vmem:[#allocation17 + $0x158] sm:$0xff] }
 0x4d2   :  { %4395 = vmatpush.bf16.msra.mxu0 %v9032_v41  ;;  %4342 = vmatpush.bf16.msrb.mxu1 %v9004_v58 }
 0x4d3   :  { %4361 = vmatpush.bf16.msra.mxu2 %v9012_v27  ;;  %4379 = vmatpush.bf16.msra.mxu3 %v9021_v10  ;;  %v9040_v27 = vld [vmem:[#allocation17 + $0x238] sm:$0xff] }
 0x4d6   :  { %4396 = vmatpush.bf16.msra.mxu0 %v9031_v33  ;;  %4343 = vmatpush.bf16.msrb.mxu1 %v9003_v61 }
 0x4d7   :  { %4362 = vmatpush.bf16.msra.mxu2 %v9011_v3  ;;  %4380 = vmatpush.bf16.msra.mxu3 %v9020_v7  ;;  %v9027_v7 = vld [vmem:[#allocation17 + $0x1d0] sm:$0xff] }
 0x4da   :  { %4397 = vmatpush.bf16.msra.mxu0 %v9030_v43  ;;  %4344 = vmatpush.bf16.msrb.mxu1 %v9002_v36 }
 0x4db   :  { %4363 = vmatpush.bf16.msra.mxu2 %v9010_v50  ;;  %4381 = vmatpush.bf16.msra.mxu3 %v9019_v52 }
 0x4de   :  { %4398 = vmatpush.bf16.msra.mxu0 %v9029_v21  ;;  %4345 = vmatpush.bf16.msrb.mxu1 %v9001_v57  ;;  %v9025_v57 = vld [vmem:[#allocation17 + $0x1c0] sm:$0xff] }
 0x4df   :  { %4364 = vmatpush.bf16.msra.mxu2 %v9009_v24  ;;  %4382 = vmatpush.bf16.msra.mxu3 %v9018_v63 }
 0x4e1   :  { %7720 = vmatmul.msk.bf16.gmra.mxu0 %vm3192_vm2, %v8968_v16 }
 0x4e2   :  { %4399 = vmatpush.bf16.msra.mxu0 %v9028_v2 }
 0x4e6   :  { %4400 = vmatpush.bf16.msra.mxu0 %v9027_v7 }
 0x50e   :  { %v3208_v16 = vpop.f32.mrf.mxu0  ;;  %v3252_v55 = vpop.f32.mrf.mxu1 }
 0x50f   :  { %v3262_v1 = vpack.c.bf16 %v3252_v55, %v3252_v55  ;;  %v3218_v14 = vpack.c.bf16 %v3208_v16, %v3208_v16 }
 0x511   :  { %v3590_v12 = vunpack.c.l.b16 %v3262_v1  ;;  %v3578_v45 = vunpack.c.l.b16 %v3218_v14  ;;  %v9017_v1 = vld [vmem:[#allocation17 + $0x180] sm:$0xff] }
 0x512   :  { %4383 = vmatpush.bf16.msra.mxu3 %v9017_v1 }
 0x516   :  { %v3210_v15 = vpop.f32.mrf.mxu0  ;;  %v3254_v29 = vpop.f32.mrf.mxu1 }
 0x517   :  { %v3296_v0 = vpop.f32.mrf.mxu2  ;;  %v3340_v59 = vpop.f32.mrf.mxu3  ;;  %v3219_v31 = vpack.c.bf16 %v3210_v15, %v3210_v15  ;;  %v3263_v49 = vpack.c.bf16 %v3254_v29, %v3254_v29  ;;  %v9026_v15 = vld [vmem:[#allocation17 + $0x1c8] sm:$0xff] }
 0x518   :  { %v3306_v28 = vpack.c.bf16 %v3296_v0, %v3296_v0  ;;  %v3350_v37 = vpack.c.bf16 %v3340_v59, %v3340_v59  ;;  %v9039_v0 = vld [vmem:[#allocation17 + $0x230] sm:$0xff]  ;;  %4401 = vmatpush.bf16.msra.mxu0 %v9026_v15 }
 0x519   :  { %v3579_v51 = vunpack.c.l.b16 %v3219_v31  ;;  %v3591_v19 = vunpack.c.l.b16 %v3263_v49  ;;  %v9038_v49 = vld [vmem:[#allocation17 + $0x228] sm:$0xff] }
 0x51a   :  { %v3602_v16 = vunpack.c.l.b16 %v3306_v28  ;;  %v3614_v10 = vunpack.c.l.b16 %v3350_v37 }
 0x51b   :  { %v3582_v56 = vpack.c.b16 %v3579_v51, %v3578_v45  ;;  %v3594_v53 = vpack.c.b16 %v3591_v19, %v3590_v12 }
 0x51c   :  { %4402 = vmatpush.bf16.msra.mxu0 %v9025_v57 }
 0x51d   :  { %4270 = vmatmul.bf16.vlgmr.msra.gmra.mxu1 %v3582_v56  ;;  %4289 = vmatmul.bf16.vlgmr.msrb.gmra.mxu2 %v3594_v53  ;;  %v9037_v56 = vld [vmem:[#allocation17 + $0x220] sm:$0xff] }
 0x51e   :  { %v3213_v33 = vpop.f32.mrf.mxu0  ;;  %v3257_v61 = vpop.f32.mrf.mxu1  ;;  %4414 = vmatpush.bf16.msra.mxu1 %v9040_v27 }
 0x51f   :  { %v3298_v41 = vpop.f32.mrf.mxu2  ;;  %v3342_v58 = vpop.f32.mrf.mxu3  ;;  %v3264_v50 = vpack.c.bf16 %v3257_v61, %v3257_v61  ;;  %v3220_v29 = vpack.c.bf16 %v3213_v33, %v3213_v33 }
 0x520   :  { %v3307_v55 = vpack.c.bf16 %v3298_v41, %v3298_v41  ;;  %v3351_v3 = vpack.c.bf16 %v3342_v58, %v3342_v58 }
 0x521   :  { %v3592_v45 = vunpack.c.l.b16 %v3264_v50  ;;  %v3580_v24 = vunpack.c.l.b16 %v3220_v29 }
 0x522   :  { %v3603_v43 = vunpack.c.l.b16 %v3307_v55  ;;  %v3615_v14 = vunpack.c.l.b16 %v3351_v3  ;;  %4415 = vmatpush.bf16.msra.mxu1 %v9039_v0 }
 0x524   :  { %v3606_v59 = vpack.c.b16 %v3603_v43, %v3602_v16  ;;  %v3618_v36 = vpack.c.b16 %v3615_v14, %v3614_v10  ;;  %v9036_v16 = vld [vmem:[#allocation17 + $0x218] sm:$0xff]  ;;  %v9035_v14 = vld [vmem:[#allocation17 + $0x210] sm:$0xff] }
 0x526   :  { %4308 = vmatmul.bf16.vlgmr.msrb.gmra.mxu3 %v3606_v59  ;;  %4327 = vmatmul.bf16.vlgmr.msrb.gmra.mxu0 %v3618_v36  ;;  %v3215_v52 = vpop.f32.mrf.mxu0  ;;  %v3259_v21 = vpop.f32.mrf.mxu1 }
 0x527   :  { %v3301_v12 = vpop.f32.mrf.mxu2  ;;  %v3345_v31 = vpop.f32.mrf.mxu3  ;;  %v3221_v51 = vpack.c.bf16 %v3215_v52, %v3215_v52  ;;  %v3265_v19 = vpack.c.bf16 %v3259_v21, %v3259_v21  ;;  %4416 = vmatpush.bf16.msra.mxu1 %v9038_v49 }
 0x528   :  { %v3308_v53 = vpack.c.bf16 %v3301_v12, %v3301_v12  ;;  %v3352_v63 = vpack.c.bf16 %v3345_v31, %v3345_v31  ;;  %v9034_v12 = vld [vmem:[#allocation17 + $0x208] sm:$0xff] }
 0x529   :  { %v3581_v28 = vunpack.c.l.b16 %v3221_v51  ;;  %v3593_v37 = vunpack.c.l.b16 %v3265_v19 }
 0x52a   :  { %v3604_v55 = vunpack.c.l.b16 %v3308_v53  ;;  %v3616_v33 = vunpack.c.l.b16 %v3352_v63 }
 0x52b   :  { %v3583_v2 = vpack.c.b16 %v3581_v28, %v3580_v24  ;;  %v3595_v41 = vpack.c.b16 %v3593_v37, %v3592_v45  ;;  %4417 = vmatpush.bf16.msra.mxu1 %v9037_v56  ;;  %v9033_v24 = vld [vmem:[#allocation17 + $0x200] sm:$0xff] }
 0x52d   :  { %4275 = vmatmul.bf16.gmra.mxu1 %v3583_v2  ;;  %4294 = vmatmul.bf16.gmra.mxu2 %v3595_v41 }
 0x52e   :  { %v3384_v61 = vpop.f32.mrf.mxu0  ;;  %v3428_v3 = vpop.f32.mrf.mxu1 }
 0x52f   :  { %v3303_v58 = vpop.f32.mrf.mxu2  ;;  %v3347_v27 = vpop.f32.mrf.mxu3  ;;  %4418 = vmatpush.bf16.msra.mxu1 %v9036_v16  ;;  %v3438_v36 = vpack.c.bf16 %v3428_v3, %v3428_v3  ;;  %v3394_v50 = vpack.c.bf16 %v3384_v61, %v3384_v61 }
 0x530   :  { %v3309_v10 = vpack.c.bf16 %v3303_v58, %v3303_v58  ;;  %v3353_v1 = vpack.c.bf16 %v3347_v27, %v3347_v27 }
 0x531   :  { %v3638_v52 = vunpack.c.l.b16 %v3438_v36  ;;  %v3626_v51 = vunpack.c.l.b16 %v3394_v50 }
 0x532   :  { %v3605_v7 = vunpack.c.l.b16 %v3309_v10  ;;  %v3617_v43 = vunpack.c.l.b16 %v3353_v1 }
 0x533   :  { %4419 = vmatpush.bf16.msra.mxu1 %v9035_v14 }
 0x534   :  { %v3607_v0 = vpack.c.b16 %v3605_v7, %v3604_v55  ;;  %v3619_v59 = vpack.c.b16 %v3617_v43, %v3616_v33 }
 0x536   :  { %4313 = vmatmul.bf16.gmra.mxu3 %v3607_v0  ;;  %4332 = vmatmul.bf16.gmra.mxu0 %v3619_v59  ;;  %v3386_v31 = vpop.f32.mrf.mxu0  ;;  %v3430_v49 = vpop.f32.mrf.mxu1 }
 0x537   :  { %v3472_v15 = vpop.f32.mrf.mxu2  ;;  %v3516_v29 = vpop.f32.mrf.mxu3  ;;  %v3395_v21 = vpack.c.bf16 %v3386_v31, %v3386_v31  ;;  %v3439_v45 = vpack.c.bf16 %v3430_v49, %v3430_v49  ;;  %4420 = vmatpush.bf16.msra.mxu1 %v9034_v12 }
 0x538   :  { %v3482_v28 = vpack.c.bf16 %v3472_v15, %v3472_v15  ;;  %v3526_v37 = vpack.c.bf16 %v3516_v29, %v3516_v29 }
 0x539   :  { %v3627_v19 = vunpack.c.l.b16 %v3395_v21  ;;  %v3639_v57 = vunpack.c.l.b16 %v3439_v45 }
 0x53a   :  { %v3650_v41 = vunpack.c.l.b16 %v3482_v28  ;;  %v3662_v27 = vunpack.c.l.b16 %v3526_v37 }
 0x53b   :  { %v3630_v56 = vpack.c.b16 %v3627_v19, %v3626_v51  ;;  %v3642_v53 = vpack.c.b16 %v3639_v57, %v3638_v52  ;;  %4421 = vmatpush.bf16.msra.mxu1 %v9033_v24 }
 0x53d   :  { %4346 = vmatmul.bf16.vlgmr.msrb.gmra.mxu1 %v3630_v56  ;;  %4365 = vmatmul.bf16.vlgmr.msra.gmra.mxu2 %v3642_v53 }
 0x53e   :  { %v3389_v16 = vpop.f32.mrf.mxu0  ;;  %v3433_v55 = vpop.f32.mrf.mxu1 }
 0x53f   :  { %v3474_v63 = vpop.f32.mrf.mxu2  ;;  %v3518_v2 = vpop.f32.mrf.mxu3  ;;  %v3440_v7 = vpack.c.bf16 %v3433_v55, %v3433_v55  ;;  %v3396_v43 = vpack.c.bf16 %v3389_v16, %v3389_v16 }
 0x540   :  { %v3483_v58 = vpack.c.bf16 %v3474_v63, %v3474_v63  ;;  %v3527_v10 = vpack.c.bf16 %v3518_v2, %v3518_v2 }
 0x541   :  { %v3640_v50 = vunpack.c.l.b16 %v3440_v7  ;;  %v3628_v12 = vunpack.c.l.b16 %v3396_v43 }
 0x542   :  { %v3651_v33 = vunpack.c.l.b16 %v3483_v58  ;;  %v3663_v61 = vunpack.c.l.b16 %v3527_v10 }
 0x544   :  { %v3654_v3 = vpack.c.b16 %v3651_v33, %v3650_v41  ;;  %v3666_v1 = vpack.c.b16 %v3663_v61, %v3662_v27 }
 0x546   :  { %4384 = vmatmul.bf16.vlgmr.msra.gmra.mxu3 %v3654_v3  ;;  %4403 = vmatmul.bf16.vlgmr.msra.gmra.mxu0 %v3666_v1  ;;  %v3391_v59 = vpop.f32.mrf.mxu0  ;;  %v3435_v36 = vpop.f32.mrf.mxu1 }
 0x547   :  { %v3477_v14 = vpop.f32.mrf.mxu2  ;;  %v3521_v0 = vpop.f32.mrf.mxu3  ;;  %v3397_v15 = vpack.c.bf16 %v3391_v59, %v3391_v59  ;;  %v3441_v29 = vpack.c.bf16 %v3435_v36, %v3435_v36 }
 0x548   :  { %v3484_v52 = vpack.c.bf16 %v3477_v14, %v3477_v14  ;;  %v3528_v21 = vpack.c.bf16 %v3521_v0, %v3521_v0 }
 0x549   :  { %v3629_v31 = vunpack.c.l.b16 %v3397_v15  ;;  %v3641_v49 = vunpack.c.l.b16 %v3441_v29 }
 0x54a   :  { %v3652_v24 = vunpack.c.l.b16 %v3484_v52  ;;  %v3664_v37 = vunpack.c.l.b16 %v3528_v21  ;;  %v9069_v52 = vld [vmem:[#allocation20 + $0xe4] sm:$0xf] }
 0x54b   :  { %v3631_v45 = vpack.c.b16 %v3629_v31, %v3628_v12  ;;  %v3643_v51 = vpack.c.b16 %v3641_v49, %v3640_v50  ;;  %v8123_v31 = vld [vmem:[#allocation20 + $0xe0] sm:$0xf]  ;;  %v9071_v49 = vld [vmem:[#allocation20 + $0xec] sm:$0xf0] }
 0x54c   :  { %v8124_v21 = vor.u32 %v9071_v49, %v8123_v31  ;;  %v8093_v49 = vld [vmem:[#allocation20 + $0xb0] sm:$0xf0] }
 0x54d   :  { %4351 = vmatmul.bf16.gmra.mxu1 %v3631_v45  ;;  %4370 = vmatmul.bf16.gmra.mxu2 %v3643_v51  ;;  %v8125_v45 = vld [vmem:[#allocation20 + $0xf0] sm:$0xf0]  ;;  %v8131_v51 = vld [vmem:[#allocation20 + $0xe8] sm:$0xf] }
 0x54e   :  { %v3560_v56 = vpop.f32.mrf.mxu0  ;;  %4641 = vmatpush.bf16.msrb.mxu2 %v8124_v21  ;;  %v9064_v21 = vld [vmem:[#allocation20 + $0xb4] sm:$0xf0] }
 0x54f   :  { %v3479_v19 = vpop.f32.mrf.mxu2  ;;  %v3523_v57 = vpop.f32.mrf.mxu3  ;;  %v3570_v27 = vpack.c.bf16 %v3560_v56, %v3560_v56  ;;  %v8133_v56 = vld [vmem:[#allocation20 + $0xf8] sm:$0xf0] }
 0x550   :  { %v3485_v28 = vpack.c.bf16 %v3479_v19, %v3479_v19  ;;  %v3529_v53 = vpack.c.bf16 %v3523_v57, %v3523_v57  ;;  %v9072_v19 = vld [vmem:[#allocation20 + $0xf4] sm:$0xf0] }
 0x551   :  { %v3674_v10 = vunpack.c.l.b16 %v3570_v27 }
 0x552   :  { %v3653_v63 = vunpack.c.l.b16 %v3485_v28  ;;  %v3665_v2 = vunpack.c.l.b16 %v3529_v53  ;;  %v8132_v28 = vor.u32 %v9072_v19, %v8131_v51 }
 0x554   :  { %v3655_v41 = vpack.c.b16 %v3653_v63, %v3652_v24  ;;  %v3667_v58 = vpack.c.b16 %v3665_v2, %v3664_v37  ;;  %v8128_v24 = vor.u32 %v9069_v52, %v8125_v45  ;;  %v9070_v37 = vld [vmem:[#allocation20 + $0xec] sm:$0xf]  ;;  %4679 = vmatpush.bf16.msrb.mxu0 %v8132_v28  ;;  %v8107_v2 = vld [vmem:[#allocation20 + $0xc0] sm:$0xf]  ;;  %v8099_v52 = vld [vmem:[#allocation20 + $0xa8] sm:$0xf] }
 0x555   :  { %v8136_v53 = vor.u32 %v9070_v37, %v8133_v56  ;;  %v9062_v28 = vld [vmem:[#allocation20 + $0xac] sm:$0xf]  ;;  %v8101_v37 = vld [vmem:[#allocation20 + $0xb8] sm:$0xf0] }
 0x556   :  { %4389 = vmatmul.bf16.gmra.mxu3 %v3655_v41  ;;  %4408 = vmatmul.bf16.gmra.mxu0 %v3667_v58  ;;  %v3562_v16 = vpop.f32.mrf.mxu0  ;;  %v9067_v41 = vld [vmem:[#allocation20 + $0xcc] sm:$0xf0]  ;;  %v9065_v58 = vld [vmem:[#allocation20 + $0xc4] sm:$0xf]  ;;  %v8104_v56 = vor.u32 %v9062_v28, %v8101_v37 }
 0x557   :  { %v3571_v55 = vpack.c.bf16 %v3562_v16, %v3562_v16  ;;  %4660 = vmatpush.bf16.msrb.mxu3 %v8128_v24  ;;  %4698 = vmatpush.bf16.msrb.mxu1 %v8136_v53  ;;  %v8108_v27 = vor.u32 %v9067_v41, %v8107_v2  ;;  %v8109_v16 = vld [vmem:[#allocation20 + $0xd0] sm:$0xf0]  ;;  %v8100_v24 = vor.u32 %v9064_v21, %v8099_v52  ;;  %v8075_v53 = vld [vmem:[#allocation20 + $0x80] sm:$0xf]  ;;  %v9059_v2 = vld [vmem:[#allocation20 + $0x8c] sm:$0xf0] }
 0x558   :  { %v9057_v41 = vld [vmem:[#allocation20 + $0x84] sm:$0xf]  ;;  %v8061_v52 = vld [vmem:[#allocation20 + $0x70] sm:$0xf0]  ;;  %v8067_v21 = vld [vmem:[#allocation20 + $0x68] sm:$0xf] }
 0x559   :  { %v3675_v33 = vunpack.c.l.b16 %v3571_v55  ;;  %v8115_v55 = vld [vmem:[#allocation20 + $0xc8] sm:$0xf]  ;;  %4642 = vmatpush.bf16.msrb.mxu2 %v8108_v27  ;;  %v8077_v27 = vld [vmem:[#allocation20 + $0x90] sm:$0xf0] }
 0x55b   :  { %v3678_v61 = vpack.c.b16 %v3675_v33, %v3674_v10  ;;  %v9068_v10 = vld [vmem:[#allocation20 + $0xd4] sm:$0xf0]  ;;  %v8112_v33 = vor.u32 %v9065_v58, %v8109_v16  ;;  %v8076_v58 = vor.u32 %v9059_v2, %v8075_v53  ;;  %v8083_v16 = vld [vmem:[#allocation20 + $0x88] sm:$0xf]  ;;  %v8069_v53 = vld [vmem:[#allocation20 + $0x78] sm:$0xf0] }
 0x55d   :  { %4422 = vmatmul.bf16.vlgmr.msra.gmra.mxu1 %v3678_v61  ;;  %v8116_v61 = vor.u32 %v9068_v10, %v8115_v55  ;;  %4661 = vmatpush.bf16.msrb.mxu3 %v8112_v33  ;;  %v9060_v55 = vld [vmem:[#allocation20 + $0x94] sm:$0xf0]  ;;  %v8080_v33 = vor.u32 %v9057_v41, %v8077_v27  ;;  %v9051_v27 = vld [vmem:[#allocation20 + $0x4c] sm:$0xf0] }
 0x55e   :  { %v3565_v3 = vpop.f32.mrf.mxu0 }
 0x55f   :  { %v3572_v1 = vpack.c.bf16 %v3565_v3, %v3565_v3  ;;  %v9066_v3 = vld [vmem:[#allocation20 + $0xcc] sm:$0xf]  ;;  %4680 = vmatpush.bf16.msrb.mxu0 %v8116_v61  ;;  %v8084_v61 = vor.u32 %v9060_v55, %v8083_v16  ;;  %v9049_v16 = vld [vmem:[#allocation20 + $0x44] sm:$0xf] }
 0x561   :  { %v3676_v14 = vunpack.c.l.b16 %v3572_v1  ;;  %v8117_v1 = vld [vmem:[#allocation20 + $0xd8] sm:$0xf0] }
 0x563   :  { %4681 = vmatpush.bf16.msrb.mxu0 %v8100_v24 }
 0x566   :  { %v3567_v7 = vpop.f32.mrf.mxu0 }
 0x567   :  { %v3573_v43 = vpack.c.bf16 %v3567_v7, %v3567_v7  ;;  %4682 = vmatpush.bf16.msrb.mxu0 %v8084_v61  ;;  %v8051_v61 = vld [vmem:[#allocation20 + $0x48] sm:$0xf] }
 0x569   :  { %v3677_v0 = vunpack.c.l.b16 %v3573_v43  ;;  %v8120_v43 = vor.u32 %v9066_v3, %v8117_v1  ;;  %v9058_v3 = vld [vmem:[#allocation20 + $0x8c] sm:$0xf]  ;;  %v8085_v1 = vld [vmem:[#allocation20 + $0x98] sm:$0xf0] }
 0x56b   :  { %v3679_v59 = vpack.c.b16 %v3677_v0, %v3676_v14  ;;  %v8091_v14 = vld [vmem:[#allocation20 + $0xa0] sm:$0xf]  ;;  %v9063_v0 = vld [vmem:[#allocation20 + $0xac] sm:$0xf0]  ;;  %4699 = vmatpush.bf16.msrb.mxu1 %v8120_v43  ;;  %v8088_v43 = vor.u32 %v9058_v3, %v8085_v1  ;;  %v9052_v3 = vld [vmem:[#allocation20 + $0x54] sm:$0xf0] }
 0x56c   :  { %v8092_v31 = vor.u32 %v9063_v0, %v8091_v14  ;;  %v8059_v0 = vld [vmem:[#allocation20 + $0x60] sm:$0xf] }
 0x56d   :  { %4427 = vmatmul.bf16.gmra.mxu1 %v3679_v59  ;;  %v9061_v59 = vld [vmem:[#allocation20 + $0xa4] sm:$0xf] }
 0x56e   :  { %v8096_v19 = vor.u32 %v9061_v59, %v8093_v49  ;;  %4643 = vmatpush.bf16.msrb.mxu2 %v8092_v31  ;;  %v9055_v59 = vld [vmem:[#allocation20 + $0x6c] sm:$0xf0]  ;;  %v9053_v31 = vld [vmem:[#allocation20 + $0x64] sm:$0xf] }
 0x56f   :  { %4700 = vmatpush.bf16.msrb.mxu1 %v8104_v56  ;;  %v8060_v49 = vor.u32 %v9055_v59, %v8059_v0  ;;  %v8064_v28 = vor.u32 %v9053_v31, %v8061_v52  ;;  %v9054_v56 = vld [vmem:[#allocation20 + $0x6c] sm:$0xf]  ;;  %v8053_v59 = vld [vmem:[#allocation20 + $0x58] sm:$0xf0]  ;;  %v8027_v52 = vld [vmem:[#allocation20 + $0x20] sm:$0xf] }
 0x570   :  { %4662 = vmatpush.bf16.msrb.mxu3 %v8096_v19  ;;  %v9056_v19 = vld [vmem:[#allocation20 + $0x74] sm:$0xf0]  ;;  %v8072_v2 = vor.u32 %v9054_v56, %v8069_v53  ;;  %v9050_v0 = vld [vmem:[#allocation20 + $0x4c] sm:$0xf]  ;;  %v8035_v56 = vld [vmem:[#allocation20 + $0x28] sm:$0xf] }
 0x571   :  { %v8068_v37 = vor.u32 %v9056_v19, %v8067_v21  ;;  %v8056_v31 = vor.u32 %v9050_v0, %v8053_v59  ;;  %v9047_v21 = vld [vmem:[#allocation20 + $0x2c] sm:$0xf0]  ;;  %v9045_v19 = vld [vmem:[#allocation20 + $0x24] sm:$0xf]  ;;  %v9048_v53 = vld [vmem:[#allocation20 + $0x34] sm:$0xf0] }
 0x572   :  { %4644 = vmatpush.bf16.msrb.mxu2 %v8076_v58  ;;  %v8043_v58 = vld [vmem:[#allocation20 + $0x40] sm:$0xf]  ;;  %v8013_v59 = vld [vmem:[#allocation20 + $0x10] sm:$0xf0] }
 0x573   :  { %4701 = vmatpush.bf16.msrb.mxu1 %v8088_v43  ;;  %4683 = vmatpush.bf16.msrb.mxu0 %v8068_v37  ;;  %v8044_v55 = vor.u32 %v9051_v27, %v8043_v58  ;;  %v8052_v43 = vor.u32 %v9052_v3, %v8051_v61  ;;  %v8029_v37 = vld [vmem:[#allocation20 + $0x30] sm:$0xf0]  ;;  %v8011_v3 = vld [vmem:[#allocation20] sm:$0xf] }
 0x574   :  { %4663 = vmatpush.bf16.msrb.mxu3 %v8080_v33  ;;  %v8045_v33 = vld [vmem:[#allocation20 + $0x50] sm:$0xf0]  ;;  %v8032_v27 = vor.u32 %v9045_v19, %v8029_v37  ;;  %v9042_v19 = vld [vmem:[#allocation20 + $0xc] sm:$0xf]  ;;  %v8021_v37 = vld [vmem:[#allocation20 + $0x18] sm:$0xf0] }
 0x575   :  { %v8048_v1 = vor.u32 %v9049_v16, %v8045_v33  ;;  %v8036_v16 = vor.u32 %v9048_v53, %v8035_v56  ;;  %v9046_v33 = vld [vmem:[#allocation20 + $0x2c] sm:$0xf]  ;;  %v8024_v56 = vor.u32 %v9042_v19, %v8021_v37 }
 0x576   :  { %4645 = vmatpush.bf16.msrb.mxu2 %v8060_v49 }
 0x577   :  { %4702 = vmatpush.bf16.msrb.mxu1 %v8072_v2  ;;  %4684 = vmatpush.bf16.msrb.mxu0 %v8052_v43  ;;  %v9041_v43 = vld [vmem:[#allocation20 + $0x4] sm:$0xf] }
 0x578   :  { %4664 = vmatpush.bf16.msrb.mxu3 %v8064_v28  ;;  %v8028_v28 = vor.u32 %v9047_v21, %v8027_v52  ;;  %v9044_v52 = vld [vmem:[#allocation20 + $0x14] sm:$0xf0]  ;;  %v8016_v34 = vor.u32 %v9041_v43, %v8013_v59 }
 0x57a   :  { %4646 = vmatpush.bf16.msrb.mxu2 %v8044_v55  ;;  %v8037_v55 = vld [vmem:[#allocation20 + $0x38] sm:$0xf0] }
 0x57b   :  { %4703 = vmatpush.bf16.msrb.mxu1 %v8056_v31  ;;  %v8040_v61 = vor.u32 %v9046_v33, %v8037_v55  ;;  %4685 = vmatpush.bf16.msrb.mxu0 %v8036_v16  ;;  %v8019_v31 = vld [vmem:[#allocation20 + $0x8] sm:$0xf] }
 0x57c   :  { %4665 = vmatpush.bf16.msrb.mxu3 %v8048_v1  ;;  %v9043_v1 = vld [vmem:[#allocation20 + $0xc] sm:$0xf0]  ;;  %v8020_v11 = vor.u32 %v9044_v52, %v8019_v31 }
 0x57d   :  { %v8012_v0 = vor.u32 %v9043_v1, %v8011_v3 }
 0x57e   :  { %4647 = vmatpush.bf16.msrb.mxu2 %v8028_v28  ;;  %v9233_v28 = vld [vmem:[#allocation19] ss:$0 sm:$0xff] }
 0x57f   :  { %4704 = vmatpush.bf16.msrb.mxu1 %v8040_v61  ;;  %4686 = vmatpush.bf16.msrb.mxu0 %v8020_v11 }
 0x580   :  { %4666 = vmatpush.bf16.msrb.mxu3 %v8032_v27 }
 0x582   :  { %4648 = vmatpush.bf16.msrb.mxu2 %v8012_v0 }
 0x583   :  { %4705 = vmatpush.bf16.msrb.mxu1 %v8024_v56  ;;  %v9096_v56 = vld [vmem:[#allocation22 + $0xb8] sm:$0xff] }
 0x584   :  { %4667 = vmatpush.bf16.msrb.mxu3 %v8016_v34  ;;  %5055 = vmatpush.bf16.msra.mxu0 %v9096_v56 }
 0x59a   :  { %v10740_v36 = vpop.f32.mrf.mxu1 }
 0x59b   :  { %v4272_v33 = vadd.f32 %v9233_v28, %v10740_v36 }
 0x5a0   :  { %v10742_v50 = vpop.f32.mrf.mxu2 }
 0x5a1   :  { %v4291_v55 = vadd.f32 %v10742_v50, %v4272_v33  ;;  %v9104_v33 = vld [vmem:[#allocation22 + $0xf8] sm:$0xff] }
 0x5a2   :  { %v10744_v15 = vpop.f32.mrf.mxu1  ;;  %5074 = vmatpush.bf16.msra.mxu1 %v9104_v33 }
 0x5a3   :  { %v10748_v12 = vpop.f32.mrf.mxu0  ;;  %v4274_v61 = vadd.f32 %v9233_v28, %v10744_v15 }
 0x5a8   :  { %v10752_v63 = vpop.f32.mrf.mxu2 }
 0x5a9   :  { %v10746_v29 = vpop.f32.mrf.mxu3  ;;  %v4293_v43 = vadd.f32 %v10752_v63, %v4274_v61  ;;  %v9080_v63 = vld [vmem:[#allocation22 + $0x38] sm:$0xff] }
 0x5aa   :  { %v10750_v57 = vpop.f32.mrf.mxu1  ;;  %v4310_v1 = vadd.f32 %v10746_v29, %v4291_v55  ;;  %v9088_v61 = vld [vmem:[#allocation22 + $0x78] sm:$0xff]  ;;  %5017 = vmatpush.bf16.msra.mxu2 %v9080_v63 }
 0x5ab   :  { %v10756_v45 = vpop.f32.mrf.mxu0  ;;  %5036 = vmatpush.bf16.msra.mxu3 %v9088_v61 }
 0x5ac   :  { %v4329_v59 = vadd.f32 %v10748_v12, %v4310_v1  ;;  %v9095_v12 = vld [vmem:[#allocation22 + $0xb0] sm:$0xff] }
 0x5ad   :  { %v9103_v1 = vld [vmem:[#allocation22 + $0xf0] sm:$0xff]  ;;  %5056 = vmatpush.bf16.msra.mxu0 %v9095_v12 }
 0x5ae   :  { %5075 = vmatpush.bf16.msra.mxu1 %v9103_v1 }
 0x5b0   :  { %v10760_v10 = vpop.f32.mrf.mxu2 }
 0x5b1   :  { %v10754_v7 = vpop.f32.mrf.mxu3 }
 0x5b2   :  { %v10758_v51 = vpop.f32.mrf.mxu1  ;;  %v4312_v34 = vadd.f32 %v10754_v7, %v4293_v43  ;;  %v4277_v7 = vadd.f32 %v9233_v28, %v10750_v57  ;;  %v9094_v57 = vld [vmem:[#allocation22 + $0xa8] sm:$0xff] }
 0x5b3   :  { %v10766_v41 = vpop.f32.mrf.mxu0  ;;  %5057 = vmatpush.bf16.msra.mxu0 %v9094_v57  ;;  %v9100_v57 = vld [vmem:[#allocation22 + $0xd8] sm:$0xff] }
 0x5b4   :  { %v4331_v52 = vadd.f32 %v10756_v45, %v4312_v34  ;;  %v9079_v45 = vld [vmem:[#allocation22 + $0x30] sm:$0xff]  ;;  %v4279_v34 = vadd.f32 %v9233_v28, %v10758_v51  ;;  %v9093_v51 = vld [vmem:[#allocation22 + $0xa0] sm:$0xff] }
 0x5b5   :  { %5018 = vmatpush.bf16.msra.mxu2 %v9079_v45 }
 0x5b7   :  { %5058 = vmatpush.bf16.msra.mxu0 %v9093_v51  ;;  %v9075_v51 = vld [vmem:[#allocation22 + $0x10] sm:$0xff] }
 0x5b8   :  { %v10768_v49 = vpop.f32.mrf.mxu2 }
 0x5b9   :  { %v10762_v14 = vpop.f32.mrf.mxu3 }
 0x5ba   :  { %v10764_v24 = vpop.f32.mrf.mxu1 }
 0x5bb   :  { %v10772_v21 = vpop.f32.mrf.mxu0  ;;  %v4348_v36 = vadd.f32 %v10764_v24, %v4329_v59  ;;  %v9087_v24 = vld [vmem:[#allocation22 + $0x70] sm:$0xff] }
 0x5bc   :  { %5037 = vmatpush.bf16.msra.mxu3 %v9087_v24 }
 0x5c0   :  { %v4366_v53 = vpop.f32.mrf.mxu2 }
 0x5c1   :  { %v10770_v2 = vpop.f32.mrf.mxu3  ;;  %v4367_v19 = vadd.f32 %v4366_v53, %v4348_v36  ;;  %v4298_v36 = vadd.f32 %v10768_v49, %v4279_v34 }
 0x5c2   :  { %v4349_v58 = vpop.f32.mrf.mxu1 }
 0x5c3   :  { %v4404_v3 = vpop.f32.mrf.mxu0  ;;  %v4350_v50 = vadd.f32 %v4349_v58, %v4331_v52  ;;  %v4296_v58 = vadd.f32 %v10760_v10, %v4277_v7  ;;  %v9102_v52 = vld [vmem:[#allocation22 + $0xe8] sm:$0xff]  ;;  %v4317_v10 = vadd.f32 %v10770_v2, %v4298_v36  ;;  %v9085_v36 = vld [vmem:[#allocation22 + $0x60] sm:$0xff] }
 0x5c4   :  { %5076 = vmatpush.bf16.msra.mxu1 %v9102_v52  ;;  %v9077_v52 = vld [vmem:[#allocation22 + $0x20] sm:$0xff] }
 0x5c8   :  { %v4368_v11 = vpop.f32.mrf.mxu2 }
 0x5c9   :  { %v4385_v16 = vpop.f32.mrf.mxu3  ;;  %v4369_v55 = vadd.f32 %v4368_v11, %v4350_v50  ;;  %v4315_v11 = vadd.f32 %v10762_v14, %v4296_v58  ;;  %v9101_v14 = vld [vmem:[#allocation22 + $0xe0] sm:$0xff] }
 0x5ca   :  { %v4352_v27 = vpop.f32.mrf.mxu1  ;;  %v4386_v29 = vadd.f32 %v4385_v16, %v4367_v19  ;;  %5077 = vmatpush.bf16.msra.mxu1 %v9101_v14  ;;  %v9083_v14 = vld [vmem:[#allocation22 + $0x50] sm:$0xff] }
 0x5cb   :  { %v4406_v37 = vpop.f32.mrf.mxu0  ;;  %v4334_v28 = vadd.f32 %v10766_v41, %v4315_v11 }
 0x5cc   :  { %v4405_v16 = vadd.f32 %v4404_v3, %v4386_v29 }
 0x5cd   :  { %v4353_v49 = vadd.f32 %v4352_v27, %v4334_v28  ;;  %v9089_v28 = vld [vmem:[#allocation22 + $0x80] sm:$0xff] }
 0x5ce   :  { %5078 = vmatpush.bf16.msra.mxu1 %v9100_v57 }
 0x5d0   :  { %v4371_v53 = vpop.f32.mrf.mxu2 }
 0x5d1   :  { %v4387_v31 = vpop.f32.mrf.mxu3  ;;  %v4372_v63 = vadd.f32 %v4371_v53, %v4353_v49  ;;  %v9086_v53 = vld [vmem:[#allocation22 + $0x68] sm:$0xff]  ;;  %v9073_v49 = vld [vmem:[#allocation22] sm:$0xff] }
 0x5d2   :  { %v4354_v0 = vpop.f32.mrf.mxu1  ;;  %v4388_v43 = vadd.f32 %v4387_v31, %v4369_v55  ;;  %v4336_v55 = vadd.f32 %v10772_v21, %v4317_v10  ;;  %5038 = vmatpush.bf16.msra.mxu3 %v9086_v53  ;;  %v9084_v10 = vld [vmem:[#allocation22 + $0x58] sm:$0xff] }
 0x5d3   :  { %v4409_v33 = vpop.f32.mrf.mxu0 }
 0x5d4   :  { %v4407_v31 = vadd.f32 %v4406_v37, %v4388_v43  ;;  %v4355_v61 = vadd.f32 %v4354_v0, %v4336_v55  ;;  %v9078_v0 = vld [vmem:[#allocation22 + $0x28] sm:$0xff] }
 0x5d5   :  { %5019 = vmatpush.bf16.msra.mxu2 %v9078_v0  ;;  %v9082_v55 = vld [vmem:[#allocation22 + $0x48] sm:$0xff] }
 0x5d6   :  { %5039 = vmatpush.bf16.msra.mxu3 %v9085_v36 }
 0x5d9   :  { %v4390_v59 = vpop.f32.mrf.mxu3  ;;  %5020 = vmatpush.bf16.msra.mxu2 %v9077_v52 }
 0x5da   :  { %v4423_v15 = vpop.f32.mrf.mxu1  ;;  %v4391_v12 = vadd.f32 %v4390_v59, %v4372_v63  ;;  %v9092_v59 = vld [vmem:[#allocation22 + $0x98] sm:$0xff]  ;;  %5040 = vmatpush.bf16.msra.mxu3 %v9084_v10 }
 0x5db   :  { %v4424_v19 = vadd.f32 %v4423_v15, %v4405_v16  ;;  %v4373_v15 = vpop.f32.mrf.mxu2  ;;  %v4411_v43 = vpop.f32.mrf.mxu0  ;;  %5059 = vmatpush.bf16.msra.mxu0 %v9092_v59 }
 0x5dc   :  { %v4374_v1 = vadd.f32 %v4373_v15, %v4355_v61  ;;  %v4410_v45 = vadd.f32 %v4409_v33, %v4391_v12  ;;  %v9098_v33 = vld [vmem:[#allocation22 + $0xc8] sm:$0xff]  ;;  %v4471_v15 = vld [vmem:[%s11035_s18] sm:$0xf] }
 0x5dd   :  { %v4433_v3 = vmax.f32 %v4424_v19, 0.0  ;;  %v9099_v19 = vld [vmem:[#allocation22 + $0xd0] sm:$0xff] }
 0x5de   :  { %5079 = vmatpush.bf16.msra.mxu1 %v9099_v19  ;;  %5041 = vmatpush.bf16.msra.mxu3 %v9083_v14 }
 0x5e1   :  { %v4392_v2 = vpop.f32.mrf.mxu3 }
 0x5e2   :  { %v4425_v50 = vpop.f32.mrf.mxu1  ;;  %v4393_v41 = vadd.f32 %v4392_v2, %v4374_v1  ;;  %5080 = vmatpush.bf16.msra.mxu1 %v9098_v33  ;;  %5042 = vmatpush.bf16.msra.mxu3 %v9082_v55  ;;  %v4475_v2 = vperm.slane %v4471_v15, 2 }
 0x5e3   :  { %v4426_v56 = vadd.f32 %v4425_v50, %v4407_v31  ;;  %v9091_v31 = vld [vmem:[#allocation22 + $0x90] sm:$0xff]  ;;  %v9076_v50 = vld [vmem:[#allocation22 + $0x18] sm:$0xff] }
 0x5e4   :  { %v4412_v24 = vadd.f32 %v4411_v43, %v4393_v41  ;;  %5060 = vmatpush.bf16.msra.mxu0 %v9091_v31  ;;  %5021 = vmatpush.bf16.msra.mxu2 %v9076_v50 }
 0x5e5   :  { %v4434_v29 = vmax.f32 %v4426_v56, 0.0  ;;  %v9090_v56 = vld [vmem:[#allocation22 + $0x88] sm:$0xff] }
 0x5e7   :  { %v4437_v37 = vpack.c.bf16 %v4434_v29, %v4433_v3  ;;  %v9097_v3 = vld [vmem:[#allocation22 + $0xc0] sm:$0xff]  ;;  %v9074_v29 = vld [vmem:[#allocation22 + $0x8] sm:$0xff] }
 0x5e8   :  { %5061 = vmatpush.bf16.msra.mxu0 %v9090_v56  ;;  %5022 = vmatpush.bf16.msra.mxu2 %v9075_v51 }
 0x5e9   :  { %4649 = vmatmul.bf16.vlgmr.msrb.gmra.mxu2 %v4437_v37  ;;  %4668 = vmatmul.bf16.vlgmr.msrb.gmra.mxu3 %v4437_v37 }
 0x5ea   :  { %4687 = vmatmul.bf16.vlgmr.msrb.gmra.mxu0 %v4437_v37  ;;  %4706 = vmatmul.bf16.vlgmr.msrb.gmra.mxu1 %v4437_v37  ;;  %v4428_v7 = vpop.f32.mrf.mxu1  ;;  %v9081_v37 = vld [vmem:[#allocation22 + $0x40] sm:$0xff] }
 0x5eb   :  { %v4429_v21 = vadd.f32 %v4428_v7, %v4410_v45  ;;  %5081 = vmatpush.bf16.msra.mxu1 %v9097_v3  ;;  %5043 = vmatpush.bf16.msra.mxu3 %v9081_v37  ;;  %v4476_v7 = vperm.slane %v4471_v15, 3  ;;  %v4473_v45 = vperm.slane %v4471_v15, 0 }
 0x5ec   :  { %5062 = vmatpush.bf16.msra.mxu0 %v9089_v28  ;;  %5023 = vmatpush.bf16.msra.mxu2 %v9074_v29 }
 0x5ed   :  { %v4435_v34 = vmax.f32 %v4429_v21, 0.0 }
 0x5f0   :  { %5024 = vmatpush.bf16.msra.mxu2 %v9073_v49 }
 0x5f2   :  { %v4430_v27 = vpop.f32.mrf.mxu1 }
 0x5f3   :  { %v4431_v58 = vadd.f32 %v4430_v27, %v4412_v24  ;;  %v4474_v24 = vperm.slane %v4471_v15, 1 }
 0x5f5   :  { %v4436_v16 = vmax.f32 %v4431_v58, 0.0 }
 0x5f7   :  { %v4438_v11 = vpack.c.bf16 %v4436_v16, %v4435_v34 }
 0x5f9   :  { %4654 = vmatmul.bf16.gmra.mxu2 %v4438_v11  ;;  %4673 = vmatmul.bf16.gmra.mxu3 %v4438_v11 }
 0x5fa   :  { %4692 = vmatmul.bf16.gmra.mxu0 %v4438_v11  ;;  %4711 = vmatmul.bf16.gmra.mxu1 %v4438_v11 }
 0x667   :  { %v4688_v63 = vpop.f32.mrf.mxu0  ;;  %v4707_v61 = vpop.f32.mrf.mxu1 }
 0x668   :  { %v4689_v12 = vadd.f32 %v4688_v63, %v4475_v2  ;;  %v4708_v1 = vadd.f32 %v4707_v61, %v4476_v7 }
 0x66a   :  { %v10796_v58 = vadd.f32 %v4689_v12, %v2814_v8  ;;  %v10800_v34 = vadd.f32 %v4708_v1, %v2815_v47  ;;  %v11079_v12 = vmax.f32 %v10714_v4, 0.0 }
 0x66c   :  { %v4650_v41 = vpop.f32.mrf.mxu2  ;;  %v4669_v43 = vpop.f32.mrf.mxu3  ;;  %v11054_v6 = vmax.f32 %v10796_v58, 0.0  ;;  %v11053_v8 = vmax.f32 %v10800_v34, 0.0 }
 0x66d   :  { %v4651_v0 = vadd.f32 %v4650_v41, %v4473_v45  ;;  %v4670_v53 = vadd.f32 %v4669_v43, %v4474_v24  ;;  %v11080_v41 = vmax.f32 %v10641_v23, 0.0  ;;  %v11082_v23 = vmax.f32 %v10645_v35, 0.0 }
 0x66f   :  { %v4690_v21 = vpop.f32.mrf.mxu0  ;;  %v4709_v27 = vpop.f32.mrf.mxu1  ;;  %v10816_v31 = vadd.f32 %v4651_v0, %v2812_v60  ;;  %v10820_v9 = vadd.f32 %v4670_v53, %v2813_v40 }
 0x670   :  { %v4691_v16 = vadd.f32 %v4690_v21, %v4475_v2  ;;  %v4710_v11 = vadd.f32 %v4709_v27, %v4476_v7 }
 0x671   :  { %v4733_v50 = vmax.f32 %v10816_v31, 0.0  ;;  %v4734_v10 = vmax.f32 %v10820_v9, 0.0 }
 0x672   :  { %v10804_v59 = vadd.f32 %v4691_v16, %v2818_v44  ;;  %v10808_v57 = vadd.f32 %v4710_v11, %v2819_v62 }
 0x674   :  { %v11058_v32 = vmax.f32 %v10804_v59, 0.0  ;;  %v11057_v47 = vmax.f32 %v10808_v57, 0.0  ;;  %v4652_v52 = vpop.f32.mrf.mxu2  ;;  %v4671_v36 = vpop.f32.mrf.mxu3 }
 0x675   :  { %v4653_v44 = vadd.f32 %v4652_v52, %v4473_v45  ;;  %v4672_v38 = vadd.f32 %v4671_v36, %v4474_v24 }
 0x676   :  { %v4751_v62 = vpack.c.bf16 %v11058_v32, %v11054_v6  ;;  %v4752_v19 = vpack.c.bf16 %v11057_v47, %v11053_v8  ;;  %v9182_v6 = vld [vmem:[#allocation26 + $0x2c] sm:$0xf] }
 0x677   :  { %v10832_v26 = vadd.f32 %v4653_v44, %v2816_v54  ;;  %v10836_v60 = vadd.f32 %v4672_v38, %v2817_v13  ;;  %v4693_v39 = vpop.f32.mrf.mxu0  ;;  %v4712_v40 = vpop.f32.mrf.mxu1 }
 0x678   :  { %5063 = vmatmul.bf16.vlgmr.msra.gmra.mxu0 %v4751_v62  ;;  %5082 = vmatmul.bf16.vlgmr.msra.gmra.mxu1 %v4752_v19  ;;  %v4694_v18 = vadd.f32 %v4693_v39, %v4475_v2  ;;  %v4713_v13 = vadd.f32 %v4712_v40, %v4476_v7 }
 0x679   :  { %v4737_v56 = vmax.f32 %v10832_v26, 0.0  ;;  %v4738_v33 = vmax.f32 %v10836_v60, 0.0 }
 0x67a   :  { %v10852_v29 = vadd.f32 %v4694_v18, %v2822_v5  ;;  %v10856_v55 = vadd.f32 %v4713_v13, %v2823_v42 }
 0x67b   :  { %v4749_v22 = vpack.c.bf16 %v4737_v56, %v4733_v50  ;;  %v4750_v54 = vpack.c.bf16 %v4738_v33, %v4734_v10 }
 0x67c   :  { %v4655_v51 = vpop.f32.mrf.mxu2  ;;  %v4674_v14 = vpop.f32.mrf.mxu3  ;;  %v4743_v30 = vmax.f32 %v10852_v29, 0.0  ;;  %v4744_v5 = vmax.f32 %v10856_v55, 0.0  ;;  %v11088_v55 = vmax.f32 %v10796_v58, 0.0  ;;  %v6481_v58 = vld [vmem:[%s11090_s17] sm:$0x1] }
 0x67d   :  { %5025 = vmatmul.bf16.vlgmr.msra.gmra.mxu2 %v4749_v22  ;;  %5044 = vmatmul.bf16.vlgmr.msra.gmra.mxu3 %v4750_v54  ;;  %v4656_v15 = vadd.f32 %v4655_v51, %v4473_v45  ;;  %v4675_v63 = vadd.f32 %v4674_v14, %v4474_v24  ;;  %v9234_v54 = vld [vmem:[#allocation23] ss:$0 sm:$0xff] }
 0x67f   :  { %v4695_v28 = vpop.f32.mrf.mxu0  ;;  %v4714_v3 = vpop.f32.mrf.mxu1  ;;  %v10872_v43 = vadd.f32 %v4656_v15, %v11080_v41 }
 0x680   :  { %v4696_v49 = vadd.f32 %v4695_v28, %v4475_v2  ;;  %v4715_v37 = vadd.f32 %v4714_v3, %v4476_v7 }
 0x682   :  { %v10860_v61 = vadd.f32 %v4696_v49, %v2826_v48  ;;  %v10864_v1 = vadd.f32 %v4715_v37, %v11079_v12  ;;  %v10876_v48 = vadd.f32 %v4675_v63, %v11081_v25 }
 0x684   :  { %v11056_v17 = vmax.f32 %v10860_v61, 0.0  ;;  %v11055_v42 = vmax.f32 %v10864_v1, 0.0  ;;  %v4657_v2 = vpop.f32.mrf.mxu2  ;;  %v4676_v7 = vpop.f32.mrf.mxu3  ;;  %v11087_v29 = vmax.f32 %v10864_v1, 0.0 }
 0x685   :  { %v4658_v4 = vadd.f32 %v4657_v2, %v4473_v45  ;;  %v4677_v21 = vadd.f32 %v4676_v7, %v4474_v24  ;;  %v4741_v45 = vmax.f32 %v10872_v43, 0.0  ;;  %v4742_v24 = vmax.f32 %v10876_v48, 0.0 }
 0x686   :  { %v4755_v27 = vpack.c.bf16 %v11056_v17, %v4743_v30  ;;  %v4756_v16 = vpack.c.bf16 %v11055_v42, %v4744_v5  ;;  %v8599_v42 = vld [vmem:[#allocation26 + $0x38] sm:$0xf0] }
 0x687   :  { %v10888_v11 = vadd.f32 %v4658_v4, %v11082_v23  ;;  %v10892_v0 = vadd.f32 %v4677_v21, %v11083_v20  ;;  %v8602_v17 = vor.u32 %v9182_v6, %v8599_v42 }
 0x688   :  { %5068 = vmatmul.bf16.gmra.mxu0 %v4755_v27  ;;  %5087 = vmatmul.bf16.gmra.mxu1 %v4756_v16 }
 0x689   :  { %v4745_v53 = vmax.f32 %v10888_v11, 0.0  ;;  %v4746_v52 = vmax.f32 %v10892_v0, 0.0 }
 0x68b   :  { %v4753_v35 = vpack.c.bf16 %v4745_v53, %v4741_v45  ;;  %v4754_v46 = vpack.c.bf16 %v4746_v52, %v4742_v24 }
 0x68d   :  { %5030 = vmatmul.bf16.gmra.mxu2 %v4753_v35  ;;  %5049 = vmatmul.bf16.gmra.mxu3 %v4754_v46 }
 0x6f5   :  { %v5064_v36 = vpop.f32.mrf.mxu0  ;;  %v5083_v44 = vpop.f32.mrf.mxu1 }
 0x6fd   :  { %v5066_v19 = vpop.f32.mrf.mxu0  ;;  %v5085_v22 = vpop.f32.mrf.mxu1 }
 0x700   :  { %v5026_v38 = vpop.f32.mrf.mxu2  ;;  %v5045_v62 = vpop.f32.mrf.mxu3 }
 0x701   :  { %v5027_v49 = vadd.f32 %v9234_v54, %v5026_v38 }
 0x703   :  { %v5046_v12 = vadd.f32 %v5045_v62, %v5027_v49  ;;  %v9246_v49 = vld [vmem:[#allocation5 + $0x70] sm:$0xff] }
 0x705   :  { %v5069_v14 = vpop.f32.mrf.mxu0  ;;  %v5088_v3 = vpop.f32.mrf.mxu1  ;;  %v5065_v27 = vadd.f32 %v5064_v36, %v5046_v12  ;;  %v9236_v36 = vld [vmem:[#allocation5] sm:$0xff]  ;;  %v9112_v12 = vld [vmem:[#allocation25 + $0x38] sm:$0xff] }
 0x708   :  { %v5028_v39 = vpop.f32.mrf.mxu2  ;;  %v5047_v40 = vpop.f32.mrf.mxu3 }
 0x709   :  { %v5029_v28 = vadd.f32 %v9234_v54, %v5028_v39 }
 0x70b   :  { %v5048_v15 = vadd.f32 %v5047_v40, %v5029_v28  ;;  %v9244_v28 = vld [vmem:[#allocation5 + $0x40] sm:$0xff] }
 0x70d   :  { %v5067_v25 = vadd.f32 %v5066_v19, %v5048_v15  ;;  %v5071_v21 = vpop.f32.mrf.mxu0  ;;  %v5090_v20 = vpop.f32.mrf.mxu1  ;;  %v9239_v19 = vld [vmem:[#allocation5 + $0x20] sm:$0xff]  ;;  %v9248_v15 = vld [vmem:[#allocation5 + $0x48] sm:$0xff] }
 0x70f   :  { %v5086_v35 = vadd.f32 %v5085_v22, %v5067_v25  ;;  %v9240_v22 = vld [vmem:[#allocation5 + $0x8] sm:$0xff]  ;;  %v9120_v25 = vld [vmem:[#allocation25 + $0x78] sm:$0xff] }
 0x710   :  { %v5031_v18 = vpop.f32.mrf.mxu2  ;;  %v5050_v13 = vpop.f32.mrf.mxu3 }
 0x711   :  { %v5032_v51 = vadd.f32 %v9234_v54, %v5031_v18  ;;  %v5084_v18 = vadd.f32 %v5083_v44, %v5065_v27  ;;  %v5094_v38 = vmax.f32 %v5086_v35, 0.0  ;;  %v9237_v44 = vld [vmem:[#allocation5 + $0x10] sm:$0xff]  ;;  %v9134_v35 = vld [vmem:[#allocation25 + $0xe8] sm:$0xff] }
 0x712   :  { %v9135_v27 = vld [vmem:[#allocation25 + $0xf0] sm:$0xff] }
 0x713   :  { %v5051_v37 = vadd.f32 %v5050_v13, %v5032_v51  ;;  %v5093_v40 = vmax.f32 %v5084_v18, 0.0  ;;  %v9242_v51 = vld [vmem:[#allocation5 + $0x38] sm:$0xff]  ;;  %v9252_v18 = vld [vmem:[#allocation5 + $0x80] sm:$0xff] }
 0x715   :  { %v5070_v2 = vadd.f32 %v5069_v14, %v5051_v37  ;;  %v5097_v62 = vpack.c.bf16 %v5094_v38, %v5093_v40  ;;  %v9243_v14 = vld [vmem:[#allocation5 + $0x28] sm:$0xff]  ;;  %v9247_v37 = vld [vmem:[#allocation5 + $0x60] sm:$0xff]  ;;  %v9108_v38 = vld [vmem:[#allocation25 + $0x18] sm:$0xff] }
 0x716   :  { %v9126_v40 = vld [vmem:[#allocation25 + $0xa8] sm:$0xff] }
 0x717   :  { %v5089_v16 = vadd.f32 %v5088_v3, %v5070_v2  ;;  %v9245_v3 = vld [vmem:[#allocation5 + $0x50] sm:$0xff] }
 0x718   :  { %v5033_v63 = vpop.f32.mrf.mxu2  ;;  %v5052_v41 = vpop.f32.mrf.mxu3  ;;  %v9136_v2 = vld [vmem:[#allocation25 + $0xf8] sm:$0xff] }
 0x719   :  { %v5034_v7 = vadd.f32 %v9234_v54, %v5033_v63  ;;  %v5095_v39 = vmax.f32 %v5089_v16, 0.0  ;;  %v9241_v54 = vld [vmem:[#allocation5 + $0x18] sm:$0xff]  ;;  %v9119_v16 = vld [vmem:[#allocation25 + $0x70] sm:$0xff] }
 0x71a   :  { %v9249_v63 = vld [vmem:[#allocation5 + $0x58] sm:$0xff] }
 0x71b   :  { %v5053_v4 = vadd.f32 %v5052_v41, %v5034_v7  ;;  %v9250_v7 = vld [vmem:[#allocation5 + $0x78] sm:$0xff]  ;;  %v9251_v41 = vld [vmem:[#allocation5 + $0x68] sm:$0xff] }
 0x71d   :  { %v5072_v23 = vadd.f32 %v5071_v21, %v5053_v4  ;;  %v9128_v4 = vld [vmem:[#allocation25 + $0xb8] sm:$0xff]  ;;  %v9111_v21 = vld [vmem:[#allocation25 + $0x30] sm:$0xff] }
 0x71f   :  { %v5091_v46 = vadd.f32 %v5090_v20, %v5072_v23  ;;  %v9127_v23 = vld [vmem:[#allocation25 + $0xb0] sm:$0xff]  ;;  %v9110_v20 = vld [vmem:[#allocation25 + $0x28] sm:$0xff] }
 0x721   :  { %v5096_v8 = vmax.f32 %v5091_v46, 0.0  ;;  %v9109_v46 = vld [vmem:[#allocation25 + $0x20] sm:$0xff] }
 0x723   :  { %v5098_v13 = vpack.c.bf16 %v5096_v8, %v5095_v39  ;;  %v9238_v8 = vld [vmem:[#allocation5 + $0x30] sm:$0xff]  ;;  %v9253_v39 = vld [vmem:[#allocation5 + $0x88] sm:$0xff] }
 0x725   :  { %5105 = vmatpush.bf16.msrb.mxu2 %v5098_v13  ;;  %5128 = vmatpush.bf16.msrb.mxu3 %v5098_v13 }
 0x726   :  { %5151 = vmatpush.bf16.msrb.mxu0 %v5098_v13  ;;  %5174 = vmatpush.bf16.msrb.mxu1 %v5098_v13 }
 0x729   :  { %5106 = vmatpush.bf16.msrb.mxu2 %v5097_v62  ;;  %5129 = vmatpush.bf16.msrb.mxu3 %v5097_v62 }
 0x72a   :  { %5152 = vmatpush.bf16.msrb.mxu0 %v5097_v62  ;;  %5175 = vmatpush.bf16.msrb.mxu1 %v5097_v62 }
 0x72c   :  { %8265 = vmatmul.msk.bf16.vlgmr.msrb.gmra.mxu2 %vm3192_vm2, %v9236_v36  ;;  %8267 = vmatmul.msk.bf16.vlgmr.msrb.gmra.mxu3 %vm3192_vm2, %v9237_v44  ;;  %v9107_v36 = vld [vmem:[#allocation25 + $0x10] sm:$0xff]  ;;  %v9117_v44 = vld [vmem:[#allocation25 + $0x60] sm:$0xff] }
 0x72d   :  { %5197 = vmatpush.bf16.msra.mxu2 %v5098_v13  ;;  %5220 = vmatpush.bf16.msra.mxu3 %v5098_v13 }
 0x72e   :  { %5243 = vmatpush.bf16.msra.mxu0 %v5098_v13  ;;  %5266 = vmatpush.bf16.msra.mxu1 %v5098_v13 }
 0x72f   :  { %8271 = vmatmul.msk.bf16.vlgmr.msrb.gmra.mxu1 %vm3192_vm2, %v9238_v8  ;;  %8269 = vmatmul.msk.bf16.vlgmr.msrb.gmra.mxu0 %vm3192_vm2, %v9239_v19  ;;  %v9125_v8 = vld [vmem:[#allocation25 + $0xa0] sm:$0xff]  ;;  %v9132_v19 = vld [vmem:[#allocation25 + $0xd8] sm:$0xff] }
 0x731   :  { %5198 = vmatpush.bf16.msra.mxu2 %v5097_v62  ;;  %5221 = vmatpush.bf16.msra.mxu3 %v5097_v62 }
 0x732   :  { %5244 = vmatpush.bf16.msra.mxu0 %v5097_v62  ;;  %5267 = vmatpush.bf16.msra.mxu1 %v5097_v62 }
 0x735   :  { %5289 = vmatpush.bf16.msrb.mxu2 %v5098_v13  ;;  %5994 = vmatpush.bf16.msrb.mxu3 %v9112_v12  ;;  %v9118_v13 = vld [vmem:[#allocation25 + $0x68] sm:$0xff] }
 0x736   :  { %6013 = vmatpush.bf16.msrb.mxu0 %v9120_v25  ;;  %6032 = vmatpush.bf16.msrb.mxu1 %v9128_v4  ;;  %v9122_v12 = vld [vmem:[#allocation25 + $0x88] sm:$0xff]  ;;  %v9121_v25 = vld [vmem:[#allocation25 + $0x80] sm:$0xff]  ;;  %v9168_v4 = vld [vmem:[#allocation25 + $0x1f8] sm:$0xff] }
 0x739   :  { %5290 = vmatpush.bf16.msrb.mxu2 %v5097_v62  ;;  %5995 = vmatpush.bf16.msrb.mxu3 %v9111_v21  ;;  %v9133_v62 = vld [vmem:[#allocation25 + $0xe0] sm:$0xff]  ;;  %v9142_v21 = vld [vmem:[#allocation25 + $0x128] sm:$0xff] }
 0x73a   :  { %6014 = vmatpush.bf16.msrb.mxu0 %v9119_v16  ;;  %6033 = vmatpush.bf16.msrb.mxu1 %v9127_v23  ;;  %v9160_v16 = vld [vmem:[#allocation25 + $0x1b8] sm:$0xff]  ;;  %v9167_v23 = vld [vmem:[#allocation25 + $0x1f0] sm:$0xff] }
 0x73c   :  { %8266 = vmatmul.msk.bf16.gmra.mxu2 %vm3192_vm2, %v9240_v22  ;;  %8268 = vmatmul.msk.bf16.gmra.mxu3 %vm3192_vm2, %v9241_v54  ;;  %v9106_v22 = vld [vmem:[#allocation25 + $0x8] sm:$0xff]  ;;  %v9116_v54 = vld [vmem:[#allocation25 + $0x58] sm:$0xff] }
 0x73d   :  { %5996 = vmatpush.bf16.msrb.mxu3 %v9110_v20 }
 0x73e   :  { %6015 = vmatpush.bf16.msrb.mxu0 %v9118_v13  ;;  %6034 = vmatpush.bf16.msrb.mxu1 %v9126_v40  ;;  %v9140_v13 = vld [vmem:[#allocation25 + $0x118] sm:$0xff]  ;;  %v9150_v40 = vld [vmem:[#allocation25 + $0x168] sm:$0xff] }
 0x73f   :  { %8272 = vmatmul.msk.bf16.gmra.mxu1 %vm3192_vm2, %v9242_v51  ;;  %8270 = vmatmul.msk.bf16.gmra.mxu0 %vm3192_vm2, %v9243_v14  ;;  %v9124_v51 = vld [vmem:[#allocation25 + $0x98] sm:$0xff]  ;;  %v9131_v14 = vld [vmem:[#allocation25 + $0xd0] sm:$0xff] }
 0x741   :  { %5997 = vmatpush.bf16.msrb.mxu3 %v9109_v46  ;;  %v9141_v46 = vld [vmem:[#allocation25 + $0x120] sm:$0xff] }
 0x742   :  { %6016 = vmatpush.bf16.msrb.mxu0 %v9117_v44  ;;  %6035 = vmatpush.bf16.msrb.mxu1 %v9125_v8 }
 0x745   :  { %5998 = vmatpush.bf16.msrb.mxu3 %v9108_v38  ;;  %v9166_v38 = vld [vmem:[#allocation25 + $0x1e8] sm:$0xff] }
 0x746   :  { %6017 = vmatpush.bf16.msrb.mxu0 %v9116_v54  ;;  %6036 = vmatpush.bf16.msrb.mxu1 %v9124_v51 }
 0x749   :  { %5999 = vmatpush.bf16.msrb.mxu3 %v9107_v36 }
 0x74c   :  { %8273 = vmatmul.msk.bf16.vlgmr.msra.gmra.mxu2 %vm3192_vm2, %v9244_v28  ;;  %8275 = vmatmul.msk.bf16.vlgmr.msra.gmra.mxu3 %vm3192_vm2, %v9245_v3  ;;  %v9105_v28 = vld [vmem:[#allocation25] sm:$0xff]  ;;  %v9115_v3 = vld [vmem:[#allocation25 + $0x50] sm:$0xff] }
 0x74d   :  { %6051 = vmatpush.bf16.msra.mxu2 %v9136_v2  ;;  %6000 = vmatpush.bf16.msrb.mxu3 %v9106_v22  ;;  %v9129_v2 = vld [vmem:[#allocation25 + $0xc0] sm:$0xff] }
 0x74e   :  { %6018 = vmatpush.bf16.msrb.mxu0 %v9115_v3  ;;  %v9165_v22 = vld [vmem:[#allocation25 + $0x1e0] sm:$0xff] }
 0x74f   :  { %8279 = vmatmul.msk.bf16.vlgmr.msra.gmra.mxu1 %vm3192_vm2, %v9246_v49  ;;  %8277 = vmatmul.msk.bf16.vlgmr.msra.gmra.mxu0 %vm3192_vm2, %v9247_v37  ;;  %v9123_v49 = vld [vmem:[#allocation25 + $0x90] sm:$0xff]  ;;  %v9130_v37 = vld [vmem:[#allocation25 + $0xc8] sm:$0xff]  ;;  %v9157_v3 = vld [vmem:[#allocation25 + $0x1a0] sm:$0xff] }
 0x750   :  { %6037 = vmatpush.bf16.msrb.mxu1 %v9123_v49 }
 0x751   :  { %6052 = vmatpush.bf16.msra.mxu2 %v9135_v27  ;;  %6001 = vmatpush.bf16.msrb.mxu3 %v9105_v28  ;;  %v9152_v27 = vld [vmem:[#allocation25 + $0x178] sm:$0xff]  ;;  %v9149_v28 = vld [vmem:[#allocation25 + $0x160] sm:$0xff] }
 0x754   :  { %6038 = vmatpush.bf16.msrb.mxu1 %v9122_v12  ;;  %v9164_v12 = vld [vmem:[#allocation25 + $0x1d8] sm:$0xff] }
 0x755   :  { %6053 = vmatpush.bf16.msra.mxu2 %v9134_v35 }
 0x758   :  { %6039 = vmatpush.bf16.msrb.mxu1 %v9121_v25 }
 0x759   :  { %6054 = vmatpush.bf16.msra.mxu2 %v9133_v62 }
 0x75c   :  { %8274 = vmatmul.msk.bf16.gmra.mxu2 %vm3192_vm2, %v9248_v15  ;;  %8276 = vmatmul.msk.bf16.gmra.mxu3 %vm3192_vm2, %v9249_v63  ;;  %v9114_v15 = vld [vmem:[#allocation25 + $0x48] sm:$0xff]  ;;  %v9144_v63 = vld [vmem:[#allocation25 + $0x138] sm:$0xff] }
 0x75d   :  { %6055 = vmatpush.bf16.msra.mxu2 %v9132_v19  ;;  %6019 = vmatpush.bf16.msrb.mxu0 %v9114_v15  ;;  %v9158_v19 = vld [vmem:[#allocation25 + $0x1a8] sm:$0xff] }
 0x75e   :  { %6070 = vmatpush.bf16.msra.mxu3 %v9144_v63  ;;  %6108 = vmatpush.bf16.msra.mxu1 %v9160_v16 }
 0x75f   :  { %8280 = vmatmul.msk.bf16.gmra.mxu1 %vm3192_vm2, %v9250_v7  ;;  %8278 = vmatmul.msk.bf16.gmra.mxu0 %vm3192_vm2, %v9251_v41  ;;  %v9113_v7 = vld [vmem:[#allocation25 + $0x40] sm:$0xff]  ;;  %v9143_v41 = vld [vmem:[#allocation25 + $0x130] sm:$0xff] }
 0x761   :  { %6056 = vmatpush.bf16.msra.mxu2 %v9131_v14  ;;  %6020 = vmatpush.bf16.msrb.mxu0 %v9113_v7  ;;  %v9139_v14 = vld [vmem:[#allocation25 + $0x110] sm:$0xff] }
 0x762   :  { %6071 = vmatpush.bf16.msra.mxu3 %v9143_v41 }
 0x765   :  { %6057 = vmatpush.bf16.msra.mxu2 %v9130_v37  ;;  %6089 = vmatpush.bf16.msra.mxu0 %v9152_v27 }
 0x766   :  { %6072 = vmatpush.bf16.msra.mxu3 %v9142_v21  ;;  %v9148_v21 = vld [vmem:[#allocation25 + $0x158] sm:$0xff] }
 0x769   :  { %6058 = vmatpush.bf16.msra.mxu2 %v9129_v2 }
 0x76a   :  { %6073 = vmatpush.bf16.msra.mxu3 %v9141_v46 }
 0x76c   :  { %8281 = vmatmul.msk.bf16.vlgmr.msrb.gmra.mxu2 %vm3192_vm2, %v9252_v18  ;;  %v9151_v18 = vld [vmem:[#allocation25 + $0x170] sm:$0xff] }
 0x76d   :  { %6127 = vmatpush.bf16.msrb.mxu2 %v9168_v4  ;;  %6090 = vmatpush.bf16.msra.mxu0 %v9151_v18  ;;  %v9138_v4 = vld [vmem:[#allocation25 + $0x108] sm:$0xff] }
 0x76e   :  { %6074 = vmatpush.bf16.msra.mxu3 %v9140_v13 }
 0x771   :  { %6128 = vmatpush.bf16.msrb.mxu2 %v9167_v23  ;;  %6091 = vmatpush.bf16.msra.mxu0 %v9150_v40 }
 0x772   :  { %6075 = vmatpush.bf16.msra.mxu3 %v9139_v14  ;;  %v9162_v14 = vld [vmem:[#allocation25 + $0x1c8] sm:$0xff] }
 0x775   :  { %6129 = vmatpush.bf16.msrb.mxu2 %v9166_v38  ;;  %6092 = vmatpush.bf16.msra.mxu0 %v9149_v28  ;;  %v9163_v38 = vld [vmem:[#allocation25 + $0x1d0] sm:$0xff]  ;;  %v9146_v28 = vld [vmem:[#allocation25 + $0x148] sm:$0xff] }
 0x776   :  { %6076 = vmatpush.bf16.msra.mxu3 %v9138_v4  ;;  %v9175_v4 = vld [vmem:[#allocation25 + $0x230] sm:$0xff] }
 0x779   :  { %6130 = vmatpush.bf16.msrb.mxu2 %v9165_v22  ;;  %6093 = vmatpush.bf16.msra.mxu0 %v9148_v21 }
 0x77c   :  { %8282 = vmatmul.msk.bf16.gmra.mxu2 %vm3192_vm2, %v9253_v39  ;;  %v9159_v39 = vld [vmem:[#allocation25 + $0x1b0] sm:$0xff] }
 0x77d   :  { %6109 = vmatpush.bf16.msra.mxu1 %v9159_v39  ;;  %6131 = vmatpush.bf16.msrb.mxu2 %v9164_v12  ;;  %v9156_v39 = vld [vmem:[#allocation25 + $0x198] sm:$0xff]  ;;  %v9154_v12 = vld [vmem:[#allocation25 + $0x188] sm:$0xff] }
 0x781   :  { %6110 = vmatpush.bf16.msra.mxu1 %v9158_v19  ;;  %6132 = vmatpush.bf16.msrb.mxu2 %v9163_v38  ;;  %v9147_v19 = vld [vmem:[#allocation25 + $0x150] sm:$0xff]  ;;  %v9174_v38 = vld [vmem:[#allocation25 + $0x228] sm:$0xff] }
 0x782   :  { %6094 = vmatpush.bf16.msra.mxu0 %v9147_v19 }
 0x785   :  { %6111 = vmatpush.bf16.msra.mxu1 %v9157_v3  ;;  %v9176_v3 = vld [vmem:[#allocation25 + $0x238] sm:$0xff]  ;;  %6133 = vmatpush.bf16.msrb.mxu2 %v9162_v14 }
 0x786   :  { %6095 = vmatpush.bf16.msra.mxu0 %v9146_v28 }
 0x789   :  { %6112 = vmatpush.bf16.msra.mxu1 %v9156_v39 }
 0x7ac   :  { %v5177_v20 = vpop.f32.mrf.mxu1  ;;  %v5154_v35 = vpop.f32.mrf.mxu0 }
 0x7ad   :  { %v5187_v36 = vpack.c.bf16 %v5177_v20, %v5177_v20  ;;  %v5164_v8 = vpack.c.bf16 %v5154_v35, %v5154_v35 }
 0x7af   :  { %v5108_v62 = vpop.f32.mrf.mxu2  ;;  %v5131_v44 = vpop.f32.mrf.mxu3  ;;  %v5346_v49 = vunpack.c.l.b16 %v5187_v36  ;;  %v5334_v37 = vunpack.c.l.b16 %v5164_v8  ;;  %v9137_v8 = vld [vmem:[#allocation25 + $0x100] sm:$0xff] }
 0x7b0   :  { %v5141_v2 = vpack.c.bf16 %v5131_v44, %v5131_v44  ;;  %v5118_v25 = vpack.c.bf16 %v5108_v62, %v5108_v62  ;;  %6077 = vmatpush.bf16.msra.mxu3 %v9137_v8 }
 0x7b2   :  { %v5322_v46 = vunpack.c.l.b16 %v5141_v2  ;;  %v5310_v13 = vunpack.c.l.b16 %v5118_v25  ;;  %v9161_v2 = vld [vmem:[#allocation25 + $0x1c0] sm:$0xff] }
 0x7b3   :  { %v9145_v25 = vld [vmem:[#allocation25 + $0x140] sm:$0xff]  ;;  %6134 = vmatpush.bf16.msrb.mxu2 %v9161_v2 }
 0x7b4   :  { %v5179_v54 = vpop.f32.mrf.mxu1  ;;  %v5156_v51 = vpop.f32.mrf.mxu0  ;;  %6096 = vmatpush.bf16.msra.mxu0 %v9145_v25 }
 0x7b5   :  { %v5188_v15 = vpack.c.bf16 %v5179_v54, %v5179_v54  ;;  %v5165_v63 = vpack.c.bf16 %v5156_v51, %v5156_v51  ;;  %v9155_v51 = vld [vmem:[#allocation25 + $0x190] sm:$0xff] }
 0x7b6   :  { %6113 = vmatpush.bf16.msra.mxu1 %v9155_v51 }
 0x7b7   :  { %v5347_v7 = vunpack.c.l.b16 %v5188_v15  ;;  %v5335_v41 = vunpack.c.l.b16 %v5165_v63  ;;  %v5110_v27 = vpop.f32.mrf.mxu2  ;;  %v5133_v23 = vpop.f32.mrf.mxu3 }
 0x7b8   :  { %v5119_v35 = vpack.c.bf16 %v5110_v27, %v5110_v27  ;;  %v5142_v18 = vpack.c.bf16 %v5133_v23, %v5133_v23 }
 0x7b9   :  { %v5350_v16 = vpack.c.b16 %v5347_v7, %v5346_v49  ;;  %v5338_v20 = vpack.c.b16 %v5335_v41, %v5334_v37 }
 0x7ba   :  { %v5311_v40 = vunpack.c.l.b16 %v5119_v35  ;;  %v5323_v62 = vunpack.c.l.b16 %v5142_v18  ;;  %6114 = vmatpush.bf16.msra.mxu1 %v9154_v12 }
 0x7bb   :  { %6059 = vmatmul.bf16.vlgmr.msra.gmra.mxu2 %v5350_v16  ;;  %6040 = vmatmul.bf16.vlgmr.msrb.gmra.mxu1 %v5338_v20  ;;  %v9153_v20 = vld [vmem:[#allocation25 + $0x180] sm:$0xff] }
 0x7bc   :  { %v5182_v36 = vpop.f32.mrf.mxu1  ;;  %v5159_v44 = vpop.f32.mrf.mxu0  ;;  %v5314_v22 = vpack.c.b16 %v5311_v40, %v5310_v13  ;;  %v5326_v54 = vpack.c.b16 %v5323_v62, %v5322_v46 }
 0x7bd   :  { %v5189_v37 = vpack.c.bf16 %v5182_v36, %v5182_v36  ;;  %v5166_v63 = vpack.c.bf16 %v5159_v44, %v5159_v44 }
 0x7be   :  { %6002 = vmatmul.bf16.vlgmr.msrb.gmra.mxu3 %v5314_v22  ;;  %6021 = vmatmul.bf16.vlgmr.msrb.gmra.mxu0 %v5326_v54 }
 0x7bf   :  { %v5113_v49 = vpop.f32.mrf.mxu2  ;;  %v5136_v15 = vpop.f32.mrf.mxu3  ;;  %6146 = vmatpush.bf16.msrb.mxu3 %v9176_v3  ;;  %v5348_v21 = vunpack.c.l.b16 %v5189_v37  ;;  %v5336_v27 = vunpack.c.l.b16 %v5166_v63  ;;  %6115 = vmatpush.bf16.msra.mxu1 %v9153_v20  ;;  %v9173_v3 = vld [vmem:[#allocation25 + $0x220] sm:$0xff] }
 0x7c0   :  { %v5143_v35 = vpack.c.bf16 %v5136_v15, %v5136_v15  ;;  %v5120_v39 = vpack.c.bf16 %v5113_v49, %v5113_v49  ;;  %v9172_v15 = vld [vmem:[#allocation25 + $0x218] sm:$0xff] }
 0x7c2   :  { %v5324_v8 = vunpack.c.l.b16 %v5143_v35  ;;  %v5312_v22 = vunpack.c.l.b16 %v5120_v39  ;;  %v9170_v39 = vld [vmem:[#allocation25 + $0x208] sm:$0xff] }
 0x7c3   :  { %6147 = vmatpush.bf16.msrb.mxu3 %v9175_v4  ;;  %v9171_v4 = vld [vmem:[#allocation25 + $0x210] sm:$0xff] }
 0x7c4   :  { %v5184_v7 = vpop.f32.mrf.mxu1  ;;  %v5161_v41 = vpop.f32.mrf.mxu0 }
 0x7c5   :  { %v5190_v16 = vpack.c.bf16 %v5184_v7, %v5184_v7  ;;  %v5167_v23 = vpack.c.bf16 %v5161_v41, %v5161_v41 }
 0x7c7   :  { %v5349_v46 = vunpack.c.l.b16 %v5190_v16  ;;  %v5337_v18 = vunpack.c.l.b16 %v5167_v23  ;;  %v5115_v13 = vpop.f32.mrf.mxu2  ;;  %v5138_v62 = vpop.f32.mrf.mxu3  ;;  %6148 = vmatpush.bf16.msrb.mxu3 %v9174_v38 }
 0x7c8   :  { %v5121_v44 = vpack.c.bf16 %v5115_v13, %v5115_v13  ;;  %v5144_v19 = vpack.c.bf16 %v5138_v62, %v5138_v62 }
 0x7c9   :  { %v5351_v40 = vpack.c.b16 %v5349_v46, %v5348_v21  ;;  %v5339_v36 = vpack.c.b16 %v5337_v18, %v5336_v27 }
 0x7ca   :  { %v5313_v54 = vunpack.c.l.b16 %v5121_v44  ;;  %v5325_v51 = vunpack.c.l.b16 %v5144_v19 }
 0x7cb   :  { %6064 = vmatmul.bf16.gmra.mxu2 %v5351_v40  ;;  %6045 = vmatmul.bf16.gmra.mxu1 %v5339_v36 }
 0x7cc   :  { %v5269_v14 = vpop.f32.mrf.mxu1  ;;  %v5246_v28 = vpop.f32.mrf.mxu0  ;;  %v5315_v37 = vpack.c.b16 %v5313_v54, %v5312_v22  ;;  %v5327_v49 = vpack.c.b16 %v5325_v51, %v5324_v8  ;;  %6149 = vmatpush.bf16.msrb.mxu3 %v9173_v3 }
 0x7cd   :  { %v5279_v12 = vpack.c.bf16 %v5269_v14, %v5269_v14  ;;  %v5256_v7 = vpack.c.bf16 %v5246_v28, %v5246_v28  ;;  %v9169_v28 = vld [vmem:[#allocation25 + $0x200] sm:$0xff] }
 0x7ce   :  { %6007 = vmatmul.bf16.gmra.mxu3 %v5315_v37  ;;  %6026 = vmatmul.bf16.gmra.mxu0 %v5327_v49 }
 0x7cf   :  { %v5200_v63 = vpop.f32.mrf.mxu2  ;;  %v5223_v2 = vpop.f32.mrf.mxu3  ;;  %v5394_v21 = vunpack.c.l.b16 %v5279_v12  ;;  %v5382_v27 = vunpack.c.l.b16 %v5256_v7 }
 0x7d0   :  { %6150 = vmatpush.bf16.msrb.mxu3 %v9172_v15  ;;  %v5233_v20 = vpack.c.bf16 %v5223_v2, %v5223_v2  ;;  %v5210_v18 = vpack.c.bf16 %v5200_v63, %v5200_v63 }
 0x7d2   :  { %v5370_v44 = vunpack.c.l.b16 %v5233_v20  ;;  %v5358_v19 = vunpack.c.l.b16 %v5210_v18 }
 0x7d4   :  { %v5271_v41 = vpop.f32.mrf.mxu1  ;;  %v5248_v25 = vpop.f32.mrf.mxu0  ;;  %6151 = vmatpush.bf16.msrb.mxu3 %v9171_v4 }
 0x7d5   :  { %v5280_v16 = vpack.c.bf16 %v5271_v41, %v5271_v41  ;;  %v5257_v23 = vpack.c.bf16 %v5248_v25, %v5248_v25 }
 0x7d7   :  { %v5395_v35 = vunpack.c.l.b16 %v5280_v16  ;;  %v5383_v46 = vunpack.c.l.b16 %v5257_v23  ;;  %v5202_v38 = vpop.f32.mrf.mxu2  ;;  %v5225_v40 = vpop.f32.mrf.mxu3 }
 0x7d8   :  { %v5211_v36 = vpack.c.bf16 %v5202_v38, %v5202_v38  ;;  %v5234_v8 = vpack.c.bf16 %v5225_v40, %v5225_v40  ;;  %6152 = vmatpush.bf16.msrb.mxu3 %v9170_v39 }
 0x7d9   :  { %v5398_v13 = vpack.c.b16 %v5395_v35, %v5394_v21  ;;  %v5386_v62 = vpack.c.b16 %v5383_v46, %v5382_v27 }
 0x7da   :  { %v5359_v22 = vunpack.c.l.b16 %v5211_v36  ;;  %v5371_v54 = vunpack.c.l.b16 %v5234_v8 }
 0x7db   :  { %6135 = vmatmul.bf16.vlgmr.msrb.gmra.mxu2 %v5398_v13  ;;  %6116 = vmatmul.bf16.vlgmr.msra.gmra.mxu1 %v5386_v62 }
 0x7dc   :  { %v5274_v51 = vpop.f32.mrf.mxu1  ;;  %v5251_v14 = vpop.f32.mrf.mxu0  ;;  %v5362_v3 = vpack.c.b16 %v5359_v22, %v5358_v19  ;;  %v5374_v37 = vpack.c.b16 %v5371_v54, %v5370_v44  ;;  %6153 = vmatpush.bf16.msrb.mxu3 %v9169_v28 }
 0x7dd   :  { %v5281_v15 = vpack.c.bf16 %v5274_v51, %v5274_v51  ;;  %v5258_v12 = vpack.c.bf16 %v5251_v14, %v5251_v14 }
 0x7de   :  { %6078 = vmatmul.bf16.vlgmr.msra.gmra.mxu3 %v5362_v3  ;;  %6097 = vmatmul.bf16.vlgmr.msra.gmra.mxu0 %v5374_v37 }
 0x7df   :  { %v5205_v49 = vpop.f32.mrf.mxu2  ;;  %v5228_v63 = vpop.f32.mrf.mxu3  ;;  %v5396_v41 = vunpack.c.l.b16 %v5281_v15  ;;  %v5384_v25 = vunpack.c.l.b16 %v5258_v12 }
 0x7e0   :  { %v5235_v27 = vpack.c.bf16 %v5228_v63, %v5228_v63  ;;  %v5212_v20 = vpack.c.bf16 %v5205_v49, %v5205_v49 }
 0x7e2   :  { %v5372_v13 = vunpack.c.l.b16 %v5235_v27  ;;  %v5360_v62 = vunpack.c.l.b16 %v5212_v20  ;;  %v9207_v20 = vld [vmem:[#allocation26 + $0xec] sm:$0xf0] }
 0x7e4   :  { %v5276_v2 = vpop.f32.mrf.mxu1  ;;  %v5253_v7 = vpop.f32.mrf.mxu0 }
 0x7e5   :  { %v5282_v4 = vpack.c.bf16 %v5276_v2, %v5276_v2  ;;  %v5259_v21 = vpack.c.bf16 %v5253_v7, %v5253_v7 }
 0x7e7   :  { %v5397_v16 = vunpack.c.l.b16 %v5282_v4  ;;  %v5385_v23 = vunpack.c.l.b16 %v5259_v21  ;;  %v5207_v35 = vpop.f32.mrf.mxu2  ;;  %v5230_v18 = vpop.f32.mrf.mxu3 }
 0x7e8   :  { %v5213_v38 = vpack.c.bf16 %v5207_v35, %v5207_v35  ;;  %v5236_v40 = vpack.c.bf16 %v5230_v18, %v5230_v18  ;;  %v9205_v35 = vld [vmem:[#allocation26 + $0xe4] sm:$0xf]  ;;  %v8687_v18 = vld [vmem:[#allocation26 + $0xf0] sm:$0xf0] }
 0x7e9   :  { %v5399_v46 = vpack.c.b16 %v5397_v16, %v5396_v41  ;;  %v5387_v39 = vpack.c.b16 %v5385_v23, %v5384_v25  ;;  %v8685_v23 = vld [vmem:[#allocation26 + $0xe0] sm:$0xf] }
 0x7ea   :  { %v5361_v36 = vunpack.c.l.b16 %v5213_v38  ;;  %v5373_v44 = vunpack.c.l.b16 %v5236_v40  ;;  %v9208_v38 = vld [vmem:[#allocation26 + $0xf4] sm:$0xf0] }
 0x7eb   :  { %6140 = vmatmul.bf16.gmra.mxu2 %v5399_v46  ;;  %6121 = vmatmul.bf16.gmra.mxu1 %v5387_v39  ;;  %v8686_v46 = vor.u32 %v9207_v20, %v8685_v23  ;;  %v8693_v39 = vld [vmem:[#allocation26 + $0xe8] sm:$0xf]  ;;  %v9199_v23 = vld [vmem:[#allocation26 + $0xac] sm:$0xf0]  ;;  %v9197_v20 = vld [vmem:[#allocation26 + $0xa4] sm:$0xf] }
 0x7ec   :  { %v5363_v8 = vpack.c.b16 %v5361_v36, %v5360_v62  ;;  %v5375_v19 = vpack.c.b16 %v5373_v44, %v5372_v13  ;;  %v8690_v62 = vor.u32 %v9205_v35, %v8687_v18  ;;  %v8694_v36 = vor.u32 %v9208_v38, %v8693_v39  ;;  %v9206_v44 = vld [vmem:[#allocation26 + $0xec] sm:$0xf]  ;;  %v8661_v18 = vld [vmem:[#allocation26 + $0xa8] sm:$0xf]  ;;  %v9200_v39 = vld [vmem:[#allocation26 + $0xb4] sm:$0xf0] }
 0x7ed   :  { %6373 = vmatpush.bf16.msrb.mxu0 %v8686_v46  ;;  %v8655_v46 = vld [vmem:[#allocation26 + $0xb0] sm:$0xf0] }
 0x7ee   :  { %6083 = vmatmul.bf16.gmra.mxu3 %v5363_v8  ;;  %6102 = vmatmul.bf16.gmra.mxu0 %v5375_v19  ;;  %v8695_v8 = vld [vmem:[#allocation26 + $0xf8] sm:$0xf0] }
 0x7ef   :  { %v5292_v22 = vpop.f32.mrf.mxu2  ;;  %v8698_v19 = vor.u32 %v9206_v44, %v8695_v8  ;;  %6392 = vmatpush.bf16.msrb.mxu1 %v8690_v62  ;;  %6411 = vmatpush.bf16.msra.mxu2 %v8694_v36  ;;  %v8658_v36 = vor.u32 %v9197_v20, %v8655_v46  ;;  %v8662_v44 = vor.u32 %v9200_v39, %v8661_v18  ;;  %v9198_v8 = vld [vmem:[#allocation26 + $0xac] sm:$0xf]  ;;  %v9191_v46 = vld [vmem:[#allocation26 + $0x6c] sm:$0xf0]  ;;  %v9189_v18 = vld [vmem:[#allocation26 + $0x64] sm:$0xf] }
 0x7f0   :  { %v5302_v54 = vpack.c.bf16 %v5292_v22, %v5292_v22  ;;  %v8669_v22 = vld [vmem:[#allocation26 + $0xc0] sm:$0xf] }
 0x7f1   :  { %6430 = vmatpush.bf16.msra.mxu3 %v8698_v19  ;;  %v8663_v19 = vld [vmem:[#allocation26 + $0xb8] sm:$0xf0] }
 0x7f2   :  { %v5406_v28 = vunpack.c.l.b16 %v5302_v54  ;;  %v9203_v54 = vld [vmem:[#allocation26 + $0xcc] sm:$0xf0] }
 0x7f7   :  { %v5294_v51 = vpop.f32.mrf.mxu2 }
 0x7f8   :  { %v5303_v14 = vpack.c.bf16 %v5294_v51, %v5294_v51  ;;  %v9201_v51 = vld [vmem:[#allocation26 + $0xc4] sm:$0xf] }
 0x7fa   :  { %v5407_v3 = vunpack.c.l.b16 %v5303_v14  ;;  %v8670_v14 = vor.u32 %v9203_v54, %v8669_v22  ;;  %v8666_v22 = vor.u32 %v9198_v8, %v8663_v19  ;;  %v9192_v8 = vld [vmem:[#allocation26 + $0x74] sm:$0xf0] }
 0x7fc   :  { %v5410_v37 = vpack.c.b16 %v5407_v3, %v5406_v28  ;;  %v8671_v28 = vld [vmem:[#allocation26 + $0xd0] sm:$0xf0]  ;;  %v8677_v3 = vld [vmem:[#allocation26 + $0xc8] sm:$0xf]  ;;  %6374 = vmatpush.bf16.msrb.mxu0 %v8670_v14  ;;  %v9195_v14 = vld [vmem:[#allocation26 + $0x8c] sm:$0xf0] }
 0x7fe   :  { %6154 = vmatmul.bf16.vlgmr.msrb.gmra.mxu3 %v5410_v37  ;;  %v9204_v37 = vld [vmem:[#allocation26 + $0xd4] sm:$0xf0] }
 0x7ff   :  { %v5297_v49 = vpop.f32.mrf.mxu2 }
 0x800   :  { %v5304_v15 = vpack.c.bf16 %v5297_v49, %v5297_v49 }
 0x802   :  { %v5408_v2 = vunpack.c.l.b16 %v5304_v15  ;;  %v8674_v15 = vor.u32 %v9201_v51, %v8671_v28  ;;  %v8637_v51 = vld [vmem:[#allocation26 + $0x80] sm:$0xf]  ;;  %v9193_v28 = vld [vmem:[#allocation26 + $0x84] sm:$0xf] }
 0x804   :  { %6393 = vmatpush.bf16.msrb.mxu1 %v8674_v15  ;;  %v8645_v15 = vld [vmem:[#allocation26 + $0x88] sm:$0xf] }
 0x807   :  { %v5299_v63 = vpop.f32.mrf.mxu2 }
 0x808   :  { %v5305_v12 = vpack.c.bf16 %v5299_v63, %v5299_v63  ;;  %v8678_v63 = vor.u32 %v9204_v37, %v8677_v3  ;;  %6394 = vmatpush.bf16.msrb.mxu1 %v8658_v36  ;;  %v8638_v3 = vor.u32 %v9195_v14, %v8637_v51  ;;  %v8639_v37 = vld [vmem:[#allocation26 + $0x90] sm:$0xf0]  ;;  %v9190_v14 = vld [vmem:[#allocation26 + $0x6c] sm:$0xf] }
 0x809   :  { %v8623_v36 = vld [vmem:[#allocation26 + $0x70] sm:$0xf0] }
 0x80a   :  { %v5409_v7 = vunpack.c.l.b16 %v5305_v12  ;;  %v9202_v12 = vld [vmem:[#allocation26 + $0xcc] sm:$0xf]  ;;  %6412 = vmatpush.bf16.msra.mxu2 %v8678_v63  ;;  %v9196_v63 = vld [vmem:[#allocation26 + $0x94] sm:$0xf0] }
 0x80c   :  { %v5411_v41 = vpack.c.b16 %v5409_v7, %v5408_v2  ;;  %v8679_v2 = vld [vmem:[#allocation26 + $0xd8] sm:$0xf0] }
 0x80d   :  { %v8682_v7 = vor.u32 %v9202_v12, %v8679_v2  ;;  %v8642_v12 = vor.u32 %v9193_v28, %v8639_v37  ;;  %v8646_v2 = vor.u32 %v9196_v63, %v8645_v15  ;;  %v8631_v28 = vld [vmem:[#allocation26 + $0x78] sm:$0xf0]  ;;  %v8605_v15 = vld [vmem:[#allocation26 + $0x40] sm:$0xf]  ;;  %v9187_v63 = vld [vmem:[#allocation26 + $0x4c] sm:$0xf0] }
 0x80e   :  { %6159 = vmatmul.bf16.gmra.mxu3 %v5411_v41  ;;  %v8653_v41 = vld [vmem:[#allocation26 + $0xa0] sm:$0xf]  ;;  %6413 = vmatpush.bf16.msra.mxu2 %v8662_v44  ;;  %v8629_v44 = vld [vmem:[#allocation26 + $0x68] sm:$0xf] }
 0x80f   :  { %6431 = vmatpush.bf16.msra.mxu3 %v8682_v7  ;;  %v8654_v35 = vor.u32 %v9199_v23, %v8653_v41  ;;  %v9194_v7 = vld [vmem:[#allocation26 + $0x8c] sm:$0xf]  ;;  %v8647_v41 = vld [vmem:[#allocation26 + $0x98] sm:$0xf0]  ;;  %6395 = vmatpush.bf16.msrb.mxu1 %v8642_v12  ;;  %v8630_v51 = vor.u32 %v9192_v8, %v8629_v44  ;;  %v9185_v12 = vld [vmem:[#allocation26 + $0x44] sm:$0xf] }
 0x810   :  { %v8650_v23 = vor.u32 %v9194_v7, %v8647_v41  ;;  %v8607_v7 = vld [vmem:[#allocation26 + $0x50] sm:$0xf0]  ;;  %v8613_v41 = vld [vmem:[#allocation26 + $0x48] sm:$0xf]  ;;  %v8615_v44 = vld [vmem:[#allocation26 + $0x58] sm:$0xf0] }
 0x811   :  { %6375 = vmatpush.bf16.msrb.mxu0 %v8654_v35  ;;  %v8621_v35 = vld [vmem:[#allocation26 + $0x60] sm:$0xf] }
 0x812   :  { %6414 = vmatpush.bf16.msra.mxu2 %v8646_v2  ;;  %v8622_v39 = vor.u32 %v9191_v46, %v8621_v35  ;;  %v8606_v2 = vor.u32 %v9187_v63, %v8605_v15  ;;  %v8610_v46 = vor.u32 %v9185_v12, %v8607_v7  ;;  %v8597_v15 = vld [vmem:[#allocation26 + $0x28] sm:$0xf]  ;;  %v9184_v63 = vld [vmem:[#allocation26 + $0x34] sm:$0xf0] }
 0x813   :  { %6432 = vmatpush.bf16.msra.mxu3 %v8666_v22  ;;  %v8626_v22 = vor.u32 %v9189_v18, %v8623_v36  ;;  %v9186_v36 = vld [vmem:[#allocation26 + $0x4c] sm:$0xf] }
 0x814   :  { %v8618_v8 = vor.u32 %v9186_v36, %v8615_v44 }
 0x815   :  { %6376 = vmatpush.bf16.msrb.mxu0 %v8638_v3  ;;  %v8634_v3 = vor.u32 %v9190_v14, %v8631_v28  ;;  %6396 = vmatpush.bf16.msrb.mxu1 %v8626_v22  ;;  %v8589_v22 = vld [vmem:[#allocation26 + $0x20] sm:$0xf]  ;;  %v9181_v14 = vld [vmem:[#allocation26 + $0x24] sm:$0xf] }
 0x816   :  { %6415 = vmatpush.bf16.msra.mxu2 %v8630_v51  ;;  %v9183_v51 = vld [vmem:[#allocation26 + $0x2c] sm:$0xf0] }
 0x817   :  { %6433 = vmatpush.bf16.msra.mxu3 %v8650_v23  ;;  %v9188_v23 = vld [vmem:[#allocation26 + $0x54] sm:$0xf0]  ;;  %v8590_v28 = vor.u32 %v9183_v51, %v8589_v22  ;;  %v8581_v22 = vld [vmem:[#allocation26 + $0x8] sm:$0xf] }
 0x818   :  { %v8614_v18 = vor.u32 %v9188_v23, %v8613_v41  ;;  %v8598_v23 = vor.u32 %v9184_v63, %v8597_v15  ;;  %v9180_v51 = vld [vmem:[#allocation26 + $0x14] sm:$0xf0]  ;;  %v8583_v15 = vld [vmem:[#allocation26 + $0x18] sm:$0xf0] }
 0x819   :  { %6377 = vmatpush.bf16.msrb.mxu0 %v8622_v39  ;;  %v9235_v39 = vld [vmem:[%s11039_s22] ss:$0 sm:$0xff]  ;;  %6397 = vmatpush.bf16.msrb.mxu1 %v8610_v46 }
 0x81a   :  { %6416 = vmatpush.bf16.msra.mxu2 %v8614_v18  ;;  %v9179_v46 = vld [vmem:[#allocation26 + $0xc] sm:$0xf0]  ;;  %v9177_v18 = vld [vmem:[#allocation26 + $0x4] sm:$0xf] }
 0x81b   :  { %6434 = vmatpush.bf16.msra.mxu3 %v8634_v3  ;;  %v8591_v3 = vld [vmem:[#allocation26 + $0x30] sm:$0xf0] }
 0x81c   :  { %v8594_v41 = vor.u32 %v9181_v14, %v8591_v3  ;;  %v8582_v14 = vor.u32 %v9180_v51, %v8581_v22  ;;  %v9178_v3 = vld [vmem:[#allocation26 + $0xc] sm:$0xf] }
 0x81d   :  { %6378 = vmatpush.bf16.msrb.mxu0 %v8606_v2  ;;  %v8573_v2 = vld [vmem:[#allocation26] sm:$0xf]  ;;  %v8586_v6 = vor.u32 %v9178_v3, %v8583_v15 }
 0x81e   :  { %6398 = vmatpush.bf16.msrb.mxu1 %v8594_v41  ;;  %6417 = vmatpush.bf16.msra.mxu2 %v8598_v23  ;;  %v8574_v44 = vor.u32 %v9179_v46, %v8573_v2 }
 0x81f   :  { %6435 = vmatpush.bf16.msra.mxu3 %v8618_v8  ;;  %v8575_v8 = vld [vmem:[#allocation26 + $0x10] sm:$0xf0] }
 0x820   :  { %v8578_v32 = vor.u32 %v9177_v18, %v8575_v8 }
 0x821   :  { %6379 = vmatpush.bf16.msrb.mxu0 %v8590_v28 }
 0x822   :  { %6399 = vmatpush.bf16.msrb.mxu1 %v8578_v32  ;;  %6418 = vmatpush.bf16.msra.mxu2 %v8582_v14 }
 0x823   :  { %6436 = vmatpush.bf16.msra.mxu3 %v8602_v17 }
 0x825   :  { %6380 = vmatpush.bf16.msrb.mxu0 %v8574_v44 }
 0x827   :  { %6437 = vmatpush.bf16.msra.mxu3 %v8586_v6 }
 0x838   :  { %v10930_v27 = vpop.f32.mrf.mxu1 }
 0x83b   :  { %v10926_v4 = vpop.f32.mrf.mxu0 }
 0x83e   :  { %v10932_v16 = vpop.f32.mrf.mxu2 }
 0x840   :  { %v10938_v49 = vpop.f32.mrf.mxu1 }
 0x841   :  { %v10924_v25 = vpop.f32.mrf.mxu3 }
 0x842   :  { %v6004_v36 = vadd.f32 %v9235_v39, %v10924_v25 }
 0x843   :  { %v10934_v13 = vpop.f32.mrf.mxu0 }
 0x844   :  { %v6023_v63 = vadd.f32 %v10926_v4, %v6004_v36 }
 0x846   :  { %v10940_v38 = vpop.f32.mrf.mxu2  ;;  %v6042_v23 = vadd.f32 %v10930_v27, %v6023_v63 }
 0x848   :  { %v10946_v20 = vpop.f32.mrf.mxu1  ;;  %v6061_v18 = vadd.f32 %v10932_v16, %v6042_v23 }
 0x849   :  { %v10928_v21 = vpop.f32.mrf.mxu3 }
 0x84a   :  { %v6006_v28 = vadd.f32 %v9235_v39, %v10928_v21 }
 0x84b   :  { %v10944_v54 = vpop.f32.mrf.mxu0 }
 0x84c   :  { %v6025_v25 = vadd.f32 %v10934_v13, %v6006_v28 }
 0x84e   :  { %v10950_v37 = vpop.f32.mrf.mxu2  ;;  %v6044_v2 = vadd.f32 %v10938_v49, %v6025_v25 }
 0x850   :  { %v6048_v12 = vpop.f32.mrf.mxu1  ;;  %v6063_v8 = vadd.f32 %v10940_v38, %v6044_v2 }
 0x851   :  { %v10936_v40 = vpop.f32.mrf.mxu3 }
 0x852   :  { %v6009_v4 = vadd.f32 %v9235_v39, %v10936_v40 }
 0x853   :  { %v10952_v35 = vpop.f32.mrf.mxu0 }
 0x854   :  { %v6028_v27 = vadd.f32 %v10944_v54, %v6009_v4 }
 0x856   :  { %v6067_v47 = vpop.f32.mrf.mxu2  ;;  %v6047_v38 = vadd.f32 %v10946_v20, %v6028_v27 }
 0x858   :  { %v6117_v41 = vpop.f32.mrf.mxu1 }
 0x859   :  { %v10942_v62 = vpop.f32.mrf.mxu3 }
 0x85a   :  { %v6011_v13 = vadd.f32 %v9235_v39, %v10942_v62 }
 0x85b   :  { %v6098_v42 = vpop.f32.mrf.mxu0 }
 0x85c   :  { %v6030_v16 = vadd.f32 %v10952_v35, %v6011_v13 }
 0x85e   :  { %v6136_v46 = vpop.f32.mrf.mxu2 }
 0x860   :  { %v6119_v22 = vpop.f32.mrf.mxu1 }
 0x861   :  { %v10948_v19 = vpop.f32.mrf.mxu3 }
 0x862   :  { %v6080_v32 = vadd.f32 %v10948_v19, %v6061_v18  ;;  %v6049_v19 = vadd.f32 %v6048_v12, %v6030_v16 }
 0x863   :  { %v6100_v21 = vpop.f32.mrf.mxu0 }
 0x864   :  { %v6099_v51 = vadd.f32 %v6098_v42, %v6080_v32  ;;  %v6068_v42 = vadd.f32 %v6067_v47, %v6049_v19 }
 0x866   :  { %v6138_v49 = vpop.f32.mrf.mxu2  ;;  %v6118_v15 = vadd.f32 %v6117_v41, %v6099_v51 }
 0x868   :  { %v6137_v63 = vadd.f32 %v6136_v46, %v6118_v15  ;;  %v6122_v40 = vpop.f32.mrf.mxu1 }
 0x869   :  { %v6081_v7 = vpop.f32.mrf.mxu3 }
 0x86a   :  { %v6082_v36 = vadd.f32 %v6081_v7, %v6063_v8  ;;  %v6066_v7 = vadd.f32 %v10950_v37, %v6047_v38 }
 0x86b   :  { %v6103_v28 = vpop.f32.mrf.mxu0 }
 0x86c   :  { %v6101_v14 = vadd.f32 %v6100_v21, %v6082_v36 }
 0x86e   :  { %v6120_v6 = vadd.f32 %v6119_v22, %v6101_v14  ;;  %v6141_v2 = vpop.f32.mrf.mxu2 }
 0x870   :  { %v6139_v25 = vadd.f32 %v6138_v49, %v6120_v6  ;;  %v6124_v12 = vpop.f32.mrf.mxu1 }
 0x871   :  { %v6084_v17 = vpop.f32.mrf.mxu3 }
 0x872   :  { %v6085_v54 = vadd.f32 %v6084_v17, %v6066_v7 }
 0x873   :  { %v6105_v41 = vpop.f32.mrf.mxu0 }
 0x874   :  { %v6104_v8 = vadd.f32 %v6103_v28, %v6085_v54 }
 0x876   :  { %v6123_v46 = vadd.f32 %v6122_v40, %v6104_v8  ;;  %v6143_v36 = vpop.f32.mrf.mxu2 }
 0x878   :  { %v6142_v47 = vadd.f32 %v6141_v2, %v6123_v46 }
 0x879   :  { %v6086_v44 = vpop.f32.mrf.mxu3 }
 0x87a   :  { %v6087_v18 = vadd.f32 %v6086_v44, %v6068_v42 }
 0x87c   :  { %v6106_v20 = vadd.f32 %v6105_v41, %v6087_v18 }
 0x87e   :  { %v6125_v4 = vadd.f32 %v6124_v12, %v6106_v20 }
 0x880   :  { %v6144_v17 = vadd.f32 %v6143_v36, %v6125_v4 }
 0x881   :  { %v6155_v3 = vpop.f32.mrf.mxu3 }
 0x882   :  { %v6156_v62 = vadd.f32 %v6155_v3, %v6137_v63  ;;  %v6203_v63 = vld [vmem:[%s11041_s24] sm:$0xf] }
 0x883   :  { %v6207_v46 = vperm.slane %v6203_v63, 2  ;;  %v6208_v4 = vperm.slane %v6203_v63, 3 }
 0x884   :  { %v6165_v21 = vmax.f32 %v6156_v62, 0.0  ;;  %v6206_v62 = vperm.slane %v6203_v63, 1 }
 0x889   :  { %v6157_v39 = vpop.f32.mrf.mxu3 }
 0x88a   :  { %v6158_v23 = vadd.f32 %v6157_v39, %v6139_v25  ;;  %v6205_v25 = vperm.slane %v6203_v63, 0 }
 0x88c   :  { %v6166_v35 = vmax.f32 %v6158_v23, 0.0 }
 0x88e   :  { %v6169_v32 = vpack.c.bf16 %v6166_v35, %v6165_v21 }
 0x890   :  { %6381 = vmatmul.bf16.vlgmr.msrb.gmra.mxu0 %v6169_v32  ;;  %6400 = vmatmul.bf16.vlgmr.msrb.gmra.mxu1 %v6169_v32 }
 0x891   :  { %6419 = vmatmul.bf16.vlgmr.msra.gmra.mxu2 %v6169_v32  ;;  %6438 = vmatmul.bf16.vlgmr.msra.gmra.mxu3 %v6169_v32  ;;  %v6160_v37 = vpop.f32.mrf.mxu3 }
 0x892   :  { %v6161_v22 = vadd.f32 %v6160_v37, %v6142_v47 }
 0x894   :  { %v6167_v51 = vmax.f32 %v6161_v22, 0.0 }
 0x899   :  { %v6162_v13 = vpop.f32.mrf.mxu3 }
 0x89a   :  { %v6163_v44 = vadd.f32 %v6162_v13, %v6144_v17 }
 0x89c   :  { %v6168_v27 = vmax.f32 %v6163_v44, 0.0 }
 0x89e   :  { %v6170_v14 = vpack.c.bf16 %v6168_v27, %v6167_v51 }
 0x8a0   :  { %6386 = vmatmul.bf16.gmra.mxu0 %v6170_v14  ;;  %6405 = vmatmul.bf16.gmra.mxu1 %v6170_v14 }
 0x8a1   :  { %6424 = vmatmul.bf16.gmra.mxu2 %v6170_v14  ;;  %6443 = vmatmul.bf16.gmra.mxu3 %v6170_v14 }
 0x90d   :  { %v6382_v49 = vpop.f32.mrf.mxu0  ;;  %v6401_v3 = vpop.f32.mrf.mxu1 }
 0x90e   :  { %v6383_v21 = vadd.f32 %v6382_v49, %v6205_v25  ;;  %v6402_v35 = vadd.f32 %v6401_v3, %v6206_v62 }
 0x910   :  { %v6449_v48 = vadd.f32 %v6383_v21, %v4733_v50 }
 0x912   :  { %v6465_v3 = vmax.f32 %v6449_v48, 0.0 }
 0x914   :  { %v6420_v16 = vpop.f32.mrf.mxu2  ;;  %v6439_v15 = vpop.f32.mrf.mxu3 }
 0x915   :  { %v6384_v28 = vpop.f32.mrf.mxu0  ;;  %v6403_v38 = vpop.f32.mrf.mxu1  ;;  %v6421_v60 = vadd.f32 %v6420_v16, %v6207_v46  ;;  %v11084_v16 = vmax.f32 %v10804_v59, 0.0 }
 0x916   :  { %v6385_v54 = vadd.f32 %v6384_v28, %v6205_v25  ;;  %v6404_v23 = vadd.f32 %v6403_v38, %v6206_v62  ;;  %v11085_v38 = vmax.f32 %v10808_v57, 0.0 }
 0x918   :  { %v6453_v36 = vadd.f32 %v6385_v54, %v4737_v56  ;;  %v6454_v47 = vadd.f32 %v6404_v23, %v4738_v33  ;;  %v6440_v33 = vadd.f32 %v6439_v15, %v6208_v4 }
 0x91a   :  { %v6470_v27 = vmax.f32 %v6454_v47, 0.0 }
 0x91c   :  { %v6422_v6 = vpop.f32.mrf.mxu2  ;;  %v6441_v19 = vpop.f32.mrf.mxu3 }
 0x91d   :  { %v6387_v40 = vpop.f32.mrf.mxu0  ;;  %v6406_v7 = vpop.f32.mrf.mxu1  ;;  %v6423_v51 = vadd.f32 %v6422_v6, %v6207_v46  ;;  %v6442_v11 = vadd.f32 %v6441_v19, %v6208_v4  ;;  %v11086_v19 = vmax.f32 %v10860_v61, 0.0 }
 0x91e   :  { %v6388_v39 = vadd.f32 %v6387_v40, %v6205_v25  ;;  %v6407_v42 = vadd.f32 %v6406_v7, %v6206_v62  ;;  %v11089_v40 = vmax.f32 %v10800_v34, 0.0 }
 0x91f   :  { %v6455_v15 = vadd.f32 %v6423_v51, %v11084_v16  ;;  %v6456_v6 = vadd.f32 %v6442_v11, %v11085_v38 }
 0x920   :  { %v6457_v32 = vadd.f32 %v6388_v39, %v4741_v45  ;;  %v6458_v20 = vadd.f32 %v6407_v42, %v4742_v24  ;;  %v6450_v45 = vadd.f32 %v6402_v35, %v4734_v10  ;;  %v6452_v7 = vadd.f32 %v6440_v33, %v11089_v40 }
 0x921   :  { %v6471_v57 = vmax.f32 %v6455_v15, 0.0  ;;  %v6472_v61 = vmax.f32 %v6456_v6, 0.0 }
 0x922   :  { %v6473_v13 = vmax.f32 %v6457_v32, 0.0  ;;  %v6474_v26 = vmax.f32 %v6458_v20, 0.0  ;;  %v6466_v28 = vmax.f32 %v6450_v45, 0.0 }
 0x924   :  { %v6425_v2 = vpop.f32.mrf.mxu2  ;;  %v6444_v18 = vpop.f32.mrf.mxu3 }
 0x925   :  { %v6389_v41 = vpop.f32.mrf.mxu0  ;;  %v6408_v8 = vpop.f32.mrf.mxu1  ;;  %v6426_v24 = vadd.f32 %v6425_v2, %v6207_v46  ;;  %v6445_v22 = vadd.f32 %v6444_v18, %v6208_v4  ;;  %v6468_v18 = vmax.f32 %v6452_v7, 0.0 }
 0x926   :  { %v6390_v12 = vadd.f32 %v6389_v41, %v6205_v25  ;;  %v6409_v37 = vadd.f32 %v6408_v8, %v6206_v62  ;;  %v6483_v62 = vpack.c.bf16 %v6470_v27, %v6466_v28 }
 0x927   :  { %v6459_v9 = vadd.f32 %v6426_v24, %v4743_v30  ;;  %v6460_v50 = vadd.f32 %v6445_v22, %v4744_v5  ;;  %v6451_v5 = vadd.f32 %v6421_v60, %v11088_v55  ;;  %v6485_v21 = vpack.c.bf16 %v6472_v61, %v6468_v18 }
 0x928   :  { %v6461_v17 = vadd.f32 %v6390_v12, %v4745_v53  ;;  %v6462_v43 = vadd.f32 %v6409_v37, %v4746_v52  ;;  %v6469_v53 = vmax.f32 %v6453_v36, 0.0 }
 0x929   :  { %v6475_v39 = vmax.f32 %v6459_v9, 0.0  ;;  %v6476_v59 = vmax.f32 %v6460_v50, 0.0  ;;  %v6467_v1 = vmax.f32 %v6451_v5, 0.0 }
 0x92a   :  { %v6477_v56 = vmax.f32 %v6461_v17, 0.0  ;;  %v6478_v44 = vmax.f32 %v6462_v43, 0.0  ;;  %v6482_v25 = vpack.c.bf16 %v6469_v53, %v6465_v3 }
 0x92b   :  { %v6484_v34 = vpack.c.bf16 %v6471_v57, %v6467_v1 }
 0x92c   :  { %v6486_v0 = vpack.c.bf16 %v6477_v56, %v6473_v13  ;;  %v6487_v52 = vpack.c.bf16 %v6478_v44, %v6474_v26  ;;  %v6427_v14 = vpop.f32.mrf.mxu2  ;;  %v6446_v31 = vpop.f32.mrf.mxu3 }
 0x92d   :  { %v6428_v10 = vadd.f32 %v6427_v14, %v6207_v46  ;;  %v6447_v49 = vadd.f32 %v6446_v31, %v6208_v4 }
 0x92e   :  { %6499 = vmatpush.bf16.msra.mxu0 %v6486_v0  ;;  %6512 = vmatpush.bf16.msra.mxu1 %v6487_v52 }
 0x92f   :  { %v6463_v63 = vadd.f32 %v6428_v10, %v11086_v19  ;;  %v6464_v30 = vadd.f32 %v6447_v49, %v11087_v29 }
 0x931   :  { %v6479_v42 = vmax.f32 %v6463_v63, 0.0  ;;  %v6480_v54 = vmax.f32 %v6464_v30, 0.0 }
 0x932   :  { %6500 = vmatpush.bf16.msra.mxu0 %v6482_v25  ;;  %6513 = vmatpush.bf16.msra.mxu1 %v6483_v62 }
 0x933   :  { %v6488_v23 = vpack.c.bf16 %v6479_v42, %v6475_v39  ;;  %v6489_v2 = vpack.c.bf16 %v6480_v54, %v6476_v59 }
 0x935   :  { %6525 = vmatpush.bf16.msrb.mxu2 %v6488_v23  ;;  %6538 = vmatpush.bf16.msrb.mxu3 %v6489_v2 }
 0x936   :  { %8699 = vmatmul.msk.bf16.vlgmr.msra.gmra.mxu0 %vm3192_vm2, %v6481_v58  ;;  %8700 = vmatmul.msk.bf16.vlgmr.msra.gmra.mxu1 %vm3192_vm2, %v6481_v58 }
 0x939   :  { %6526 = vmatpush.bf16.msrb.mxu2 %v6484_v34  ;;  %6539 = vmatpush.bf16.msrb.mxu3 %v6485_v21 }
 0x93c   :  { %8701 = vmatmul.msk.bf16.vlgmr.msrb.gmra.mxu2 %vm3192_vm2, %v6481_v58  ;;  %8702 = vmatmul.msk.bf16.vlgmr.msrb.gmra.mxu3 %vm3192_vm2, %v6481_v58 }
 0x9b3   :  { %v6502_v35 = vpop.f32.mrf.mxu0  ;;  %v6515_v41 = vpop.f32.mrf.mxu1 }
 0x9b4   :  { %v6549_v20 = vrot.slane %v6515_v41, 6 }
 0x9b6   :  { %v6553_v36 = vsel %vm6552_vm3, %v6502_v35, %v6549_v20 }
 0x9bb   :  { %v6504_v8 = vpop.f32.mrf.mxu0  ;;  %v6517_v32 = vpop.f32.mrf.mxu1 }
 0x9bf   :  { %v6528_v12 = vpop.f32.mrf.mxu2  ;;  %v6541_v37 = vpop.f32.mrf.mxu3 }
 0x9c0   :  { %v6550_v46 = vrot.slane %v6528_v12, 4  ;;  %v6551_v4 = vrot.slane %v6541_v37, 2 }
 0x9c2   :  { %v6555_v47 = vsel %vm6554_vm4, %v6550_v46, %v6551_v4 }
 0x9c3   :  { %v6557_v17 = vsel %vm6556_vm5, %v6553_v36, %v6555_v47 }
 0x9c4   :  { %6559 = vst [vmem:[#allocation28] sm:$0xff] %v6557_v17 }
 0x9c5   :  { %6570 = dma.vmem_to_hbm [thread:$0]  %s6566_s9, 128, %s6568_s14, [#allocation4]  }
 0x9c7   :  { %v6530_v43 = vpop.f32.mrf.mxu2  ;;  %v6543_v48 = vpop.f32.mrf.mxu3 }
 0x9c8   :  { %9680 = dma.done.wait [#allocation4], 128  }
 0x9c9   :  { %9681 = vsyncadd [#allocation4], 4294967168 }
 0x9ca   :  { %6575 = vsyncpa [#allocation3], 1 }
 0x9cb   :  { %6576 = vsyncpa [#allocation6], 1 }
 0x9cc   :  { %6577 = vsyncpa [#allocation9], 1 }
 0x9cd   :  { %6578 = vsyncpa [#allocation12], 1 }
 0x9ce   :  { %6579 = vsyncpa [#allocation15], 1 }
 0x9cf   :  { %6580 = vsyncpa [#allocation18], 1 }
 0x9d0   :  { %6581 = vsyncpa [#allocation21], 1 }
 0x9d1   :  { %6582 = vsyncpa [#allocation24], 1 }
 0x9d2   :  { %6583 = vsyncpa [#allocation27], 1 }
 0x9d3   :  { %6584 = vsyncpa [#allocation4], 1 }

</bundles_post_ra>
